<compile_context>
chip_gen: v7x
topology: tpu7x:2x2x1
jax: 0.10.0
libtpu: 0.0.40
codegen_flags: <defaults>
</compile_context>

<pallas_src>
import functools

import jax
import jax.numpy as jnp
import numpy as np
from jax.experimental import pallas as pl
from jax.experimental.pallas import tpu as pltpu


def sine_layer_kernel(x_ref, w_ref, b_ref, o_ref):
    # x_ref: (tm, Cin)  w_ref: (Cin, Cout_p)  b_ref: (1, Cout_p)  o_ref: (tm, Cout_p)
    h = jnp.dot(x_ref[...], w_ref[...], preferred_element_type=jnp.float32)
    o_ref[...] = jnp.sin(h + b_ref[...]).astype(o_ref.dtype)


def sine_layer_forward(x, weight, bias=None, *, omega=30.0, tm=256, lane=128):
    """SineLayer forward.

    x      : [..., in_features] float array
    weight : [out_features, in_features]  (PyTorch nn.Linear layout)
    bias   : [out_features] or None
    """
    orig_shape = x.shape
    cin = orig_shape[-1]
    cout = weight.shape[0]
    m = int(np.prod(orig_shape[:-1]))
    out_dtype = x.dtype

    x2 = x.reshape(m, cin)

    # Fold omega into the (tiny) parameters, pre-transpose W -> [Cin, Cout],
    # and zero-pad the out dim to a lane-dense multiple of 128.
    cout_p = ((cout + lane - 1) // lane) * lane
    w_t = jnp.pad(weight.T.astype(jnp.float32) * jnp.float32(omega),
                  ((0, 0), (0, cout_p - cout)))
    if bias is not None:
        b_row = jnp.pad(bias.astype(jnp.float32).reshape(1, cout) * jnp.float32(omega),
                        ((0, 0), (0, cout_p - cout)))
    else:
        b_row = jnp.zeros((1, cout_p), jnp.float32)

    # Pad rows up to a multiple of the row tile so the grid divides exactly.
    tm = min(tm, ((m + 7) // 8) * 8)          # don't over-tile tiny inputs
    tm = max(tm, 8)
    m_p = ((m + tm - 1) // tm) * tm
    if m_p != m:
        x2 = jnp.pad(x2, ((0, m_p - m), (0, 0)))

    out = pl.pallas_call(
        sine_layer_kernel,
        out_shape=jax.ShapeDtypeStruct((m_p, cout_p), out_dtype),
        grid=(m_p // tm,),
        in_specs=[
            pl.BlockSpec((tm, cin), lambda i: (i, 0)),       # x row tile (pipelined)
            pl.BlockSpec((cin, cout_p), lambda i: (0, 0)),   # W resident in VMEM
            pl.BlockSpec((1, cout_p), lambda i: (0, 0)),     # b resident in VMEM
        ],
        out_specs=pl.BlockSpec((tm, cout_p), lambda i: (i, 0)),
        compiler_params=pltpu.CompilerParams(
            dimension_semantics=("parallel",)),
    )(x2, w_t, b_row)

    return out[:m, :cout].reshape(*orig_shape[:-1], cout)


def init_params(key, in_features, out_features):
    """Deterministic init matching the module: W ~ U(-1/in, 1/in);
    bias keeps the default nn.Linear init U(-1/sqrt(in), 1/sqrt(in))."""
    kw, kb = jax.random.split(key, 2)
    w = jax.random.uniform(kw, (out_features, in_features), jnp.float32,
                           -1.0 / in_features, 1.0 / in_features)
    bound = 1.0 / np.sqrt(in_features)
    b = jax.random.uniform(kb, (out_features,), jnp.float32, -bound, bound)
    return w, b


def reference_forward(x, weight, bias, omega=30.0):
    """Pure-JAX reference matching the PyTorch SineLayer."""
    h = jnp.einsum("...i,oi->...o", x, weight,
                   precision=jax.lax.Precision.HIGHEST)
    if bias is not None:
        h = h + bias
    return jnp.sin(omega * h)


if __name__ == "__main__":
    B, S = 2, 200          # flattened rows M = 400 -> padded -> row tiles
    C_IN, C_OUT = 16, 32
    OMEGA = 30.0

    key = jax.random.PRNGKey(0)
    kx, kp = jax.random.split(key, 2)

    x = jax.random.normal(kx, (B, S, C_IN), dtype=jnp.float32)
    weight, bias = init_params(kp, C_IN, C_OUT)

    out = sine_layer_forward(x, weight, bias, omega=OMEGA)
    out = jax.block_until_ready(out)

    ref = reference_forward(x, weight, bias, omega=OMEGA)
    np.testing.assert_allclose(np.asarray(out), np.asarray(ref),
                               rtol=5e-4, atol=5e-4)
    assert out.shape == (B, S, C_OUT)
    print("KERNEL_OK")
</pallas_src>

<mosaic_0001>
module attributes {stable_mosaic.version = 11 : i64} {
  func.func @sine_layer_kernel(%arg0: i32, %arg1: memref<256x16xf32, #tpu.memory_space<vmem>>, %arg2: memref<16x128xf32, #tpu.memory_space<vmem>>, %arg3: memref<1x128xf32, #tpu.memory_space<vmem>>, %arg4: memref<256x128xf32, #tpu.memory_space<vmem>>) attributes {dimension_semantics = [#tpu.dimension_semantics<parallel>], iteration_bounds = array<i64: 2>, scalar_prefetch = 0 : i64, scratch_operands = 0 : i64, tpu.core_type = #tpu.core_type<tc>, window_params = [{transform_indices = @transform_0, window_bounds = array<i64: 256, 16>}, {pipeline_mode = #tpu.pipeline_mode<synchronous>, transform_indices = @transform_1, window_bounds = array<i64: 16, 128>}, {pipeline_mode = #tpu.pipeline_mode<synchronous>, transform_indices = @transform_2, window_bounds = array<i64: 1, 128>}, {transform_indices = @transform_3, window_bounds = array<i64: 256, 128>}]} {
    %c0 = arith.constant 0 : index
    %c0_0 = arith.constant 0 : index
    %0 = vector.load %arg1[%c0, %c0_0] : memref<256x16xf32, #tpu.memory_space<vmem>>, vector<256x16xf32>
    %c0_1 = arith.constant 0 : index
    %c0_2 = arith.constant 0 : index
    %1 = vector.load %arg2[%c0_1, %c0_2] : memref<16x128xf32, #tpu.memory_space<vmem>>, vector<16x128xf32>
    %cst = arith.constant dense<0.000000e+00> : vector<256x128xf32>
    %2 = tpu.matmul %0, %1, %cst {dimension_numbers = #tpu.dot_dimension_numbers<[1], [0], [0], [1], [0, 0, 1, 1], [], []>} : vector<256x16xf32>, vector<16x128xf32>, vector<256x128xf32> -> vector<256x128xf32>
    %c0_3 = arith.constant 0 : index
    %c0_4 = arith.constant 0 : index
    %3 = vector.load %arg3[%c0_3, %c0_4] : memref<1x128xf32, #tpu.memory_space<vmem>>, vector<1x128xf32>
    %4 = vector.broadcast %3 : vector<1x128xf32> to vector<256x128xf32>
    %5 = arith.addf %2, %4 : vector<256x128xf32>
    %6 = math.sin %5 : vector<256x128xf32>
    %c0_5 = arith.constant 0 : index
    %c0_6 = arith.constant 0 : index
    %7 = vector.load %arg4[%c0_5, %c0_6] : memref<256x128xf32, #tpu.memory_space<vmem>>, vector<256x128xf32>
    tpu.vector_store %arg4[%c0_5, %c0_6], %6 {strides = array<i32>} : memref<256x128xf32, #tpu.memory_space<vmem>>, vector<256x128xf32>,
    return
  }
  func.func @transform_0(%arg0: i32) -> (i32, i32) {
    %c0_i32 = arith.constant 0 : i32
    %c0_i32_0 = arith.constant 0 : i32
    return %arg0, %c0_i32 : i32, i32
  }
  func.func @transform_1(%arg0: i32) -> (i32, i32) {
    %c0_i32 = arith.constant 0 : i32
    %c0_i32_0 = arith.constant 0 : i32
    %c0_i32_1 = arith.constant 0 : i32
    return %c0_i32, %c0_i32_0 : i32, i32
  }
  func.func @transform_2(%arg0: i32) -> (i32, i32) {
    %c0_i32 = arith.constant 0 : i32
    %c0_i32_0 = arith.constant 0 : i32
    %c0_i32_1 = arith.constant 0 : i32
    return %c0_i32, %c0_i32_0 : i32, i32
  }
  func.func @transform_3(%arg0: i32) -> (i32, i32) {
    %c0_i32 = arith.constant 0 : i32
    %c0_i32_0 = arith.constant 0 : i32
    return %arg0, %c0_i32 : i32, i32
  }
}

</mosaic_0001>

<bundles_post_ra>
// kernel: tpu_custom_call.1
= control target key start
LH: loop header
LB: loop body
LE: loop exit
PB: predicated region body
PF: predicated region fallthrough
CT: control target
= control target key end

     0   :  { %8 = vsyncpa [#allocation3], 0  ;;  %s7486_s0 = inlined_call_operand.vmem [shape: f32[512,16], index: 0, kind: input, shape index: {}]   ;;  %s7487_s1 = inlined_call_operand.vmem [shape: f32[16,128], index: 1, kind: input, shape index: {}]   ;;  %s7488_s2 = inlined_call_operand.vmem [shape: f32[1,128], index: 2, kind: input, shape index: {}]   ;;  %s7489_s3 = inlined_call_operand.hbm [shape: f32[512,128], index: 3, kind: output, shape index: {}]  }
   0x1   :  { %10 = vsyncpa [#allocation3 + $0x1], 0  ;;  %s4638_s12 = smov 0   ;;  %s4640_s13 = smov 0  }
   0x2   :  { %s4642_s14 = smov 0   ;;  %s4644_s15 = smov 0  }
   0x3 LB: > { %s4659_s16 = sadd.s32 4294967295, %s4607_s15   ;;  %s3971_s17 = sadd.s32 4294967294, %s4607_s15   ;;  %s4607_s15 = sphi %s4644_s15, %s7555_s15   ;;  %s4603_s14 = sphi %s4642_s14, %s7554_s14   ;;  %s4599_s13 = sphi %s4640_s13, %s7553_s13   ;;  %s4595_s12 = sphi %s4638_s12, %s7552_s12  }
   0x4   : > { %s4663_s18 = sadd.s32 1, %s4607_s15   ;;  %s91_s19 = sadd.s32 1, %s4603_s14 }
   0x5   : > { %s88_s20 = ssub.s32 %s4607_s15, %s4663_s18  ;;  %p101_p0 = scmp.ne.s32.totalorder %s4603_s14, %s4599_s13 }
   0x6   : > { %p89_p1 = scmp.eq.s32.totalorder %s88_s20, 0  ;;  %p102_p2 = scmp.eq.s32.totalorder %s4659_s16, 1 }
   0x7   : > { %p107_p3 = scmp.ne.s32.totalorder %s4599_s13, %s4595_s12  ;;  %p108_p4 = scmp.eq.s32.totalorder %s3971_s17, 1 }
   0x8   : > { %s4674_s21 = scalar_select %p89_p1, %s4603_s14, %s91_s19  }
   0x9   : > { %p4676_p5 = por %p102_p2, %p101_p0  ;;  %p4680_p6 = por %p108_p4, %p107_p3 }
   0xa   : > { %p3974_p7 = scmp.ge.s32.totalorder %s4607_s15, 1  ;;  %p141_p8 = scmp.lt.s32.totalorder %s4607_s15, 3 }
   0xc   : > { %p142_p9 = pnand %p3974_p7, %p141_p8 }
   0xd   : > { %v204_v0 = vld [vmem:[%s7487_s1] sm:$0xff] (!%p142_p9)  ;;  %v205_v1 = vld [vmem:[%s7487_s1 + $0x8] sm:$0xff] (!%p142_p9)  ;;  %s3976_s28 = sshll.u32 (!%p142_p9), %s4659_s16, 5  ;;  %vm213_vm0 = vcmask (!%p142_p9), 130048   ;;  %s162_s8 = sand.u32 (!%p142_p9), 1, %s4599_s13  }
   0xe   : > { %145 = sbr.rel (%p142_p9) target bundleno = 1083 (0x43b), region = 32  ;;  %v4231_v2 = vpack.c.bf16 (!%p142_p9), %v205_v1, %v204_v0  ;;  %p166_p10 = scmp.lt.s32.totalorder (!%p142_p9), %s3976_s28, 63  ;;  %v4765_v35 = vld [vmem:[%s7488_s2] ss:$0 sm:$0xff] (!%p142_p9) }
   0xf   : > { %s3975_s9 = sshll.u32 (!%p142_p9), %s162_s8, 8  ;;  %s4144_s30 = sshll.u32 (!%p142_p9), %s4659_s16, 12 }
  0x10   : > { %4232 = vmatprep.subr.bf16.mxu0 (!%p142_p9), %v4231_v2  ;;  %4235 = vmatprep.subr.bf16.mxu1 (!%p142_p9), %v4231_v2  ;;  %s5083_s10 = scalar_lea.vmem (!%p142_p9), [#allocation2], %s3975_s9  ;;  %s7437_s7 = scalar_lea.hbm (!%p142_p9), %s7489_s3, %s4144_s30 }
  0x11   : > { %4234 = vmatpush3.bf16.msra.mxu0 (!%p142_p9), %v4231_v2  ;;  %4236 = vmatpush3.bf16.msra.mxu1 (!%p142_p9), %v4231_v2  ;;  %s3909_s4 = sshll.u32 (!%p142_p9), %s5083_s10, 4  ;;  %s7445_s16 = scalar_lea.sflag (!%p142_p9), [#allocation3], %s162_s8  ;;  %s7439_s4 = int_to_ptr.vmem [resolvable:$true] %s3909_s4 }
  0x12   : > { %s4545_s9 = scalar_lea.vmem (!%p142_p9), %s7439_s4, 4096  ;;  %s4615_s11 = smov (!%p142_p9), [#allocation2]  }
  0x13   : > { %p4546_p11 = scmp.ne.s32.totalorder (!%p142_p9), %s7439_s4, %s4545_s9  ;;  %s4549_s17 = sshll.u32 (!%p142_p9), %s4615_s11, 4  ;;  %s4550_s17 = int_to_ptr.vmem [resolvable:$false] %s4549_s17 }
  0x14   : > { %s4551_s19 = scalar_lea.vmem (!%p142_p9), %s4550_s17, 8192  ;;  %p4552_p0 = scmp.lt.s32.totalorder (!%p142_p9), %s7439_s4, %s4550_s17 }
  0x15   : > { %s7557_s28 = smov (!%p166_p10, %s3976_s28), 63  ;;  %p4547_p12 = pnand %p4546_p11, %p4676_p5 }
  0x16   : > { %s3977_s29 = sshll.u32 %s7557_s28, 3  ;;  %p4553_p1 = scmp.lt.s32.totalorder %s4551_s19, %s4545_s9 }
  0x17   : > { %s4696_s5 = scalar_lea.vmem %s7486_s0, %s3977_s29  ;;  %p4548_p13 = pneg %p4547_p12 }
  0x18   : > { %v172_v3 = vld [vmem:[%s4696_s5] sm:$0xff]  ;;  %v173_v5 = vld [vmem:[%s4696_s5 + $0x8] sm:$0xff]  ;;  %v174_v7 = vld [vmem:[%s4696_s5 + $0x10] sm:$0xff]  ;;  %p4554_p2 = por %p4553_p1, %p4552_p0 }
  0x19   : > { %v188_v4 = vld [vmem:[%s4696_s5 + $0x80] sm:$0xff]  ;;  %4183 = vmatprep.mubr.msk.f32.mxu0 %vm213_vm0, %v172_v3  ;;  %v189_v6 = vld [vmem:[%s4696_s5 + $0x88] sm:$0xff]  ;;  %v190_v8 = vld [vmem:[%s4696_s5 + $0x90] sm:$0xff] }
  0x1a   : > { %4207 = vmatprep.mubr.msk.f32.mxu1 %vm213_vm0, %v188_v4  ;;  %4184 = vmatmul.mubr.msk.f32.vlgmr.msra.gmra.mrb[0].mxu0 %vm213_vm0, %v173_v5  ;;  %v175_v9 = vld [vmem:[%s4696_s5 + $0x18] sm:$0xff]  ;;  %v176_v11 = vld [vmem:[%s4696_s5 + $0x20] sm:$0xff]  ;;  %v177_v13 = vld [vmem:[%s4696_s5 + $0x28] sm:$0xff]  ;;  %p4555_p3 = pnand %p4554_p2, %p4548_p13 }
  0x1b   : > { %4208 = vmatmul.mubr.msk.f32.vlgmr.msra.gmra.mrb[0].mxu1 %vm213_vm0, %v189_v6  ;;  %4186 = vmatprep.mubr.msk.f32.mxu0 %vm213_vm0, %v174_v7  ;;  %v191_v10 = vld [vmem:[%s4696_s5 + $0x98] sm:$0xff]  ;;  %v192_v12 = vld [vmem:[%s4696_s5 + $0xa0] sm:$0xff]  ;;  %v193_v14 = vld [vmem:[%s4696_s5 + $0xa8] sm:$0xff] }
  0x1c   : > { %4210 = vmatprep.mubr.msk.f32.mxu1 %vm213_vm0, %v190_v8  ;;  %v178_v15 = vld [vmem:[%s4696_s5 + $0x30] sm:$0xff]  ;;  %v179_v17 = vld [vmem:[%s4696_s5 + $0x38] sm:$0xff]  ;;  %v180_v19 = vld [vmem:[%s4696_s5 + $0x40] sm:$0xff] }
  0x1d   : > { %v194_v16 = vld [vmem:[%s4696_s5 + $0xb0] sm:$0xff]  ;;  %v195_v18 = vld [vmem:[%s4696_s5 + $0xb8] sm:$0xff]  ;;  %v196_v20 = vld [vmem:[%s4696_s5 + $0xc0] sm:$0xff] }
  0x1e   : > { %4187 = vmatmul.mubr.msk.f32.gmra.mrb[2].mxu0 %vm213_vm0, %v175_v9  ;;  %v181_v21 = vld [vmem:[%s4696_s5 + $0x48] sm:$0xff]  ;;  %v182_v23 = vld [vmem:[%s4696_s5 + $0x50] sm:$0xff]  ;;  %v183_v25 = vld [vmem:[%s4696_s5 + $0x58] sm:$0xff] }
  0x1f   : > { %4211 = vmatmul.mubr.msk.f32.gmra.mrb[2].mxu1 %vm213_vm0, %v191_v10  ;;  %4189 = vmatprep.mubr.msk.f32.mxu0 %vm213_vm0, %v176_v11  ;;  %v197_v22 = vld [vmem:[%s4696_s5 + $0xc8] sm:$0xff]  ;;  %v198_v24 = vld [vmem:[%s4696_s5 + $0xd0] sm:$0xff]  ;;  %v199_v26 = vld [vmem:[%s4696_s5 + $0xd8] sm:$0xff] }
  0x20   : > { %4213 = vmatprep.mubr.msk.f32.mxu1 %vm213_vm0, %v192_v12  ;;  %v184_v27 = vld [vmem:[%s4696_s5 + $0x60] sm:$0xff]  ;;  %v185_v29 = vld [vmem:[%s4696_s5 + $0x68] sm:$0xff]  ;;  %v186_v31 = vld [vmem:[%s4696_s5 + $0x70] sm:$0xff]  ;;  %v4609_v12 = vmov 683565275  }
  0x21   : > { %v200_v28 = vld [vmem:[%s4696_s5 + $0xe0] sm:$0xff]  ;;  %v201_v30 = vld [vmem:[%s4696_s5 + $0xe8] sm:$0xff]  ;;  %v202_v32 = vld [vmem:[%s4696_s5 + $0xf0] sm:$0xff] }
  0x22   : > { %4190 = vmatmul.mubr.msk.f32.gmra.mrb[4].mxu0 %vm213_vm0, %v177_v13  ;;  %v187_v33 = vld [vmem:[%s4696_s5 + $0x78] sm:$0xff] }
  0x23   : > { %4214 = vmatmul.mubr.msk.f32.gmra.mrb[4].mxu1 %vm213_vm0, %v193_v14  ;;  %4192 = vmatprep.mubr.msk.f32.mxu0 %vm213_vm0, %v178_v15  ;;  %v203_v34 = vld [vmem:[%s4696_s5 + $0xf8] sm:$0xff] }
  0x24   : > { %4216 = vmatprep.mubr.msk.f32.mxu1 %vm213_vm0, %v194_v16  ;;  %v4610_v16 = vmov 2475754826  }
  0x26   : > { %4193 = vmatmul.mubr.msk.f32.gmra.mrb[6].mxu0 %vm213_vm0, %v179_v17 }
  0x27   : > { %4217 = vmatmul.mubr.msk.f32.gmra.mrb[6].mxu1 %vm213_vm0, %v195_v18  ;;  %4195 = vmatprep.mubr.msk.f32.mxu0 %vm213_vm0, %v180_v19  ;;  %v4611_v18 = vmov 2131351028  }
  0x28   : > { %4219 = vmatprep.mubr.msk.f32.mxu1 %vm213_vm0, %v196_v20  ;;  %v4612_v20 = vmov 2102212464  }
  0x2a   : > { %4196 = vmatmul.mubr.msk.f32.gmra.mrb[8].mxu0 %vm213_vm0, %v181_v21 }
  0x2b   : > { %4220 = vmatmul.mubr.msk.f32.gmra.mrb[8].mxu1 %vm213_vm0, %v197_v22  ;;  %4198 = vmatprep.mubr.msk.f32.mxu0 %vm213_vm0, %v182_v23  ;;  %v4613_v22 = vmov 920167782  }
  0x2c   : > { %4222 = vmatprep.mubr.msk.f32.mxu1 %vm213_vm0, %v198_v24 }
  0x2e   : > { %4199 = vmatmul.mubr.msk.f32.gmra.mrb[10].mxu0 %vm213_vm0, %v183_v25 }
  0x2f   : > { %4223 = vmatmul.mubr.msk.f32.gmra.mrb[10].mxu1 %vm213_vm0, %v199_v26  ;;  %4201 = vmatprep.mubr.msk.f32.mxu0 %vm213_vm0, %v184_v27 }
  0x30   : > { %4225 = vmatprep.mubr.msk.f32.mxu1 %vm213_vm0, %v200_v28 }
  0x32   : > { %4202 = vmatmul.mubr.msk.f32.gmra.mrb[12].mxu0 %vm213_vm0, %v185_v29  ;;  %v4614_v29 = vmov 1326507024  }
  0x33   : > { %4226 = vmatmul.mubr.msk.f32.gmra.mrb[12].mxu1 %vm213_vm0, %v201_v30  ;;  %4204 = vmatprep.mubr.msk.f32.mxu0 %vm213_vm0, %v186_v31 }
  0x34   : > { %4228 = vmatprep.mubr.msk.f32.mxu1 %vm213_vm0, %v202_v32 }
  0x36   : > { %4205 = vmatmul.mubr.msk.f32.gmra.mrb[14].mxu0 %vm213_vm0, %v187_v33 }
  0x37   : > { %4229 = vmatmul.mubr.msk.f32.gmra.mrb[14].mxu1 %vm213_vm0, %v203_v34 }
  0xed   : > { %v4185_v36 = vpop.f32.mrb[0].mxu0 }
  0xee   : > { %v4209_v37 = vpop.f32.mrb[0].mxu1  ;;  %v4768_v38 = vadd.f32 %v4185_v36, %v4765_v35  ;;  %v376_v40 = vpop.f32.mrb[1].mxu0 }
  0xef   : > { %v4771_v39 = vadd.f32 %v4209_v37, %v4765_v35  ;;  %v456_v41 = vpop.f32.mrb[1].mxu1  ;;  %v4774_v42 = vadd.f32 %v4765_v35, %v376_v40 }
  0xf0   : > { %v639_v43 = vand.u32 2147483647, %v4768_v38  ;;  %v642_v44 = vand.u32 2139095040, %v4768_v38  ;;  %v4792_v60 = vadd.f32 %v4765_v35, %v456_v41  ;;  %vm641_vm14 = vcmp.lt.s32.totalorder %v4768_v38, 0 }
  0xf1   : > { %v2303_v45 = vand.u32 2147483647, %v4771_v39  ;;  %v2306_v46 = vand.u32 2139095040, %v4771_v39  ;;  %v4780_v47 = vpop.f32.mrb[2].mxu0  ;;  %v538_v53 = vand.u32 2139095040, %v4774_v42 }
  0xf2   : > { %v4782_v48 = vpop.f32.mrb[2].mxu1  ;;  %v643_v49 = vshrl.u32 %v642_v44, 23  ;;  %v646_v50 = vand.u32 8388607, %v639_v43  ;;  %v4789_v55 = vpop.f32.mrb[3].mxu0  ;;  %v2202_v10 = vand.u32 2139095040, %v4792_v60 }
  0xf3   : > { %v2307_v51 = vshrl.u32 %v2306_v46, 23  ;;  %v2310_v52 = vand.u32 8388607, %v2303_v45  ;;  %v539_v57 = vshrl.u32 %v538_v53, 23  ;;  %v535_v63 = vand.u32 2147483647, %v4774_v42 }
  0xf4   : > { %v4015_v54 = vadd.s32 4294967169, %v643_v49  ;;  %v647_v58 = vor.u32 8388608, %v646_v50  ;;  %v4795_v1 = vpop.f32.mrb[3].mxu1  ;;  %vm4895_vm15 = vcmp.le.f32.partialorder %v639_v43, 0.7853982 }
  0xf5   : > { %v4079_v56 = vadd.s32 4294967169, %v2307_v51  ;;  %v2311_v61 = vor.u32 8388608, %v2310_v52  ;;  %v4011_v0 = vadd.s32 4294967169, %v539_v57  ;;  %v4803_v8 = vand.u32 8388607, %v535_v63 }
  0xf6   : > { %v649_v59 = vadd.s32 1, %v4015_v54  ;;  %v4797_v5 = vshll.u32 %v647_v58, 8 }
  0xf7   : > { %v2313_v62 = vadd.s32 1, %v4079_v56  ;;  %v4799_v7 = vshll.u32 %v2311_v61, 8  ;;  %v4805_v9 = vadd.s32 1, %v4011_v0 }
  0xf8   : > { %vm650_vm1 = vcmp.gt.s32.totalorder %v649_v59, 0 }
  0xf9   : > { %v651_v2 = vsel %vm650_vm1, %v649_v59, 0  ;;  %vm2314_vm2 = vcmp.gt.s32.totalorder %v2313_v62, 0  ;;  %vm546_vm7 = vcmp.gt.s32.totalorder %v4805_v9, 0 }
  0xfa   : > { %v652_v3 = vshrl.u32 %v651_v2, 5  ;;  %v653_v4 = vand.u32 31, %v651_v2  ;;  %v2315_v6 = vsel %vm2314_vm2, %v2313_v62, 0 }
  0xfb   : > { %v4809_v14 = vshrl.u32 %v2315_v6, 5  ;;  %v2317_v15 = vand.u32 31, %v2315_v6 }
  0xfc   : > { %v654_v11 = vsub.s32 32, %v653_v4  ;;  %v656_v13 = vshll.u32 %v4609_v12, %v653_v4  ;;  %v659_v17 = vshll.u32 %v4610_v16, %v653_v4  ;;  %v662_v19 = vshll.u32 %v4611_v18, %v653_v4 }
  0xfd   : > { %v665_v21 = vshll.u32 %v4612_v20, %v653_v4  ;;  %v668_v23 = vshll.u32 %v4613_v22, %v653_v4  ;;  %vm671_vm3 = vcmp.lt.s32.totalorder %v652_v3, 1  ;;  %vm672_vm4 = vcmp.lt.s32.totalorder %v652_v3, 2 }
  0xfe   : > { %v657_v24 = vshrl.u32 %v4610_v16, %v654_v11  ;;  %v660_v25 = vshrl.u32 %v4611_v18, %v654_v11  ;;  %v663_v26 = vshrl.u32 %v4612_v20, %v654_v11  ;;  %v655_v27 = vshrl.u32 %v4609_v12, %v654_v11 }
  0xff   : > { %v666_v28 = vshrl.u32 %v4613_v22, %v654_v11  ;;  %v669_v30 = vshrl.u32 %v4614_v29, %v654_v11  ;;  %v2318_v34 = vsub.s32 32, %v2317_v15  ;;  %vm673_vm5 = vcmp.lt.s32.totalorder %v652_v3, 3 }
 0x100   : > { %v658_v31 = vor.u32 %v657_v24, %v656_v13  ;;  %v661_v32 = vor.u32 %v660_v25, %v659_v17  ;;  %v664_v33 = vor.u32 %v663_v26, %v662_v19  ;;  %vm674_vm6 = vcmp.lt.s32.totalorder %v652_v3, 4 }
 0x101   : > { %v667_v36 = vor.u32 %v666_v28, %v665_v21  ;;  %v670_v37 = vor.u32 %v669_v30, %v668_v23  ;;  %v2320_v52 = vshll.u32 %v4609_v12, %v2317_v15  ;;  %v2321_v56 = vshrl.u32 %v4610_v16, %v2318_v34 }
 0x102   : > { %v675_v40 = vsel %vm671_vm3, %v655_v27, %v658_v31  ;;  %v676_v41 = vsel %vm674_vm6, %v664_v33, 2102212464  ;;  %v679_v44 = vsel %vm671_vm3, %v658_v31, %v661_v32  ;;  %v683_v46 = vsel %vm671_vm3, %v661_v32, %v664_v33 }
 0x103   : > { %v677_v49 = vsel %vm673_vm5, %v661_v32, %v676_v41  ;;  %v680_v50 = vsel %vm674_vm6, %v667_v36, 920167782  ;;  %v684_v51 = vsel %vm674_vm6, %v670_v37, 1326507024  ;;  %v2323_v57 = vshll.u32 %v4610_v16, %v2317_v15 }
 0x104   : > { %v681_v53 = vsel %vm673_vm5, %v664_v33, %v680_v50  ;;  %v685_v54 = vsel %vm673_vm5, %v667_v36, %v684_v51  ;;  %v678_v58 = vsel %vm672_vm4, %v675_v40, %v677_v49  ;;  %v2324_v62 = vshrl.u32 %v4611_v18, %v2318_v34 }
 0x105   : > { %v682_v59 = vsel %vm672_vm4, %v679_v44, %v681_v53  ;;  %v686_v61 = vsel %vm672_vm4, %v683_v46, %v685_v54  ;;  %v2322_v11 = vor.u32 %v2321_v56, %v2320_v52  ;;  %v2326_v17 = vshll.u32 %v4611_v18, %v2317_v15 }
 0x106   : > { %v4833_v0 = vmul.u32.u64.low %v4797_v5, %v686_v61  ;;  %v4834_v2 = vmul.u32.u64.high %v4797_v5, %v686_v61, %v4833_v0  ;;  %v4837_v4 = vmul.u32.u64.low %v4797_v5, %v682_v59  ;;  %v4838_v6 = vmul.u32.u64.high %v4797_v5, %v682_v59, %v4837_v4 }
 0x107   : > { %v2325_v13 = vor.u32 %v2324_v62, %v2323_v57  ;;  %v2327_v19 = vshrl.u32 %v4612_v20, %v2318_v34  ;;  %v2319_v21 = vshrl.u32 %v4609_v12, %v2318_v34  ;;  %v2329_v3 = vshll.u32 %v4612_v20, %v2317_v15 }
 0x108   : > { %v2330_v23 = vshrl.u32 %v4613_v22, %v2318_v34  ;;  %v2333_v24 = vshrl.u32 %v4614_v29, %v2318_v34  ;;  %v694_v25 = vmul.u32 %v4797_v5, %v678_v58  ;;  %v2332_v27 = vshll.u32 %v4613_v22, %v2317_v15 }
 0x109   : > { %v2328_v26 = vor.u32 %v2327_v19, %v2326_v17  ;;  %vm2335_vm8 = vcmp.lt.s32.totalorder %v4809_v14, 1  ;;  %vm696_vm9 = vc.u32 %v4834_v2, %v4837_v4  ;;  %v697_v28 = vadd.s32 1, %v4838_v6  ;;  %v4878_v17 = vpop.f32.mrb[4].mxu0 }
 0x10a   : > { %v2331_v30 = vor.u32 %v2330_v23, %v2329_v3  ;;  %vm2336_vm10 = vcmp.lt.s32.totalorder %v4809_v14, 2  ;;  %v2334_v31 = vor.u32 %v2333_v24, %v2332_v27  ;;  %vm2337_vm11 = vcmp.lt.s32.totalorder %v4809_v14, 3 }
 0x10b   : > { %vm2338_vm12 = vcmp.lt.s32.totalorder %v4809_v14, 4  ;;  %v2343_v32 = vsel %vm2335_vm8, %v2322_v11, %v2325_v13  ;;  %v698_v5 = vsel %vm696_vm9, %v697_v28, %v4838_v6  ;;  %v2347_v15 = vsel %vm2335_vm8, %v2325_v13, %v2328_v26 }
 0x10c   : > { %v2340_v33 = vsel %vm2338_vm12, %v2328_v26, 2102212464  ;;  %v2344_v34 = vsel %vm2338_vm12, %v2331_v30, 920167782  ;;  %v699_v36 = vadd.s32 %v698_v5, %v694_v25  ;;  %v2339_v37 = vsel %vm2335_vm8, %v2319_v21, %v2322_v11 }
 0x10d   : > { %v2345_v40 = vsel %vm2337_vm11, %v2328_v26, %v2344_v34  ;;  %v2348_v41 = vsel %vm2338_vm12, %v2334_v31, 1326507024  ;;  %v2341_v44 = vsel %vm2337_vm11, %v2325_v13, %v2340_v33  ;;  %v547_v50 = vsel %vm546_vm7, %v4805_v9, 0 }
 0x10e   : > { %v2346_v46 = vsel %vm2336_vm10, %v2343_v32, %v2345_v40  ;;  %v2349_v49 = vsel %vm2337_vm11, %v2331_v30, %v2348_v41  ;;  %v700_v51 = vadd.s32 536870912, %v699_v36  ;;  %v2199_v58 = vand.u32 2147483647, %v4792_v60 }
 0x10f   : > { %v2350_v52 = vsel %vm2336_vm10, %v2347_v15, %v2349_v49  ;;  %v4863_v53 = vmul.u32.u64.low %v4799_v7, %v2346_v46  ;;  %v4864_v54 = vmul.u32.u64.high %v4799_v7, %v2346_v46, %v4863_v53  ;;  %v2342_v61 = vsel %vm2336_vm10, %v2339_v37, %v2341_v44 }
 0x110   : > { %v4868_v56 = vmul.u32.u64.low %v4799_v7, %v2350_v52  ;;  %v4869_v57 = vmul.u32.u64.high %v4799_v7, %v2350_v52, %v4868_v56  ;;  %v701_v59 = vshrl.u32 %v700_v51, 30  ;;  %v543_v9 = vor.u32 8388608, %v4803_v8 }
 0x111   : > { %v549_v62 = vand.u32 31, %v547_v50  ;;  %v2361_v6 = vadd.s32 1, %v4864_v54  ;;  %v2203_v13 = vshrl.u32 %v2202_v10, 23  ;;  %v2358_v19 = vmul.u32 %v4799_v7, %v2342_v61 }
 0x112   : > { %v702_v0 = vshll.u32 %v701_v59, 30  ;;  %vm2360_vm13 = vc.u32 %v4869_v57, %v4863_v53  ;;  %v4885_v14 = vand.u32 8388607, %v2199_v58  ;;  %v4891_v3 = vshll.u32 %v543_v9, 8 }
 0x113   : > { %v550_v11 = vsub.s32 32, %v549_v62  ;;  %v2362_v21 = vsel %vm2360_vm13, %v2361_v6, %v4864_v54  ;;  %v695_v7 = vadd.s32 %v4837_v4, %v4834_v2  ;;  %v4900_v24 = vshrl.u32 %v547_v50, 5 }
 0x114   : > { %v4888_v8 = vsub.s32 %v699_v36, %v702_v0  ;;  %v2363_v23 = vadd.s32 %v2362_v21, %v2358_v19  ;;  %v4075_v30 = vadd.s32 4294967169, %v2203_v13  ;;  %v725_v31 = vsub.s32 4, %v701_v59 }
 0x115   : > { %v553_v25 = vshrl.u32 %v4610_v16, %v550_v11  ;;  %v556_v27 = vshrl.u32 %v4611_v18, %v550_v11  ;;  %v559_v28 = vshrl.u32 %v4612_v20, %v550_v11  ;;  %v552_v43 = vshll.u32 %v4609_v12, %v549_v62 }
 0x116   : > { %v705_v26 = vsub.s32 0, %v4888_v8  ;;  %v2364_v32 = vadd.s32 536870912, %v2363_v23  ;;  %v2207_v5 = vor.u32 8388608, %v4885_v14  ;;  %v555_v4 = vshll.u32 %v4610_v16, %v549_v62 }
 0x117   : > { %v558_v33 = vshll.u32 %v4611_v18, %v549_v62  ;;  %v562_v34 = vshrl.u32 %v4613_v22, %v550_v11  ;;  %v554_v36 = vor.u32 %v553_v25, %v552_v43  ;;  %v561_v37 = vshll.u32 %v4612_v20, %v549_v62 }
 0x118   : > { %v4016_v2 = vmin.u32 %v705_v26, %v4888_v8  ;;  %v2365_v15 = vshrl.u32 %v2364_v32, 30  ;;  %v565_v40 = vshrl.u32 %v4614_v29, %v550_v11  ;;  %v557_v44 = vor.u32 %v556_v27, %v555_v4 }
 0x119   : > { %v560_v46 = vor.u32 %v559_v28, %v558_v33  ;;  %v564_v49 = vshll.u32 %v4613_v22, %v549_v62  ;;  %v726_v50 = vsel %vm641_vm14, %v725_v31, %v701_v59  ;;  %v563_v52 = vor.u32 %v562_v34, %v561_v37 }
 0x11a   : > { %v707_v41 = vclz %v4016_v2  ;;  %v2366_v51 = vshll.u32 %v2365_v15, 30  ;;  %vm567_vm0 = vcmp.lt.s32.totalorder %v4900_v24, 1  ;;  %vm568_vm1 = vcmp.lt.s32.totalorder %v4900_v24, 2 }
 0x11b   : > { %v566_v56 = vor.u32 %v565_v40, %v564_v49  ;;  %vm570_vm2 = vcmp.lt.s32.totalorder %v4900_v24, 4  ;;  %vm2305_vm3 = vcmp.lt.s32.totalorder %v4771_v39, 0  ;;  %v551_v9 = vshrl.u32 %v4609_v12, %v550_v11 }
 0x11c   : > { %v4017_v54 = vadd.s32 4294967294, %v707_v41  ;;  %v4921_v61 = vsub.s32 %v2363_v23, %v2366_v51  ;;  %vm569_vm4 = vcmp.lt.s32.totalorder %v4900_v24, 3  ;;  %v576_v59 = vsel %vm570_vm2, %v563_v52, 920167782 }
 0x11d   : > { %v728_v62 = vsel %vm4895_vm15, 0, %v726_v50  ;;  %v575_v0 = vsel %vm567_vm0, %v554_v36, %v557_v44  ;;  %v577_v6 = vsel %vm569_vm4, %v560_v46, %v576_v59  ;;  %v2389_v21 = vsub.s32 4, %v2365_v15 }
 0x11e   : > { %vm4018_vm5 = vcmp.lt.s32.totalorder %v4017_v54, 0  ;;  %v2369_v19 = vsub.s32 0, %v4921_v61  ;;  %v579_v11 = vsel %vm567_vm0, %v557_v44, %v560_v46  ;;  %vm4938_vm6 = vcmp.le.f32.partialorder %v2303_v45, 0.7853982 }
 0x11f   : > { %v710_v13 = vsel %vm4018_vm5, 0, %v4017_v54  ;;  %v572_v27 = vsel %vm570_vm2, %v560_v46, 2102212464  ;;  %v580_v28 = vsel %vm570_vm2, %v566_v56, 1326507024  ;;  %v578_v43 = vsel %vm568_vm1, %v575_v0, %v577_v6  ;;  %v4958_v46 = vpop.f32.mrb[4].mxu1 }
 0x120   : > { %v711_v23 = vsub.s32 32, %v710_v13  ;;  %v715_v25 = vsub.s32 4294967266, %v710_v13  ;;  %v712_v31 = vshll.u32 %v4888_v8, %v710_v13  ;;  %v4080_v32 = vmin.u32 %v2369_v19, %v4921_v61 }
 0x121   : > { %v581_v2 = vsel %vm569_vm4, %v563_v52, %v580_v28  ;;  %v2209_v34 = vadd.s32 1, %v4075_v30  ;;  %v732_v37 = vadd.s32 3, %v728_v62  ;;  %v571_v41 = vsel %vm567_vm0, %v551_v9, %v554_v36 }
 0x122   : > { %v713_v45 = vshrl.u32 %v695_v7, %v711_v23  ;;  %v716_v4 = vadd.s32 127, %v715_v25  ;;  %v582_v33 = vsel %vm568_vm1, %v579_v11, %v581_v2  ;;  %v2371_v40 = vclz %v4080_v32 }
 0x123   : > { %v573_v8 = vsel %vm569_vm4, %v557_v44, %v572_v27  ;;  %v4961_v51 = vmul.u32.u64.low %v4891_v3, %v582_v33  ;;  %v4962_v7 = vmul.u32.u64.high %v4891_v3, %v582_v33, %v4961_v51  ;;  %vm2210_vm7 = vcmp.gt.s32.totalorder %v2209_v34, 0 }
 0x124   : > { %v714_v49 = vor.u32 %v713_v45, %v712_v31  ;;  %v717_v50 = vshll.u32 %v716_v4, 23  ;;  %v4081_v52 = vadd.s32 4294967294, %v2371_v40  ;;  %v2359_v36 = vadd.s32 %v4863_v53, %v4869_v57 }
 0x125   : > { %v4965_v54 = vmul.u32.u64.low %v4891_v3, %v578_v43  ;;  %v4966_v30 = vmul.u32.u64.high %v4891_v3, %v578_v43, %v4965_v54  ;;  %v2390_v44 = vsel %vm2305_vm3, %v2389_v21, %v2365_v15  ;;  %v2211_v9 = vsel %vm2210_vm7, %v2209_v34, 0 }
 0x126   : > { %v718_v56 = vor.u32 4788187, %v717_v50  ;;  %v4973_v59 = vand.u32 3, %v732_v37  ;;  %vm4082_vm8 = vcmp.lt.s32.totalorder %v4081_v52, 0  ;;  %v574_v62 = vsel %vm568_vm1, %v571_v41, %v573_v8 }
 0x127   : > { %v2213_v0 = vand.u32 31, %v2211_v9  ;;  %v721_v13 = vcvt.s32.f32 %v714_v49  ;;  %v2374_v19 = vsel %vm4082_vm8, 0, %v4081_v52  ;;  %vm592_vm9 = vc.u32 %v4962_v7, %v4965_v54 }
 0x128   : > { %v719_v6 = vand.u32 2147483647, %v718_v56  ;;  %v2375_v11 = vsub.s32 32, %v2374_v19  ;;  %v2379_v23 = vsub.s32 4294967266, %v2374_v19  ;;  %v2392_v53 = vsel %vm4938_vm6, 0, %v2390_v44 }
 0x129   : > { %v593_v57 = vadd.s32 1, %v4966_v30  ;;  %v590_v21 = vmul.u32 %v4891_v3, %v574_v62  ;;  %v4983_v25 = vshrl.u32 %v2211_v9, 5  ;;  %v2214_v24 = vsub.s32 32, %v2213_v0 }
 0x12a   : > { %v722_v15 = vmul.f32 %v721_v13, %v719_v6  ;;  %v2376_v27 = vshll.u32 %v4921_v61, %v2374_v19  ;;  %v2377_v28 = vshrl.u32 %v2359_v36, %v2375_v11  ;;  %v2380_v31 = vadd.s32 127, %v2379_v23 }
 0x12b   : > { %v594_v32 = vsel %vm592_vm9, %v593_v57, %v4966_v30  ;;  %v2216_v45 = vshll.u32 %v4609_v12, %v2213_v0  ;;  %v2217_v4 = vshrl.u32 %v4610_v16, %v2214_v24  ;;  %v2219_v37 = vshll.u32 %v4610_v16, %v2213_v0 }
 0x12c   : > { %v723_v43 = vxor.u32 2147483648, %v722_v15  ;;  %v595_v2 = vadd.s32 %v594_v32, %v590_v21  ;;  %v2378_v33 = vor.u32 %v2377_v28, %v2376_v27  ;;  %v2381_v34 = vshll.u32 %v2380_v31, 23 }
 0x12d   : > { %v2220_v3 = vshrl.u32 %v4611_v18, %v2214_v24  ;;  %v2222_v41 = vshll.u32 %v4611_v18, %v2213_v0  ;;  %v2223_v8 = vshrl.u32 %v4612_v20, %v2214_v24  ;;  %v2218_v51 = vor.u32 %v2217_v4, %v2216_v45 }
 0x12e   : > { %v724_v40 = vsel %vm641_vm14, %v723_v43, %v722_v15  ;;  %v596_v61 = vadd.s32 536870912, %v595_v2  ;;  %v2382_v50 = vor.u32 4788187, %v2381_v34  ;;  %v2225_v52 = vshll.u32 %v4612_v20, %v2213_v0 }
 0x12f   : > { %v727_v49 = vsel %vm4895_vm15, %v4768_v38, %v724_v40  ;;  %v2385_v30 = vcvt.s32.f32 %v2378_v33  ;;  %v2226_v36 = vshrl.u32 %v4613_v22, %v2214_v24  ;;  %v2221_v9 = vor.u32 %v2220_v3, %v2219_v37 }
 0x130   : > { %4412 = vcosq.f32 %v727_v49  ;;  %v4999_v56 = vshrl.u32 %v596_v61, 30  ;;  %v2383_v44 = vand.u32 2147483647, %v2382_v50  ;;  %v2229_v62 = vshrl.u32 %v4614_v29, %v2214_v24 }
 0x131   : > { %4414 = vsinq.f32 %v727_v49  ;;  %v2227_v13 = vor.u32 %v2226_v36, %v2225_v52  ;;  %v2224_v19 = vor.u32 %v2223_v8, %v2222_v41  ;;  %v2228_v11 = vshll.u32 %v4613_v22, %v2213_v0 }
 0x132   : > { %v598_v6 = vshll.u32 %v4999_v56, 30  ;;  %v2386_v10 = vmul.f32 %v2385_v30, %v2383_v44  ;;  %v2396_v23 = vadd.s32 3, %v2392_v53  ;;  %vm2231_vm10 = vcmp.lt.s32.totalorder %v4983_v25, 1 }
 0x133   : > { %v5010_v15 = vshll.u32 %v2207_v5, 8  ;;  %vm735_vm11 = vcmp.eq.s32.totalorder %v4973_v59, 0  ;;  %v2230_v27 = vor.u32 %v2229_v62, %v2228_v11  ;;  %vm2234_vm12 = vcmp.lt.s32.totalorder %v4983_v25, 4 }
 0x134   : > { %v5005_v57 = vsub.s32 %v595_v2, %v598_v6  ;;  %v2387_v21 = vxor.u32 2147483648, %v2386_v10  ;;  %v2239_v28 = vsel %vm2231_vm10, %v2218_v51, %v2221_v9  ;;  %vm734_vm13 = vcmp.lt.s32.totalorder %v4973_v59, 2 }
 0x135   : > { %v2215_v53 = vshrl.u32 %v4609_v12, %v2214_v24  ;;  %vm2233_vm14 = vcmp.lt.s32.totalorder %v4983_v25, 3  ;;  %v2240_v14 = vsel %vm2234_vm12, %v2227_v13, 920167782  ;;  %vm731_vm15 = vweird.f32 %v4768_v38 }
 0x136   : > { %v601_v0 = vsub.s32 0, %v5005_v57  ;;  %v2388_v5 = vsel %vm2305_vm3, %v2387_v21, %v2386_v10  ;;  %vm537_vm0 = vcmp.lt.s32.totalorder %v4774_v42, 0  ;;  %vm2232_vm1 = vcmp.lt.s32.totalorder %v4983_v25, 2 }
 0x137   : > { %v2236_v31 = vsel %vm2234_vm12, %v2224_v19, 2102212464  ;;  %v2241_v24 = vsel %vm2233_vm14, %v2224_v19, %v2240_v14  ;;  %v2391_v32 = vsel %vm4938_vm6, %v4771_v39, %v2388_v5  ;;  %v2243_v45 = vsel %vm2231_vm10, %v2221_v9, %v2224_v19  ;;  %v5092_v5 = vpop.f32.mrb[5].mxu0 }
 0x138   : > { %v4012_v43 = vmin.u32 %v601_v0, %v5005_v57  ;;  %v2242_v2 = vsel %vm2232_vm1, %v2239_v28, %v2241_v24  ;;  %4416 = vcosq.f32 %v2391_v32  ;;  %v2244_v4 = vsel %vm2234_vm12, %v2230_v27, 1326507024 }
 0x139   : > { %v5043_v33 = vmul.u32.u64.low %v5010_v15, %v2242_v2  ;;  %v5044_v34 = vmul.u32.u64.high %v5010_v15, %v2242_v2, %v5043_v33  ;;  %vm738_vm2 = vcmp.eq.s32.totalorder %v4973_v59, 2  ;;  %4418 = vsinq.f32 %v2391_v32 }
 0x13a   : > { %v4413_v37 = vpop.eup %4412  ;;  %v603_v26 = vclz %v4012_v43  ;;  %v621_v3 = vsub.s32 4, %v4999_v56  ;;  %v2235_v41 = vsel %vm2231_vm10, %v2215_v53, %v2218_v51  ;;  %v2237_v8 = vsel %vm2233_vm14, %v2221_v9, %v2236_v31 }
 0x13b   : > { %v4415_v40 = vpop.eup %4414  ;;  %v739_v61 = vxor.u32 2147483648, %v4413_v37  ;;  %v2245_v49 = vsel %vm2233_vm14, %v2227_v13, %v2244_v4  ;;  %v5061_v36 = vadd.f32 %v4780_v47, %v4765_v35  ;;  %v2397_v62 = vand.u32 3, %v2396_v23 }
 0x13c   : > { %v736_v50 = vxor.u32 2147483648, %v4415_v40  ;;  %v4013_v52 = vadd.s32 4294967294, %v603_v26  ;;  %v2246_v30 = vsel %vm2232_vm1, %v2243_v45, %v2245_v49  ;;  %v2238_v13 = vsel %vm2232_vm1, %v2235_v41, %v2237_v8 }
 0x13d   : > { %v740_v44 = vsel %vm738_vm2, %v739_v61, %v4415_v40  ;;  %v5064_v6 = vmul.u32.u64.low %v5010_v15, %v2246_v30  ;;  %v5065_v51 = vmul.u32.u64.high %v5010_v15, %v2246_v30, %v5064_v6  ;;  %v2257_v10 = vadd.s32 1, %v5044_v34 }
 0x13e   : > { %v737_v9 = vsel %vm735_vm11, %v4413_v37, %v736_v50  ;;  %vm4014_vm3 = vcmp.lt.s32.totalorder %v4013_v52, 0  ;;  %v591_v47 = vadd.s32 %v4965_v54, %v4962_v7  ;;  %v850_v23 = vand.u32 2139095040, %v5061_v36 }
 0x13f   : > { %v741_v19 = vsel %vm734_vm13, %v737_v9, %v740_v44  ;;  %v606_v11 = vsel %vm4014_vm3, 0, %v4013_v52  ;;  %vm2395_vm4 = vweird.f32 %v4771_v39  ;;  %v622_v25 = vsel %vm537_vm0, %v621_v3, %v4999_v56 }
 0x140   : > { %v742_v21 = vsel %vm731_vm15, nan, %v741_v19  ;;  %v607_v27 = vsub.s32 32, %v606_v11  ;;  %v611_v28 = vsub.s32 4294967266, %v606_v11  ;;  %v2254_v7 = vmul.u32 %v5010_v15, %v2238_v13 }
 0x141   : > { %3864 = vst [vmem:[%s5083_s10 + $0x8] sm:$0xff] %v742_v21  ;;  %vm2256_vm5 = vc.u32 %v5065_v51, %v5043_v33  ;;  %v847_v38 = vand.u32 2147483647, %v5061_v36  ;;  %v851_v54 = vshrl.u32 %v850_v23, 23  ;;  %v608_v59 = vshll.u32 %v5005_v57, %v606_v11 }
 0x142   : > { %v609_v0 = vshrl.u32 %v591_v47, %v607_v27  ;;  %v612_v53 = vadd.s32 127, %v611_v28  ;;  %v2258_v14 = vsel %vm2256_vm5, %v2257_v10, %v5044_v34  ;;  %v4417_v56 = vpop.eup %4416  ;;  %vm2402_vm6 = vcmp.eq.s32.totalorder %v2397_v62, 2 }
 0x143   : > { %vm5096_vm7 = vcmp.le.f32.partialorder %v535_v63, 0.7853982  ;;  %v2259_v31 = vadd.s32 %v2258_v14, %v2254_v7  ;;  %v4023_v24 = vadd.s32 4294967169, %v851_v54  ;;  %v4419_v32 = vpop.eup %4418  ;;  %v2403_v43 = vxor.u32 2147483648, %v4417_v56 }
 0x144   : > { %v610_v2 = vor.u32 %v609_v0, %v608_v59  ;;  %v613_v57 = vshll.u32 %v612_v53, 23  ;;  %v624_v45 = vsel %vm5096_vm7, 0, %v622_v25  ;;  %v2400_v4 = vxor.u32 2147483648, %v4419_v32 }
 0x145   : > { %v2260_v34 = vadd.s32 536870912, %v2259_v31  ;;  %v854_v37 = vand.u32 8388607, %v847_v38  ;;  %v857_v26 = vadd.s32 1, %v4023_v24  ;;  %vm2398_vm8 = vcmp.lt.s32.totalorder %v2397_v62, 2 }
 0x146   : > { %vm2399_vm9 = vcmp.eq.s32.totalorder %v2397_v62, 0  ;;  %v2404_v63 = vsel %vm2402_vm6, %v2403_v43, %v4419_v32  ;;  %v614_v3 = vor.u32 4788187, %v613_v57  ;;  %v628_v61 = vadd.s32 3, %v624_v45 }
 0x147   : > { %v2401_v40 = vsel %vm2399_vm9, %v4417_v56, %v2400_v4  ;;  %v5104_v41 = vshrl.u32 %v2260_v34, 30  ;;  %vm858_vm10 = vcmp.gt.s32.totalorder %v857_v26, 0  ;;  %v617_v50 = vcvt.s32.f32 %v610_v2 }
 0x148   : > { %v2405_v8 = vsel %vm2398_vm8, %v2401_v40, %v2404_v63  ;;  %v615_v49 = vand.u32 2147483647, %v614_v3  ;;  %v859_v52 = vsel %vm858_vm10, %v857_v26, 0  ;;  %v855_v6 = vor.u32 8388608, %v854_v37  ;;  %v5159_v63 = vpop.f32.mrb[5].mxu1 }
 0x149   : > { %v2406_v30 = vsel %vm2395_vm4, nan, %v2405_v8  ;;  %v2262_v44 = vshll.u32 %v5104_v41, 30  ;;  %v861_v62 = vand.u32 31, %v859_v52  ;;  %v5110_v13 = vand.u32 3, %v628_v61 }
 0x14a   : > { %3880 = vst [vmem:[%s5083_s10 + $0x88] sm:$0xff] %v2406_v30  ;;  %v618_v9 = vmul.f32 %v617_v50, %v615_v49  ;;  %v2255_v47 = vadd.s32 %v5043_v33, %v5065_v51  ;;  %v5118_v23 = vadd.f32 %v4782_v48, %v4765_v35  ;;  %v5121_v21 = vshrl.u32 %v859_v52, 5 }
 0x14b   : > { %v5112_v10 = vsub.s32 %v2259_v31, %v2262_v44  ;;  %v862_v11 = vsub.s32 32, %v861_v62  ;;  %v5123_v27 = vshll.u32 %v855_v6, 8  ;;  %v5127_v28 = vadd.f32 %v4765_v35, %v4789_v55 }
 0x14c   : > { %v619_v19 = vxor.u32 2147483648, %v618_v9  ;;  %v864_v33 = vshll.u32 %v4609_v12, %v861_v62  ;;  %v867_v59 = vshll.u32 %v4610_v16, %v861_v62  ;;  %v2285_v55 = vsub.s32 4, %v5104_v41 }
 0x14d   : > { %v2265_v39 = vsub.s32 0, %v5112_v10  ;;  %v865_v51 = vshrl.u32 %v4610_v16, %v862_v11  ;;  %v868_v48 = vshrl.u32 %v4611_v18, %v862_v11  ;;  %v871_v35 = vshrl.u32 %v4612_v20, %v862_v11 }
 0x14e   : > { %v620_v25 = vsel %vm537_vm0, %v619_v19, %v618_v9  ;;  %v870_v0 = vshll.u32 %v4611_v18, %v861_v62  ;;  %v2514_v53 = vand.u32 2139095040, %v5118_v23  ;;  %v873_v15 = vshll.u32 %v4612_v20, %v861_v62 }
 0x14f   : > { %v623_v7 = vsel %vm5096_vm7, %v4774_v42, %v620_v25  ;;  %v4076_v54 = vmin.u32 %v2265_v39, %v5112_v10  ;;  %v866_v56 = vor.u32 %v865_v51, %v864_v33  ;;  %v869_v31 = vor.u32 %v868_v48, %v867_v59 }
 0x150   : > { %4420 = vcosq.f32 %v623_v7  ;;  %v872_v24 = vor.u32 %v871_v35, %v870_v0  ;;  %v874_v32 = vshrl.u32 %v4613_v22, %v862_v11  ;;  %vm879_vm11 = vcmp.lt.s32.totalorder %v5121_v21, 1 }
 0x151   : > { %4422 = vsinq.f32 %v623_v7  ;;  %v2267_v14 = vclz %v4076_v54  ;;  %v876_v2 = vshll.u32 %v4613_v22, %v861_v62  ;;  %v877_v57 = vshrl.u32 %v4614_v29, %v862_v11 }
 0x152   : > { %vm880_vm12 = vcmp.lt.s32.totalorder %v5121_v21, 2  ;;  %vm634_vm13 = vcmp.eq.s32.totalorder %v5110_v13, 2  ;;  %v863_v45 = vshrl.u32 %v4609_v12, %v862_v11  ;;  %v875_v4 = vor.u32 %v874_v32, %v873_v15 }
 0x153   : > { %v4077_v43 = vadd.s32 4294967294, %v2267_v14  ;;  %vm881_vm14 = vcmp.lt.s32.totalorder %v5121_v21, 3  ;;  %vm882_vm15 = vcmp.lt.s32.totalorder %v5121_v21, 4  ;;  %vm631_vm0 = vcmp.eq.s32.totalorder %v5110_v13, 0 }
 0x154   : > { %vm2201_vm1 = vcmp.lt.s32.totalorder %v4792_v60, 0  ;;  %v878_v34 = vor.u32 %v877_v57, %v876_v2  ;;  %v884_v37 = vsel %vm882_vm15, %v872_v24, 2102212464  ;;  %v887_v26 = vsel %vm879_vm11, %v866_v56, %v869_v31 }
 0x155   : > { %vm4078_vm2 = vcmp.lt.s32.totalorder %v4077_v43, 0  ;;  %vm630_vm3 = vcmp.lt.s32.totalorder %v5110_v13, 2  ;;  %v883_v40 = vsel %vm879_vm11, %v863_v45, %v866_v56  ;;  %v888_v61 = vsel %vm882_vm15, %v875_v4, 920167782 }
 0x156   : > { %v2270_v3 = vsel %vm4078_vm2, 0, %v4077_v43  ;;  %v2515_v8 = vshrl.u32 %v2514_v53, 23  ;;  %vm627_vm4 = vweird.f32 %v4774_v42  ;;  %v889_v52 = vsel %vm881_vm14, %v872_v24, %v888_v61 }
 0x157   : > { %v2271_v49 = vsub.s32 32, %v2270_v3  ;;  %v2275_v50 = vsub.s32 4294967266, %v2270_v3  ;;  %v891_v30 = vsel %vm879_vm11, %v869_v31, %v872_v24  ;;  %vm5173_vm5 = vcmp.le.f32.partialorder %v2199_v58, 0.7853982 }
 0x158   : > { %v885_v6 = vsel %vm881_vm14, %v869_v31, %v884_v37  ;;  %v890_v9 = vsel %vm880_vm12, %v887_v26, %v889_v52  ;;  %v892_v62 = vsel %vm882_vm15, %v878_v34, 1326507024  ;;  %v4087_v19 = vadd.s32 4294967169, %v2515_v8 }
 0x159   : > { %v2272_v11 = vshll.u32 %v5112_v10, %v2270_v3  ;;  %v2273_v39 = vshrl.u32 %v2255_v47, %v2271_v49  ;;  %v2276_v25 = vadd.s32 127, %v2275_v50  ;;  %v893_v58 = vsel %vm881_vm14, %v875_v4, %v892_v62 }
 0x15a   : > { %v4421_v33 = vpop.eup %4420  ;;  %v894_v51 = vsel %vm880_vm12, %v891_v30, %v893_v58  ;;  %v5189_v48 = vmul.u32.u64.low %v5123_v27, %v890_v9  ;;  %v5190_v7 = vmul.u32.u64.high %v5123_v27, %v890_v9, %v5189_v48  ;;  %v2521_v54 = vadd.s32 1, %v4087_v19 }
 0x15b   : > { %v4423_v59 = vpop.eup %4422  ;;  %v635_v35 = vxor.u32 2147483648, %v4421_v33  ;;  %v2274_v0 = vor.u32 %v2273_v39, %v2272_v11  ;;  %v2277_v53 = vshll.u32 %v2276_v25, 23  ;;  %v2511_v10 = vand.u32 2147483647, %v5118_v23 }
 0x15c   : > { %v632_v47 = vxor.u32 2147483648, %v4423_v59  ;;  %v5195_v14 = vmul.u32.u64.low %v5123_v27, %v894_v51  ;;  %v5196_v56 = vmul.u32.u64.high %v5123_v27, %v894_v51, %v5195_v14  ;;  %vm2522_vm6 = vcmp.gt.s32.totalorder %v2521_v54, 0 }
 0x15d   : > { %v636_v31 = vsel %vm634_vm13, %v635_v35, %v4423_v59  ;;  %v2278_v24 = vor.u32 4788187, %v2277_v53  ;;  %v886_v15 = vsel %vm880_vm12, %v883_v40, %v885_v6  ;;  %v2523_v32 = vsel %vm2522_vm6, %v2521_v54, 0 }
 0x15e   : > { %v633_v43 = vsel %vm631_vm0, %v4421_v33, %v632_v47  ;;  %v2286_v2 = vsel %vm2201_vm1, %v2285_v55, %v5104_v41  ;;  %v905_v57 = vadd.s32 1, %v5190_v7  ;;  %v2525_v45 = vand.u32 31, %v2523_v32 }
 0x15f   : > { %v637_v4 = vsel %vm630_vm3, %v633_v43, %v636_v31  ;;  %v2279_v34 = vand.u32 2147483647, %v2278_v24  ;;  %v2281_v37 = vcvt.s32.f32 %v2274_v0  ;;  %v2518_v21 = vand.u32 8388607, %v2511_v10 }
 0x160   : > { %v638_v26 = vsel %vm627_vm4, nan, %v637_v4  ;;  %v902_v3 = vmul.u32 %v5123_v27, %v886_v15  ;;  %vm904_vm7 = vc.u32 %v5196_v56, %v5189_v48  ;;  %v2526_v41 = vsub.s32 32, %v2525_v45 }
 0x161   : > { %3863 = vst [vmem:[%s5083_s10] sm:$0xff] %v638_v26  ;;  %v2282_v55 = vmul.f32 %v2281_v37, %v2279_v34  ;;  %v2288_v13 = vsel %vm5173_vm5, 0, %v2286_v2  ;;  %v906_v40 = vsel %vm904_vm7, %v905_v57, %v5190_v7  ;;  %v2524_v61 = vshrl.u32 %v2523_v32, 5 }
 0x162   : > { %v907_v8 = vadd.s32 %v906_v40, %v902_v3  ;;  %v2528_v49 = vshll.u32 %v4609_v12, %v2525_v45  ;;  %v2529_v42 = vshrl.u32 %v4610_v16, %v2526_v41  ;;  %v2532_v50 = vshrl.u32 %v4611_v18, %v2526_v41 }
 0x163   : > { %v2283_v27 = vxor.u32 2147483648, %v2282_v55  ;;  %v2531_v52 = vshll.u32 %v4610_v16, %v2525_v45  ;;  %v2534_v30 = vshll.u32 %v4611_v18, %v2525_v45  ;;  %v2535_v6 = vshrl.u32 %v4612_v20, %v2526_v41 }
 0x164   : > { %v908_v9 = vadd.s32 536870912, %v907_v8  ;;  %v2530_v62 = vor.u32 %v2529_v42, %v2528_v49  ;;  %v2537_v19 = vshll.u32 %v4612_v20, %v2525_v45  ;;  %v2538_v11 = vshrl.u32 %v4613_v22, %v2526_v41 }
 0x165   : > { %v2284_v39 = vsel %vm2201_vm1, %v2283_v27, %v2282_v55  ;;  %v2533_v25 = vor.u32 %v2532_v50, %v2531_v52  ;;  %v2536_v58 = vor.u32 %v2535_v6, %v2534_v30  ;;  %v2541_v33 = vshrl.u32 %v4614_v29, %v2526_v41 }
 0x166   : > { %v2287_v51 = vsel %vm5173_vm5, %v4792_v60, %v2284_v39  ;;  %v909_v7 = vshrl.u32 %v908_v9, 30  ;;  %v2539_v54 = vor.u32 %v2538_v11, %v2537_v19  ;;  %v2540_v59 = vshll.u32 %v4613_v22, %v2525_v45 }
 0x167   : > { %4424 = vcosq.f32 %v2287_v51  ;;  %v2292_v35 = vadd.s32 3, %v2288_v13  ;;  %v2519_v0 = vor.u32 8388608, %v2518_v21  ;;  %vm2543_vm8 = vcmp.lt.s32.totalorder %v2524_v61, 1 }
 0x168   : > { %4426 = vsinq.f32 %v2287_v51  ;;  %v910_v53 = vshll.u32 %v909_v7, 30  ;;  %v2542_v47 = vor.u32 %v2541_v33, %v2540_v59  ;;  %vm2546_vm9 = vcmp.lt.s32.totalorder %v2524_v61, 4 }
 0x169   : > { %v2527_v14 = vshrl.u32 %v4609_v12, %v2526_v41  ;;  %vm2545_vm10 = vcmp.lt.s32.totalorder %v2524_v61, 3  ;;  %v2551_v31 = vsel %vm2543_vm8, %v2530_v62, %v2533_v25  ;;  %v2552_v44 = vsel %vm2546_vm9, %v2539_v54, 920167782 }
 0x16a   : > { %v5241_v24 = vsub.s32 %v907_v8, %v910_v53  ;;  %vm2544_vm11 = vcmp.lt.s32.totalorder %v2524_v61, 2  ;;  %v2548_v15 = vsel %vm2546_vm9, %v2536_v58, 2102212464  ;;  %v2553_v32 = vsel %vm2545_vm10, %v2536_v58, %v2552_v44 }
 0x16b   : > { %v933_v43 = vsub.s32 4, %v909_v7  ;;  %v2554_v2 = vsel %vm2544_vm11, %v2551_v31, %v2553_v32  ;;  %v2555_v57 = vsel %vm2543_vm8, %v2533_v25, %v2536_v58  ;;  %v2559_v45 = vshll.u32 %v2519_v0, 8 }
 0x16c   : > { %v2293_v4 = vand.u32 3, %v2292_v35  ;;  %v913_v34 = vsub.s32 0, %v5241_v24  ;;  %v2547_v37 = vsel %vm2543_vm8, %v2527_v14, %v2530_v62  ;;  %v2556_v21 = vsel %vm2546_vm9, %v2542_v47, 1326507024 }
 0x16d   : > { %v2549_v26 = vsel %vm2545_vm10, %v2533_v25, %v2548_v15  ;;  %v2557_v3 = vsel %vm2545_vm10, %v2539_v54, %v2556_v21  ;;  %v5252_v41 = vmul.u32.u64.low %v2559_v45, %v2554_v2  ;;  %v5253_v55 = vmul.u32.u64.high %v2559_v45, %v2554_v2, %v5252_v41  ;;  %v5286_v2 = vpop.f32.mrb[6].mxu0 }
 0x16e   : > { %vm2291_vm12 = vweird.f32 %v4792_v60  ;;  %vm849_vm13 = vcmp.lt.s32.totalorder %v5061_v36, 0  ;;  %v4024_v13 = vmin.u32 %v913_v34, %v5241_v24  ;;  %v2558_v40 = vsel %vm2544_vm11, %v2555_v57, %v2557_v3 }
 0x16f   : > { %v934_v8 = vsel %vm849_vm13, %v933_v43, %v909_v7  ;;  %v5261_v49 = vmul.u32.u64.low %v2559_v45, %v2558_v40  ;;  %v5262_v42 = vmul.u32.u64.high %v2559_v45, %v2558_v40, %v5261_v49  ;;  %v746_v50 = vand.u32 2139095040, %v5127_v28 }
 0x170   : > { %vm5267_vm14 = vcmp.le.f32.partialorder %v847_v38, 0.7853982  ;;  %v915_v52 = vclz %v4024_v13  ;;  %v2550_v30 = vsel %vm2544_vm11, %v2547_v37, %v2549_v26  ;;  %v743_v6 = vand.u32 2147483647, %v5127_v28 }
 0x171   : > { %v4425_v9 = vpop.eup %4424  ;;  %vm2294_vm15 = vcmp.lt.s32.totalorder %v2293_v4, 2  ;;  %vm2295_vm0 = vcmp.eq.s32.totalorder %v2293_v4, 0  ;;  %v2569_v62 = vadd.s32 1, %v5253_v55  ;;  %v747_v19 = vshrl.u32 %v746_v50, 23 }
 0x172   : > { %v4427_v11 = vpop.eup %4426  ;;  %vm2298_vm1 = vcmp.eq.s32.totalorder %v2293_v4, 2  ;;  %v2299_v39 = vxor.u32 2147483648, %v4425_v9  ;;  %v4025_v25 = vadd.s32 4294967294, %v915_v52  ;;  %v936_v38 = vsel %vm5267_vm14, 0, %v934_v8 }
 0x173   : > { %v2296_v58 = vxor.u32 2147483648, %v4427_v11  ;;  %v2566_v33 = vmul.u32 %v2559_v45, %v2550_v30  ;;  %vm2568_vm2 = vc.u32 %v5262_v42, %v5252_v41  ;;  %v4019_v61 = vadd.s32 4294967169, %v747_v19 }
 0x174   : > { %v2300_v51 = vsel %vm2298_vm1, %v2299_v39, %v4427_v11  ;;  %vm4026_vm3 = vcmp.lt.s32.totalorder %v4025_v25, 0  ;;  %v2570_v7 = vsel %vm2568_vm2, %v2569_v62, %v5253_v55  ;;  %v750_v54 = vand.u32 8388607, %v743_v6 }
 0x175   : > { %v2297_v59 = vsel %vm2295_vm0, %v4425_v9, %v2296_v58  ;;  %v918_v35 = vsel %vm4026_vm3, 0, %v4025_v25  ;;  %v2571_v0 = vadd.s32 %v2570_v7, %v2566_v33  ;;  %v753_v53 = vadd.s32 1, %v4019_v61 }
 0x176   : > { %v2301_v47 = vsel %vm2294_vm15, %v2297_v59, %v2300_v51  ;;  %v903_v14 = vadd.s32 %v5189_v48, %v5196_v56  ;;  %v919_v31 = vsub.s32 32, %v918_v35  ;;  %v923_v44 = vsub.s32 4294967266, %v918_v35 }
 0x177   : > { %v2302_v15 = vsel %vm2291_vm12, nan, %v2301_v47  ;;  %v940_v32 = vadd.s32 3, %v936_v38  ;;  %v2572_v43 = vadd.s32 536870912, %v2571_v0  ;;  %vm754_vm4 = vcmp.gt.s32.totalorder %v753_v53, 0 }
 0x178   : > { %3879 = vst [vmem:[%s5083_s10 + $0x80] sm:$0xff] %v2302_v15  ;;  %v920_v57 = vshll.u32 %v5241_v24, %v918_v35  ;;  %v921_v45 = vshrl.u32 %v903_v14, %v919_v31  ;;  %v924_v34 = vadd.s32 127, %v923_v44  ;;  %v755_v4 = vsel %vm754_vm4, %v753_v53, 0  ;;  %v5297_v24 = vld [vmem:[%s7488_s2] ss:$0 sm:$0xff] }
 0x179   : > { %v2573_v37 = vshrl.u32 %v2572_v43, 30  ;;  %v751_v21 = vor.u32 8388608, %v750_v54  ;;  %v757_v26 = vand.u32 31, %v755_v4  ;;  %v5290_v3 = vand.u32 3, %v940_v32 }
 0x17a   : > { %v922_v48 = vor.u32 %v921_v45, %v920_v57  ;;  %v925_v56 = vshll.u32 %v924_v34, 23  ;;  %vm2513_vm5 = vcmp.lt.s32.totalorder %v5118_v23, 0  ;;  %v2567_v40 = vadd.s32 %v5252_v41, %v5262_v42 }
 0x17b   : > { %v2574_v60 = vshll.u32 %v2573_v37, 30  ;;  %v758_v55 = vsub.s32 32, %v757_v26  ;;  %v5301_v8 = vadd.f32 %v5297_v24, %v4795_v1  ;;  %v5305_v49 = vadd.f32 %v5297_v24, %v4878_v17 }
 0x17c   : > { %v926_v13 = vor.u32 4788187, %v925_v56  ;;  %v756_v52 = vshrl.u32 %v755_v4, 5  ;;  %v5310_v9 = vshll.u32 %v751_v21, 8  ;;  %v929_v42 = vcvt.s32.f32 %v922_v48 }
 0x17d   : > { %v5307_v50 = vsub.s32 %v2571_v0, %v2574_v60  ;;  %v761_v30 = vshrl.u32 %v4610_v16, %v758_v55  ;;  %v764_v62 = vshrl.u32 %v4611_v18, %v758_v55  ;;  %v767_v19 = vshrl.u32 %v4612_v20, %v758_v55 }
 0x17e   : > { %v927_v41 = vand.u32 2147483647, %v926_v13  ;;  %v2597_v11 = vsub.s32 4, %v2573_v37  ;;  %v760_v39 = vshll.u32 %v4609_v12, %v757_v26  ;;  %v763_v17 = vshll.u32 %v4610_v16, %v757_v26 }
 0x17f   : > { %v2577_v1 = vsub.s32 0, %v5307_v50  ;;  %v766_v38 = vshll.u32 %v4611_v18, %v757_v26  ;;  %v769_v58 = vshll.u32 %v4612_v20, %v757_v26  ;;  %v770_v33 = vshrl.u32 %v4613_v22, %v758_v55 }
 0x180   : > { %v930_v25 = vmul.f32 %v929_v42, %v927_v41  ;;  %v762_v51 = vor.u32 %v761_v30, %v760_v39  ;;  %v765_v7 = vor.u32 %v764_v62, %v763_v17  ;;  %v773_v54 = vshrl.u32 %v4614_v29, %v758_v55 }
 0x181   : > { %v4088_v61 = vmin.u32 %v2577_v1, %v5307_v50  ;;  %v768_v35 = vor.u32 %v767_v19, %v766_v38  ;;  %v771_v0 = vor.u32 %v770_v33, %v769_v58  ;;  %v772_v53 = vshll.u32 %v4613_v22, %v757_v26  ;;  %v5335_v26 = vpop.f32.mrb[6].mxu1 }
 0x182   : > { %v931_v59 = vxor.u32 2147483648, %v930_v25  ;;  %v2598_v14 = vsel %vm2513_vm5, %v2597_v11, %v2573_v37  ;;  %v759_v31 = vshrl.u32 %v4609_v12, %v758_v55  ;;  %v2410_v44 = vand.u32 2139095040, %v5301_v8 }
 0x183   : > { %v2579_v47 = vclz %v4088_v61  ;;  %v774_v32 = vor.u32 %v773_v54, %v772_v53  ;;  %vm775_vm6 = vcmp.lt.s32.totalorder %v756_v52, 1  ;;  %vm776_vm7 = vcmp.lt.s32.totalorder %v756_v52, 2 }
 0x184   : > { %v932_v15 = vsel %vm849_vm13, %v931_v59, %v930_v25  ;;  %vm777_vm8 = vcmp.lt.s32.totalorder %v756_v52, 3  ;;  %vm778_vm9 = vcmp.lt.s32.totalorder %v756_v52, 4  ;;  %v783_v34 = vsel %vm775_vm6, %v762_v51, %v765_v7 }
 0x185   : > { %v935_v43 = vsel %vm5267_vm14, %v5061_v36, %v932_v15  ;;  %v4089_v57 = vadd.s32 4294967294, %v2579_v47  ;;  %v780_v45 = vsel %vm778_vm9, %v768_v35, 2102212464  ;;  %v784_v4 = vsel %vm778_vm9, %v771_v0, 920167782 }
 0x186   : > { %4428 = vcosq.f32 %v935_v43  ;;  %v779_v37 = vsel %vm775_vm6, %v759_v31, %v762_v51  ;;  %v785_v21 = vsel %vm777_vm8, %v768_v35, %v784_v4  ;;  %v787_v56 = vsel %vm775_vm6, %v765_v7, %v768_v35 }
 0x187   : > { %4430 = vsinq.f32 %v935_v43  ;;  %vm4090_vm10 = vcmp.lt.s32.totalorder %v4089_v57, 0  ;;  %v786_v27 = vsel %vm776_vm7, %v783_v34, %v785_v21  ;;  %v788_v60 = vsel %vm778_vm9, %v774_v32, 1326507024 }
 0x188   : > { %v2582_v48 = vsel %vm4090_vm10, 0, %v4089_v57  ;;  %v781_v30 = vsel %vm777_vm8, %v765_v7, %v780_v45  ;;  %v789_v41 = vsel %vm777_vm8, %v771_v0, %v788_v60  ;;  %vm5354_vm11 = vcmp.le.f32.partialorder %v2511_v10, 0.7853982 }
 0x189   : > { %v2583_v55 = vsub.s32 32, %v2582_v48  ;;  %v2587_v13 = vsub.s32 4294967266, %v2582_v48  ;;  %v2584_v42 = vshll.u32 %v5307_v50, %v2582_v48  ;;  %v790_v62 = vsel %vm776_vm7, %v787_v56, %v789_v41 }
 0x18a   : > { %v5344_v19 = vmul.u32.u64.low %v5310_v9, %v786_v27  ;;  %v5345_v1 = vmul.u32.u64.high %v5310_v9, %v786_v27, %v5344_v19  ;;  %v5349_v17 = vmul.u32.u64.low %v5310_v9, %v790_v62  ;;  %v5350_v25 = vmul.u32.u64.high %v5310_v9, %v790_v62, %v5349_v17 }
 0x18b   : > { %v2585_v11 = vshrl.u32 %v2567_v40, %v2583_v55  ;;  %v2588_v39 = vadd.s32 127, %v2587_v13  ;;  %v782_v50 = vsel %vm776_vm7, %v779_v37, %v781_v30  ;;  %v2411_v58 = vshrl.u32 %v2410_v44, 23 }
 0x18c   : > { %v2600_v51 = vsel %vm5354_vm11, 0, %v2598_v14  ;;  %v801_v40 = vadd.s32 1, %v5345_v1  ;;  %v2407_v7 = vand.u32 2147483647, %v5301_v8  ;;  %v1058_v59 = vand.u32 2139095040, %v5305_v49 }
 0x18d   : > { %v2586_v33 = vor.u32 %v2585_v11, %v2584_v42  ;;  %v2589_v61 = vshll.u32 %v2588_v39, 23  ;;  %v4083_v54 = vadd.s32 4294967169, %v2411_v58  ;;  %vm943_vm12 = vcmp.eq.s32.totalorder %v5290_v3, 0 }
 0x18e   : > { %v798_v35 = vmul.u32 %v5310_v9, %v782_v50  ;;  %vm800_vm13 = vc.u32 %v5350_v25, %v5344_v19  ;;  %vm946_vm14 = vcmp.eq.s32.totalorder %v5290_v3, 2  ;;  %v2604_v0 = vadd.s32 3, %v2600_v51 }
 0x18f   : > { %v2590_v10 = vor.u32 4788187, %v2589_v61  ;;  %v802_v53 = vsel %vm800_vm13, %v801_v40, %v5345_v1  ;;  %v2417_v47 = vadd.s32 1, %v4083_v54  ;;  %v2593_v15 = vcvt.s32.f32 %v2586_v33 }
 0x190   : > { %v4429_v52 = vpop.eup %4428  ;;  %v803_v32 = vadd.s32 %v802_v53, %v798_v35  ;;  %v2414_v57 = vand.u32 8388607, %v2407_v7  ;;  %v1059_v9 = vshrl.u32 %v1058_v59, 23  ;;  %vm939_vm0 = vweird.f32 %v5061_v36 }
 0x191   : > { %v4431_v14 = vpop.eup %4430  ;;  %v947_v31 = vxor.u32 2147483648, %v4429_v52  ;;  %v2591_v44 = vand.u32 2147483647, %v2590_v10  ;;  %vm2418_vm15 = vcmp.gt.s32.totalorder %v2417_v47, 0  ;;  %vm942_vm1 = vcmp.lt.s32.totalorder %v5290_v3, 2 }
 0x192   : > { %v944_v43 = vxor.u32 2147483648, %v4431_v14  ;;  %v804_v4 = vadd.s32 536870912, %v803_v32  ;;  %v2419_v37 = vsel %vm2418_vm15, %v2417_v47, 0  ;;  %v5376_v60 = vand.u32 3, %v2604_v0 }
 0x193   : > { %v948_v45 = vsel %vm946_vm14, %v947_v31, %v4431_v14  ;;  %v2594_v34 = vmul.f32 %v2593_v15, %v2591_v44  ;;  %v2421_v48 = vand.u32 31, %v2419_v37  ;;  %v2415_v30 = vor.u32 8388608, %v2414_v57 }
 0x194   : > { %v945_v21 = vsel %vm943_vm12, %v4429_v52, %v944_v43  ;;  %v5378_v55 = vshrl.u32 %v804_v4, 30  ;;  %v1055_v42 = vand.u32 2147483647, %v5305_v49  ;;  %v4031_v1 = vadd.s32 4294967169, %v1059_v9 }
 0x195   : > { %v949_v27 = vsel %vm942_vm1, %v945_v21, %v948_v45  ;;  %v2595_v56 = vxor.u32 2147483648, %v2594_v34  ;;  %v2422_v41 = vsub.s32 32, %v2421_v48  ;;  %v2424_v3 = vshll.u32 %v4609_v12, %v2421_v48 }
 0x196   : > { %v950_v13 = vsel %vm939_vm0, nan, %v949_v27  ;;  %v806_v62 = vshll.u32 %v5378_v55, 30  ;;  %v2427_v17 = vshll.u32 %v4610_v16, %v2421_v48  ;;  %v2430_v33 = vshll.u32 %v4611_v18, %v2421_v48 }
 0x197   : > { %3866 = vst [vmem:[%s5083_s10 + $0x18] sm:$0xff] %v950_v13  ;;  %v2596_v36 = vsel %vm2513_vm5, %v2595_v56, %v2594_v34  ;;  %v2425_v39 = vshrl.u32 %v4610_v16, %v2422_v41  ;;  %v2428_v50 = vshrl.u32 %v4611_v18, %v2422_v41  ;;  %v2431_v61 = vshrl.u32 %v4612_v20, %v2422_v41 }
 0x198   : > { %v2599_v11 = vsel %vm5354_vm11, %v5118_v23, %v2596_v36  ;;  %v5392_v58 = vsub.s32 %v803_v32, %v806_v62  ;;  %v799_v51 = vadd.s32 %v5344_v19, %v5350_v25  ;;  %v2420_v40 = vshrl.u32 %v2419_v37, 5 }
 0x199   : > { %4432 = vcosq.f32 %v2599_v11  ;;  %v5398_v38 = vshll.u32 %v2415_v30, 8  ;;  %v2426_v59 = vor.u32 %v2425_v39, %v2424_v3  ;;  %v2429_v10 = vor.u32 %v2428_v50, %v2427_v17  ;;  %v5428_v50 = vpop.f32.mrb[7].mxu0 }
 0x19a   : > { %4434 = vsinq.f32 %v2599_v11  ;;  %v809_v54 = vsub.s32 0, %v5392_v58  ;;  %v2432_v35 = vor.u32 %v2431_v61, %v2430_v33  ;;  %v2433_v52 = vshll.u32 %v4612_v20, %v2421_v48 }
 0x19b   : > { %v2434_v0 = vshrl.u32 %v4613_v22, %v2422_v41  ;;  %v2436_v53 = vshll.u32 %v4613_v22, %v2421_v48  ;;  %v2437_v47 = vshrl.u32 %v4614_v29, %v2422_v41  ;;  %vm2610_vm2 = vcmp.eq.s32.totalorder %v5376_v60, 2 }
 0x19c   : > { %v4020_v19 = vmin.u32 %v809_v54, %v5392_v58  ;;  %v829_v25 = vsub.s32 4, %v5378_v55  ;;  %v5410_v14 = vand.u32 8388607, %v1055_v42  ;;  %v1065_v31 = vadd.s32 1, %v4031_v1 }
 0x19d   : > { %vm2607_vm3 = vcmp.eq.s32.totalorder %v5376_v60, 0  ;;  %v2423_v44 = vshrl.u32 %v4609_v12, %v2422_v41  ;;  %v2435_v15 = vor.u32 %v2434_v0, %v2433_v52  ;;  %v2438_v32 = vor.u32 %v2437_v47, %v2436_v53 }
 0x19e   : > { %vm2439_vm4 = vcmp.lt.s32.totalorder %v2420_v40, 1  ;;  %vm2606_vm5 = vcmp.lt.s32.totalorder %v5376_v60, 2  ;;  %vm745_vm6 = vcmp.lt.s32.totalorder %v5127_v28, 0  ;;  %v811_v43 = vclz %v4020_v19 }
 0x19f   : > { %vm2440_vm7 = vcmp.lt.s32.totalorder %v2420_v40, 2  ;;  %vm2441_vm8 = vcmp.lt.s32.totalorder %v2420_v40, 3  ;;  %vm2442_vm9 = vcmp.lt.s32.totalorder %v2420_v40, 4  ;;  %vm2603_vm10 = vweird.f32 %v5118_v23 }
 0x1a0   : > { %v2444_v57 = vsel %vm2442_vm9, %v2432_v35, 2102212464  ;;  %v2447_v9 = vsel %vm2439_vm4, %v2426_v59, %v2429_v10  ;;  %v2448_v45 = vsel %vm2442_vm9, %v2435_v15, 920167782  ;;  %v2451_v34 = vsel %vm2439_vm4, %v2429_v10, %v2432_v35 }
 0x1a1   : > { %v4021_v4 = vadd.s32 4294967294, %v811_v43  ;;  %v2443_v37 = vsel %vm2439_vm4, %v2423_v44, %v2426_v59  ;;  %v2449_v21 = vsel %vm2441_vm8, %v2432_v35, %v2448_v45  ;;  %v2452_v48 = vsel %vm2442_vm9, %v2438_v32, 1326507024 }
 0x1a2   : > { %v2445_v27 = vsel %vm2441_vm8, %v2429_v10, %v2444_v57  ;;  %v2450_v56 = vsel %vm2440_vm7, %v2447_v9, %v2449_v21  ;;  %v2453_v13 = vsel %vm2441_vm8, %v2435_v15, %v2452_v48  ;;  %vm1066_vm11 = vcmp.gt.s32.totalorder %v1065_v31, 0 }
 0x1a3   : > { %v4433_v30 = vpop.eup %4432  ;;  %vm4022_vm12 = vcmp.lt.s32.totalorder %v4021_v4, 0  ;;  %v2454_v41 = vsel %vm2440_vm7, %v2451_v34, %v2453_v13  ;;  %v5420_v36 = vmul.u32.u64.low %v5398_v38, %v2450_v56  ;;  %v5421_v62 = vmul.u32.u64.high %v5398_v38, %v2450_v56, %v5420_v36 }
 0x1a4   : > { %v4435_v3 = vpop.eup %4434  ;;  %v2611_v1 = vxor.u32 2147483648, %v4433_v30  ;;  %v814_v11 = vsel %vm4022_vm12, 0, %v4021_v4  ;;  %v5425_v39 = vmul.u32.u64.low %v5398_v38, %v2454_v41  ;;  %v5426_v17 = vmul.u32.u64.high %v5398_v38, %v2454_v41, %v5425_v39 }
 0x1a5   : > { %v2608_v33 = vxor.u32 2147483648, %v4435_v3  ;;  %v815_v61 = vsub.s32 32, %v814_v11  ;;  %v819_v54 = vsub.s32 4294967266, %v814_v11  ;;  %v2446_v59 = vsel %vm2440_vm7, %v2443_v37, %v2445_v27 }
 0x1a6   : > { %v2612_v10 = vsel %vm2610_vm2, %v2611_v1, %v4435_v3  ;;  %v816_v35 = vshll.u32 %v5392_v58, %v814_v11  ;;  %v1063_v52 = vor.u32 8388608, %v5410_v14  ;;  %v1067_v0 = vsel %vm1066_vm11, %v1065_v31, 0 }
 0x1a7   : > { %v2609_v53 = vsel %vm2607_vm3, %v4433_v30, %v2608_v33  ;;  %v817_v47 = vshrl.u32 %v799_v51, %v815_v61  ;;  %v820_v19 = vadd.s32 127, %v819_v54  ;;  %v2465_v44 = vadd.s32 1, %v5421_v62 }
 0x1a8   : > { %v2613_v40 = vsel %vm2606_vm5, %v2609_v53, %v2612_v10  ;;  %v830_v15 = vsel %vm745_vm6, %v829_v25, %v5378_v55  ;;  %v2462_v58 = vmul.u32 %v5398_v38, %v2446_v59  ;;  %vm2464_vm13 = vc.u32 %v5426_v17, %v5420_v36 }
 0x1a9   : > { %v2614_v14 = vsel %vm2603_vm10, nan, %v2613_v40  ;;  %v818_v31 = vor.u32 %v817_v47, %v816_v35  ;;  %v821_v51 = vshll.u32 %v820_v19, 23  ;;  %v2466_v32 = vsel %vm2464_vm13, %v2465_v44, %v5421_v62 }
 0x1aa   : > { %3882 = vst [vmem:[%s5083_s10 + $0x98] sm:$0xff] %v2614_v14  ;;  %vm5453_vm14 = vcmp.le.f32.partialorder %v743_v6, 0.7853982  ;;  %v2467_v55 = vadd.s32 %v2466_v32, %v2462_v58  ;;  %v1069_v25 = vand.u32 31, %v1067_v0  ;;  %v5459_v57 = vshll.u32 %v1063_v52, 8 }
 0x1ab   : > { %v822_v38 = vor.u32 4788187, %v821_v51  ;;  %v832_v43 = vsel %vm5453_vm14, 0, %v830_v15  ;;  %v825_v23 = vcvt.s32.f32 %v818_v31  ;;  %v5461_v45 = vshrl.u32 %v1067_v0, 5 }
 0x1ac   : > { %v2468_v9 = vadd.s32 536870912, %v2467_v55  ;;  %v1070_v34 = vsub.s32 32, %v1069_v25  ;;  %v1072_v37 = vshll.u32 %v4609_v12, %v1069_v25  ;;  %v1075_v6 = vshll.u32 %v4610_v16, %v1069_v25 }
 0x1ad   : > { %v823_v4 = vand.u32 2147483647, %v822_v38  ;;  %v1078_v21 = vshll.u32 %v4611_v18, %v1069_v25  ;;  %v1081_v13 = vshll.u32 %v4612_v20, %v1069_v25  ;;  %v836_v1 = vadd.s32 3, %v832_v43 }
 0x1ae   : > { %v2469_v48 = vshrl.u32 %v2468_v9, 30  ;;  %v1073_v27 = vshrl.u32 %v4610_v16, %v1070_v34  ;;  %v1076_v56 = vshrl.u32 %v4611_v18, %v1070_v34  ;;  %v1079_v41 = vshrl.u32 %v4612_v20, %v1070_v34 }
 0x1af   : > { %v826_v30 = vmul.f32 %v825_v23, %v823_v4  ;;  %v1082_v62 = vshrl.u32 %v4613_v22, %v1070_v34  ;;  %v1085_v3 = vshrl.u32 %v4614_v29, %v1070_v34  ;;  %v1084_v10 = vshll.u32 %v4613_v22, %v1069_v25  ;;  %v5510_v23 = vpop.f32.mrb[7].mxu1 }
 0x1b0   : > { %v2470_v11 = vshll.u32 %v2469_v48, 30  ;;  %v1074_v39 = vor.u32 %v1073_v27, %v1072_v37  ;;  %v1077_v33 = vor.u32 %v1076_v56, %v1075_v6  ;;  %v1080_v54 = vor.u32 %v1079_v41, %v1078_v21 }
 0x1b1   : > { %v827_v61 = vxor.u32 2147483648, %v826_v30  ;;  %v1083_v59 = vor.u32 %v1082_v62, %v1081_v13  ;;  %vm1087_vm15 = vcmp.lt.s32.totalorder %v5461_v45, 1  ;;  %vm1090_vm0 = vcmp.lt.s32.totalorder %v5461_v45, 4 }
 0x1b2   : > { %v5473_v35 = vsub.s32 %v2467_v55, %v2470_v11  ;;  %v5479_v52 = vadd.f32 %v5297_v24, %v4958_v46  ;;  %v1086_v53 = vor.u32 %v1085_v3, %v1084_v10  ;;  %v1095_v47 = vsel %vm1087_vm15, %v1074_v39, %v1077_v33 }
 0x1b3   : > { %v828_v0 = vsel %vm745_vm6, %v827_v61, %v826_v30  ;;  %v1096_v19 = vsel %vm1090_vm0, %v1083_v59, 920167782  ;;  %vm1088_vm1 = vcmp.lt.s32.totalorder %v5461_v45, 2  ;;  %vm1089_vm2 = vcmp.lt.s32.totalorder %v5461_v45, 3 }
 0x1b4   : > { %v831_v44 = vsel %vm5453_vm14, %v5127_v28, %v828_v0  ;;  %v2473_v40 = vsub.s32 0, %v5473_v35  ;;  %v2493_v46 = vsub.s32 4, %v2469_v48  ;;  %v1071_v15 = vshrl.u32 %v4609_v12, %v1070_v34 }
 0x1b5   : > { %4436 = vcosq.f32 %v831_v44  ;;  %v1097_v58 = vsel %vm1089_vm2, %v1080_v54, %v1096_v19  ;;  %v1092_v31 = vsel %vm1090_vm0, %v1080_v54, 2102212464  ;;  %v1099_v32 = vsel %vm1087_vm15, %v1077_v33, %v1080_v54 }
 0x1b6   : > { %4438 = vsinq.f32 %v831_v44  ;;  %v4084_v14 = vmin.u32 %v2473_v40, %v5473_v35  ;;  %v1098_v51 = vsel %vm1088_vm1, %v1095_v47, %v1097_v58  ;;  %v1100_v60 = vsel %vm1090_vm0, %v1086_v53, 1326507024 }
 0x1b7   : > { %v5506_v55 = vmul.u32.u64.low %v5459_v57, %v1098_v51  ;;  %v5507_v25 = vmul.u32.u64.high %v5459_v57, %v1098_v51, %v5506_v55  ;;  %v837_v38 = vand.u32 3, %v836_v1  ;;  %v1091_v9 = vsel %vm1087_vm15, %v1071_v15, %v1074_v39 }
 0x1b8   : > { %v2475_v43 = vclz %v4084_v14  ;;  %v1093_v34 = vsel %vm1089_vm2, %v1077_v33, %v1092_v31  ;;  %v1101_v4 = vsel %vm1089_vm2, %v1083_v59, %v1100_v60  ;;  %v2722_v37 = vand.u32 2139095040, %v5479_v52 }
 0x1b9   : > { %vm5521_vm3 = vcmp.le.f32.partialorder %v2407_v7, 0.7853982  ;;  %vm2409_vm4 = vcmp.lt.s32.totalorder %v5301_v8, 0  ;;  %v1102_v27 = vsel %vm1088_vm1, %v1099_v32, %v1101_v4  ;;  %v2719_v41 = vand.u32 2147483647, %v5479_v52 }
 0x1ba   : > { %v4085_v21 = vadd.s32 4294967294, %v2475_v43  ;;  %v2494_v56 = vsel %vm2409_vm4, %v2493_v46, %v2469_v48  ;;  %v5531_v13 = vmul.u32.u64.low %v5459_v57, %v1102_v27  ;;  %v5532_v30 = vmul.u32.u64.high %v5459_v57, %v1102_v27, %v5531_v13 }
 0x1bb   : > { %vm835_vm5 = vweird.f32 %v5127_v28  ;;  %v1094_v7 = vsel %vm1088_vm1, %v1091_v9, %v1093_v34  ;;  %v1113_v62 = vadd.s32 1, %v5507_v25  ;;  %v2723_v3 = vshrl.u32 %v2722_v37, 23 }
 0x1bc   : > { %vm4086_vm6 = vcmp.lt.s32.totalorder %v4085_v21, 0  ;;  %vm838_vm7 = vcmp.lt.s32.totalorder %v837_v38, 2  ;;  %vm842_vm8 = vcmp.eq.s32.totalorder %v837_v38, 2  ;;  %v2463_v48 = vadd.s32 %v5420_v36, %v5426_v17 }
 0x1bd   : > { %v2478_v1 = vsel %vm4086_vm6, 0, %v4085_v21  ;;  %v2496_v33 = vsel %vm5521_vm3, 0, %v2494_v56  ;;  %v4095_v61 = vadd.s32 4294967169, %v2723_v3  ;;  %v1110_v45 = vmul.u32 %v5459_v57, %v1094_v7 }
 0x1be   : > { %v2479_v11 = vsub.s32 32, %v2478_v1  ;;  %v2483_v39 = vsub.s32 4294967266, %v2478_v1  ;;  %v2480_v59 = vshll.u32 %v5473_v35, %v2478_v1  ;;  %vm1112_vm9 = vc.u32 %v5532_v30, %v5506_v55 }
 0x1bf   : > { %v4437_v54 = vpop.eup %4436  ;;  %v2726_v10 = vand.u32 8388607, %v2719_v41  ;;  %v1114_v47 = vsel %vm1112_vm9, %v1113_v62, %v5507_v25  ;;  %v2729_v40 = vadd.s32 1, %v4095_v61  ;;  %v5552_v35 = vadd.f32 %v5297_v24, %v5092_v5 }
 0x1c0   : > { %v4439_v0 = vpop.eup %4438  ;;  %v843_v36 = vxor.u32 2147483648, %v4437_v54  ;;  %v2481_v17 = vshrl.u32 %v2463_v48, %v2479_v11  ;;  %v2484_v53 = vadd.s32 127, %v2483_v39  ;;  %v1115_v44 = vadd.s32 %v1114_v47, %v1110_v45 }
 0x1c1   : > { %v840_v19 = vxor.u32 2147483648, %v4439_v0  ;;  %vm839_vm10 = vcmp.eq.s32.totalorder %v837_v38, 0  ;;  %v2500_v14 = vadd.s32 3, %v2496_v33  ;;  %vm2730_vm11 = vcmp.gt.s32.totalorder %v2729_v40, 0 }
 0x1c2   : > { %v844_v57 = vsel %vm842_vm8, %v843_v36, %v4439_v0  ;;  %v2482_v46 = vor.u32 %v2481_v17, %v2480_v59  ;;  %v2485_v15 = vshll.u32 %v2484_v53, 23  ;;  %v1116_v31 = vadd.s32 536870912, %v1115_v44 }
 0x1c3   : > { %v841_v58 = vsel %vm839_vm10, %v4437_v54, %v840_v19  ;;  %v2727_v60 = vor.u32 8388608, %v2726_v10  ;;  %v2731_v25 = vsel %vm2730_vm11, %v2729_v40, 0  ;;  %v954_v34 = vand.u32 2139095040, %v5552_v35 }
 0x1c4   : > { %v845_v51 = vsel %vm838_vm7, %v841_v58, %v844_v57  ;;  %v2486_v32 = vor.u32 4788187, %v2485_v15  ;;  %v1117_v5 = vshrl.u32 %v1116_v31, 30  ;;  %v2733_v9 = vand.u32 31, %v2731_v25 }
 0x1c5   : > { %v846_v43 = vsel %vm835_vm5, nan, %v845_v51  ;;  %v2489_v37 = vcvt.s32.f32 %v2482_v46  ;;  %vm1057_vm12 = vcmp.lt.s32.totalorder %v5305_v49, 0  ;;  %v5561_v21 = vand.u32 3, %v2500_v14 }
 0x1c6   : > { %3865 = vst [vmem:[%s5083_s10 + $0x10] sm:$0xff] %v846_v43  ;;  %v2487_v4 = vand.u32 2147483647, %v2486_v32  ;;  %vm5565_vm13 = vcmp.le.f32.partialorder %v1055_v42, 0.7853982  ;;  %v1118_v27 = vshll.u32 %v1117_v5, 30  ;;  %v1111_v7 = vadd.s32 %v5506_v55, %v5532_v30 }
 0x1c7   : > { %v2734_v28 = vsub.s32 32, %v2733_v9  ;;  %v951_v56 = vand.u32 2147483647, %v5552_v35  ;;  %v1141_v62 = vsub.s32 4, %v1117_v5  ;;  %v5572_v3 = vshll.u32 %v2727_v60, 8 }
 0x1c8   : > { %v2490_v13 = vmul.f32 %v2489_v37, %v2487_v4  ;;  %v5574_v48 = vsub.s32 %v1115_v44, %v1118_v27  ;;  %v5576_v1 = vshrl.u32 %v2731_v25, 5  ;;  %v955_v11 = vshrl.u32 %v954_v34, 23 }
 0x1c9   : > { %v2737_v42 = vshrl.u32 %v4610_v16, %v2734_v28  ;;  %v2736_v33 = vshll.u32 %v4609_v12, %v2733_v9  ;;  %v2740_v61 = vshrl.u32 %v4611_v18, %v2734_v28  ;;  %v2743_v54 = vshrl.u32 %v4612_v20, %v2734_v28 }
 0x1ca   : > { %v2491_v39 = vxor.u32 2147483648, %v2490_v13  ;;  %v1121_v59 = vsub.s32 0, %v5574_v48  ;;  %v2739_v55 = vshll.u32 %v4610_v16, %v2733_v9  ;;  %v2742_v30 = vshll.u32 %v4611_v18, %v2733_v9 }
 0x1cb   : > { %v2746_v45 = vshrl.u32 %v4613_v22, %v2734_v28  ;;  %v1142_v0 = vsel %vm1057_vm12, %v1141_v62, %v1117_v5  ;;  %v2738_v36 = vor.u32 %v2737_v42, %v2736_v33  ;;  %v2745_v17 = vshll.u32 %v4612_v20, %v2733_v9 }
 0x1cc   : > { %v2492_v10 = vsel %vm2409_vm4, %v2491_v39, %v2490_v13  ;;  %v4032_v47 = vmin.u32 %v1121_v59, %v5574_v48  ;;  %v2741_v19 = vor.u32 %v2740_v61, %v2739_v55  ;;  %v2744_v44 = vor.u32 %v2743_v54, %v2742_v30 }
 0x1cd   : > { %v2495_v53 = vsel %vm5521_vm3, %v5301_v8, %v2492_v10  ;;  %v2747_v40 = vor.u32 %v2746_v45, %v2745_v17  ;;  %v2748_v57 = vshll.u32 %v4613_v22, %v2733_v9  ;;  %v2749_v46 = vshrl.u32 %v4614_v29, %v2734_v28  ;;  %v5630_v10 = vpop.f32.mrb[8].mxu0 }
 0x1ce   : > { %4440 = vcosq.f32 %v2495_v53  ;;  %v1123_v15 = vclz %v4032_v47  ;;  %v4027_v58 = vadd.s32 4294967169, %v955_v11  ;;  %v5599_v14 = vand.u32 8388607, %v951_v56 }
 0x1cf   : > { %4442 = vsinq.f32 %v2495_v53  ;;  %v1144_v6 = vsel %vm5565_vm13, 0, %v1142_v0  ;;  %v2735_v31 = vshrl.u32 %v4609_v12, %v2734_v28  ;;  %v2750_v51 = vor.u32 %v2749_v46, %v2748_v57 }
 0x1d0   : > { %vm2751_vm14 = vcmp.lt.s32.totalorder %v5576_v1, 1  ;;  %v4033_v32 = vadd.s32 4294967294, %v1123_v15  ;;  %vm2753_vm15 = vcmp.lt.s32.totalorder %v5576_v1, 3  ;;  %vm2754_vm0 = vcmp.lt.s32.totalorder %v5576_v1, 4 }
 0x1d1   : > { %v2759_v60 = vsel %vm2751_vm14, %v2738_v36, %v2741_v19  ;;  %v2756_v25 = vsel %vm2754_vm0, %v2744_v44, 2102212464  ;;  %v2760_v43 = vsel %vm2754_vm0, %v2747_v40, 920167782  ;;  %v2763_v5 = vsel %vm2751_vm14, %v2741_v19, %v2744_v44 }
 0x1d2   : > { %v2764_v9 = vsel %vm2754_vm0, %v2750_v51, 1326507024  ;;  %vm4034_vm1 = vcmp.lt.s32.totalorder %v4033_v32, 0  ;;  %vm2752_vm2 = vcmp.lt.s32.totalorder %v5576_v1, 2  ;;  %v2761_v34 = vsel %vm2753_vm15, %v2744_v44, %v2760_v43 }
 0x1d3   : > { %v2765_v4 = vsel %vm2753_vm15, %v2747_v40, %v2764_v9  ;;  %vm2502_vm3 = vcmp.lt.s32.totalorder %v5561_v21, 2  ;;  %v1126_v37 = vsel %vm4034_vm1, 0, %v4033_v32  ;;  %v2755_v27 = vsel %vm2751_vm14, %v2735_v31, %v2738_v36 }
 0x1d4   : > { %v2762_v28 = vsel %vm2752_vm2, %v2759_v60, %v2761_v34  ;;  %v2766_v13 = vsel %vm2752_vm2, %v2763_v5, %v2765_v4  ;;  %vm2499_vm4 = vweird.f32 %v5301_v8  ;;  %v1127_v62 = vsub.s32 32, %v1126_v37 }
 0x1d5   : > { %v1131_v42 = vsub.s32 4294967266, %v1126_v37  ;;  %v2757_v11 = vsel %vm2753_vm15, %v2741_v19, %v2756_v25  ;;  %v961_v39 = vadd.s32 1, %v4027_v58  ;;  %v1128_v55 = vshll.u32 %v5574_v48, %v1126_v37 }
 0x1d6   : > { %v5621_v33 = vmul.u32.u64.low %v5572_v3, %v2766_v13  ;;  %v5622_v61 = vmul.u32.u64.high %v5572_v3, %v2766_v13, %v5621_v33  ;;  %v5625_v54 = vmul.u32.u64.low %v5572_v3, %v2762_v28  ;;  %v5626_v59 = vmul.u32.u64.high %v5572_v3, %v2762_v28, %v5625_v54 }
 0x1d7   : > { %v1129_v30 = vshrl.u32 %v1111_v7, %v1127_v62  ;;  %v1132_v45 = vadd.s32 127, %v1131_v42  ;;  %vm962_vm5 = vcmp.gt.s32.totalorder %v961_v39, 0  ;;  %vm2503_vm6 = vcmp.eq.s32.totalorder %v5561_v21, 0 }
 0x1d8   : > { %v4441_v0 = vpop.eup %4440  ;;  %vm2506_vm7 = vcmp.eq.s32.totalorder %v5561_v21, 2  ;;  %v2758_v36 = vsel %vm2752_vm2, %v2755_v27, %v2757_v11  ;;  %v963_v17 = vsel %vm962_vm5, %v961_v39, 0  ;;  %v959_v48 = vor.u32 8388608, %v5599_v14 }
 0x1d9   : > { %v4443_v53 = vpop.eup %4442  ;;  %v2507_v47 = vxor.u32 2147483648, %v4441_v0  ;;  %v1130_v19 = vor.u32 %v1129_v30, %v1128_v55  ;;  %v1133_v44 = vshll.u32 %v1132_v45, 23  ;;  %v1148_v40 = vadd.s32 3, %v1144_v6 }
 0x1da   : > { %v2504_v7 = vxor.u32 2147483648, %v4443_v53  ;;  %vm2776_vm8 = vc.u32 %v5622_v61, %v5625_v54  ;;  %v2777_v57 = vadd.s32 1, %v5626_v59  ;;  %v2774_v1 = vmul.u32 %v5572_v3, %v2758_v36 }
 0x1db   : > { %v2508_v46 = vsel %vm2506_vm7, %v2507_v47, %v4443_v53  ;;  %v1134_v15 = vor.u32 4788187, %v1133_v44  ;;  %v965_v58 = vand.u32 31, %v963_v17  ;;  %v1137_v51 = vcvt.s32.f32 %v1130_v19 }
 0x1dc   : > { %v2505_v31 = vsel %vm2503_vm6, %v4441_v0, %v2504_v7  ;;  %v2778_v32 = vsel %vm2776_vm8, %v2777_v57, %v5626_v59  ;;  %v5646_v14 = vadd.f32 %v5297_v24, %v5159_v63  ;;  %v5652_v5 = vand.u32 3, %v1148_v40 }
 0x1dd   : > { %v2509_v6 = vsel %vm2502_vm3, %v2505_v31, %v2508_v46  ;;  %v1135_v60 = vand.u32 2147483647, %v1134_v15  ;;  %v2779_v25 = vadd.s32 %v2778_v32, %v2774_v1  ;;  %v966_v43 = vsub.s32 32, %v965_v58 }
 0x1de   : > { %v2510_v3 = vsel %vm2499_vm4, nan, %v2509_v6  ;;  %v964_v9 = vshrl.u32 %v963_v17, 5  ;;  %v968_v34 = vshll.u32 %v4609_v12, %v965_v58  ;;  %v971_v27 = vshll.u32 %v4610_v16, %v965_v58 }
 0x1df   : > { %3881 = vst [vmem:[%s5083_s10 + $0x90] sm:$0xff] %v2510_v3  ;;  %v1138_v4 = vmul.f32 %v1137_v51, %v1135_v60  ;;  %v2780_v37 = vadd.s32 536870912, %v2779_v25  ;;  %v969_v63 = vshrl.u32 %v4610_v16, %v966_v43  ;;  %v972_v21 = vshrl.u32 %v4611_v18, %v966_v43 }
 0x1e0   : > { %v974_v28 = vshll.u32 %v4611_v18, %v965_v58  ;;  %v975_v13 = vshrl.u32 %v4612_v20, %v966_v43  ;;  %v978_v8 = vshrl.u32 %v4613_v22, %v966_v43  ;;  %v977_v39 = vshll.u32 %v4612_v20, %v965_v58 }
 0x1e1   : > { %v1139_v62 = vxor.u32 2147483648, %v1138_v4  ;;  %v2781_v42 = vshrl.u32 %v2780_v37, 30  ;;  %v970_v11 = vor.u32 %v969_v63, %v968_v34  ;;  %v973_v33 = vor.u32 %v972_v21, %v971_v27 }
 0x1e2   : > { %v976_v59 = vor.u32 %v975_v13, %v974_v28  ;;  %v980_v55 = vshll.u32 %v4613_v22, %v965_v58  ;;  %v981_v30 = vshrl.u32 %v4614_v29, %v966_v43  ;;  %v979_v36 = vor.u32 %v978_v8, %v977_v39 }
 0x1e3   : > { %v1140_v45 = vsel %vm1057_vm12, %v1139_v62, %v1138_v4  ;;  %v2782_v0 = vshll.u32 %v2781_v42, 30  ;;  %v5667_v17 = vshll.u32 %v959_v48, 8  ;;  %vm983_vm9 = vcmp.lt.s32.totalorder %v964_v9, 1 }
 0x1e4   : > { %v1143_v53 = vsel %vm5565_vm13, %v5305_v49, %v1140_v45  ;;  %v982_v47 = vor.u32 %v981_v30, %v980_v55  ;;  %v2618_v19 = vand.u32 2139095040, %v5646_v14  ;;  %vm984_vm10 = vcmp.lt.s32.totalorder %v964_v9, 2 }
 0x1e5   : > { %4444 = vcosq.f32 %v1143_v53  ;;  %v5673_v44 = vsub.s32 %v2779_v25, %v2782_v0  ;;  %vm986_vm11 = vcmp.lt.s32.totalorder %v964_v9, 4  ;;  %v967_v7 = vshrl.u32 %v4609_v12, %v966_v43 }
 0x1e6   : > { %4446 = vsinq.f32 %v1143_v53  ;;  %v988_v40 = vsel %vm986_vm11, %v976_v59, 2102212464  ;;  %v991_v48 = vsel %vm983_vm9, %v970_v11, %v973_v33  ;;  %v2805_v46 = vsub.s32 4, %v2781_v42 }
 0x1e7   : > { %v2785_v57 = vsub.s32 0, %v5673_v44  ;;  %vm985_vm12 = vcmp.lt.s32.totalorder %v964_v9, 3  ;;  %v992_v38 = vsel %vm986_vm11, %v979_v36, 920167782  ;;  %v987_v15 = vsel %vm983_vm9, %v967_v7, %v970_v11  ;;  %v5707_v9 = vpop.f32.mrb[8].mxu1 }
 0x1e8   : > { %v993_v1 = vsel %vm985_vm12, %v976_v59, %v992_v38  ;;  %v995_v58 = vsel %vm983_vm9, %v973_v33, %v976_v59  ;;  %v996_v31 = vsel %vm986_vm11, %v982_v47, 1326507024  ;;  %v989_v32 = vsel %vm985_vm12, %v973_v33, %v988_v40 }
 0x1e9   : > { %v4096_v51 = vmin.u32 %v2785_v57, %v5673_v44  ;;  %v994_v6 = vsel %vm984_vm10, %v991_v48, %v993_v1  ;;  %v997_v60 = vsel %vm985_vm12, %v979_v36, %v996_v31  ;;  %vm2721_vm13 = vcmp.lt.s32.totalorder %v5479_v52, 0 }
 0x1ea   : > { %v998_v25 = vsel %vm984_vm10, %v995_v58, %v997_v60  ;;  %v5685_v43 = vmul.u32.u64.low %v5667_v17, %v994_v6  ;;  %v5686_v3 = vmul.u32.u64.high %v5667_v17, %v994_v6, %v5685_v43  ;;  %v2806_v4 = vsel %vm2721_vm13, %v2805_v46, %v2781_v42 }
 0x1eb   : > { %v2787_v34 = vclz %v4096_v51  ;;  %v2615_v37 = vand.u32 2147483647, %v5646_v14  ;;  %v990_v63 = vsel %vm984_vm10, %v987_v15, %v989_v32  ;;  %v2619_v28 = vshrl.u32 %v2618_v19, 23 }
 0x1ec   : > { %v5693_v27 = vmul.u32.u64.low %v5667_v17, %v998_v25  ;;  %v5694_v21 = vmul.u32.u64.high %v5667_v17, %v998_v25, %v5693_v27  ;;  %vm1150_vm14 = vcmp.lt.s32.totalorder %v5652_v5, 2  ;;  %vm5699_vm15 = vcmp.le.f32.partialorder %v2719_v41, 0.7853982 }
 0x1ed   : > { %v4097_v8 = vadd.s32 4294967294, %v2787_v34  ;;  %v5705_v62 = vadd.f32 %v5297_v24, %v5286_v2  ;;  %vm1151_vm0 = vcmp.eq.s32.totalorder %v5652_v5, 0  ;;  %vm1154_vm1 = vcmp.eq.s32.totalorder %v5652_v5, 2 }
 0x1ee   : > { %v1009_v42 = vadd.s32 1, %v5686_v3  ;;  %v4091_v11 = vadd.s32 4294967169, %v2619_v28  ;;  %v2775_v41 = vadd.s32 %v5625_v54, %v5622_v61  ;;  %v2808_v33 = vsel %vm5699_vm15, 0, %v2806_v4 }
 0x1ef   : > { %v4445_v39 = vpop.eup %4444  ;;  %vm4098_vm2 = vcmp.lt.s32.totalorder %v4097_v8, 0  ;;  %v1006_v2 = vmul.u32 %v5667_v17, %v990_v63  ;;  %vm1008_vm3 = vc.u32 %v5694_v21, %v5685_v43  ;;  %v2622_v30 = vand.u32 8388607, %v2615_v37 }
 0x1f0   : > { %v4447_v24 = vpop.eup %4446  ;;  %v1155_v59 = vxor.u32 2147483648, %v4445_v39  ;;  %v2790_v55 = vsel %vm4098_vm2, 0, %v4097_v8  ;;  %v1266_v53 = vand.u32 2139095040, %v5705_v62  ;;  %v1010_v17 = vsel %vm1008_vm3, %v1009_v42, %v5686_v3 }
 0x1f1   : > { %v1152_v45 = vxor.u32 2147483648, %v4447_v24  ;;  %v2791_v0 = vsub.s32 32, %v2790_v55  ;;  %v2795_v36 = vsub.s32 4294967266, %v2790_v55  ;;  %v2792_v54 = vshll.u32 %v5673_v44, %v2790_v55 }
 0x1f2   : > { %v1156_v61 = vsel %vm1154_vm1, %v1155_v59, %v4447_v24  ;;  %v2625_v47 = vadd.s32 1, %v4091_v11  ;;  %v1011_v48 = vadd.s32 %v1010_v17, %v1006_v2  ;;  %vm1147_vm4 = vweird.f32 %v5305_v49 }
 0x1f3   : > { %v1153_v19 = vsel %vm1151_vm0, %v4445_v39, %v1152_v45  ;;  %v2793_v7 = vshrl.u32 %v2775_v41, %v2791_v0  ;;  %v2796_v40 = vadd.s32 127, %v2795_v36  ;;  %v2812_v46 = vadd.s32 3, %v2808_v33 }
 0x1f4   : > { %v1157_v57 = vsel %vm1150_vm14, %v1153_v19, %v1156_v61  ;;  %vm2626_vm5 = vcmp.gt.s32.totalorder %v2625_v47, 0  ;;  %v1012_v44 = vadd.s32 536870912, %v1011_v48  ;;  %v2623_v58 = vor.u32 8388608, %v2622_v30 }
 0x1f5   : > { %v1158_v38 = vsel %vm1147_vm4, nan, %v1157_v57  ;;  %v2794_v15 = vor.u32 %v2793_v7, %v2792_v54  ;;  %v2797_v1 = vshll.u32 %v2796_v40, 23  ;;  %v2627_v31 = vsel %vm2626_vm5, %v2625_v47, 0 }
 0x1f6   : > { %3868 = vst [vmem:[%s5083_s10 + $0x28] sm:$0xff] %v1158_v38  ;;  %v1013_v32 = vshrl.u32 %v1012_v44, 30  ;;  %v1267_v6 = vshrl.u32 %v1266_v53, 23  ;;  %v2629_v60 = vand.u32 31, %v2627_v31  ;;  %v5731_v34 = vand.u32 3, %v2812_v46 }
 0x1f7   : > { %v2798_v51 = vor.u32 4788187, %v2797_v1  ;;  %v2801_v3 = vcvt.s32.f32 %v2794_v15  ;;  %vm953_vm6 = vcmp.lt.s32.totalorder %v5552_v35, 0  ;;  %v5735_v5 = vadd.s32 %v5685_v43, %v5694_v21 }
 0x1f8   : > { %v1014_v49 = vshll.u32 %v1013_v32, 30  ;;  %v2630_v4 = vsub.s32 32, %v2629_v60  ;;  %v5737_v63 = vshll.u32 %v2623_v58, 8  ;;  %v1263_v27 = vand.u32 2147483647, %v5705_v62 }
 0x1f9   : > { %v2799_v25 = vand.u32 2147483647, %v2798_v51  ;;  %v5742_v42 = vshrl.u32 %v2627_v31, 5  ;;  %v4039_v11 = vadd.s32 4294967169, %v1267_v6  ;;  %v1037_v39 = vsub.s32 4, %v1013_v32 }
 0x1fa   : > { %v5740_v8 = vsub.s32 %v1011_v48, %v1014_v49  ;;  %v2632_v41 = vshll.u32 %v4609_v12, %v2629_v60  ;;  %v2633_v33 = vshrl.u32 %v4610_v16, %v2630_v4  ;;  %v2636_v2 = vshrl.u32 %v4611_v18, %v2630_v4  ;;  %v5789_v49 = vpop.f32.mrb[9].mxu0 }
 0x1fb   : > { %v2802_v28 = vmul.f32 %v2801_v3, %v2799_v25  ;;  %vm5749_vm7 = vcmp.le.f32.partialorder %v951_v56, 0.7853982  ;;  %v2635_v59 = vshll.u32 %v4610_v16, %v2629_v60  ;;  %v2639_v55 = vshrl.u32 %v4612_v20, %v2630_v4 }
 0x1fc   : > { %v1017_v24 = vsub.s32 0, %v5740_v8  ;;  %v2634_v30 = vor.u32 %v2633_v33, %v2632_v41  ;;  %v2638_v45 = vshll.u32 %v4611_v18, %v2629_v60  ;;  %v2641_v0 = vshll.u32 %v4612_v20, %v2629_v60 }
 0x1fd   : > { %v2803_v43 = vxor.u32 2147483648, %v2802_v28  ;;  %v2642_v36 = vshrl.u32 %v4613_v22, %v2630_v4  ;;  %v2637_v61 = vor.u32 %v2636_v2, %v2635_v59  ;;  %v2644_v54 = vshll.u32 %v4613_v22, %v2629_v60 }
 0x1fe   : > { %v4028_v56 = vmin.u32 %v1017_v24, %v5740_v8  ;;  %v2640_v47 = vor.u32 %v2639_v55, %v2638_v45  ;;  %v2645_v7 = vshrl.u32 %v4614_v29, %v2630_v4  ;;  %vm2647_vm8 = vcmp.lt.s32.totalorder %v5742_v42, 1 }
 0x1ff   : > { %v2804_v53 = vsel %vm2721_vm13, %v2803_v43, %v2802_v28  ;;  %v2643_v19 = vor.u32 %v2642_v36, %v2641_v0  ;;  %v1273_v48 = vadd.s32 1, %v4039_v11  ;;  %v1038_v57 = vsel %vm953_vm6, %v1037_v39, %v1013_v32 }
 0x200   : > { %v2807_v17 = vsel %vm5699_vm15, %v5479_v52, %v2804_v53  ;;  %v1019_v40 = vclz %v4028_v56  ;;  %v2631_v46 = vshrl.u32 %v4609_v12, %v2630_v4  ;;  %v2646_v38 = vor.u32 %v2645_v7, %v2644_v54 }
 0x201   : > { %4448 = vcosq.f32 %v2807_v17  ;;  %vm2649_vm9 = vcmp.lt.s32.totalorder %v5742_v42, 3  ;;  %vm2650_vm10 = vcmp.lt.s32.totalorder %v5742_v42, 4  ;;  %v2655_v13 = vsel %vm2647_vm8, %v2634_v30, %v2637_v61 }
 0x202   : > { %4450 = vsinq.f32 %v2807_v17  ;;  %v4029_v15 = vadd.s32 4294967294, %v1019_v40  ;;  %v2652_v1 = vsel %vm2650_vm10, %v2640_v47, 2102212464  ;;  %v2656_v44 = vsel %vm2650_vm10, %v2643_v19, 920167782 }
 0x203   : > { %v2659_v58 = vsel %vm2647_vm8, %v2637_v61, %v2640_v47  ;;  %v2660_v31 = vsel %vm2650_vm10, %v2646_v38, 1326507024  ;;  %vm2648_vm12 = vcmp.lt.s32.totalorder %v5742_v42, 2  ;;  %v2657_v51 = vsel %vm2649_vm9, %v2640_v47, %v2656_v44  ;;  %v5819_v42 = vld [vmem:[%s7488_s2] ss:$0 sm:$0xff] }
 0x204   : > { %vm4030_vm11 = vcmp.lt.s32.totalorder %v4029_v15, 0  ;;  %v2661_v32 = vsel %vm2649_vm9, %v2643_v19, %v2660_v31  ;;  %vm2815_vm13 = vcmp.eq.s32.totalorder %v5731_v34, 0  ;;  %v1040_v60 = vsel %vm5749_vm7, 0, %v1038_v57 }
 0x205   : > { %v1022_v6 = vsel %vm4030_vm11, 0, %v4029_v15  ;;  %v2658_v25 = vsel %vm2648_vm12, %v2655_v13, %v2657_v51  ;;  %v2662_v3 = vsel %vm2648_vm12, %v2659_v58, %v2661_v32  ;;  %vm2814_vm14 = vcmp.lt.s32.totalorder %v5731_v34, 2 }
 0x206   : > { %v1023_v4 = vsub.s32 32, %v1022_v6  ;;  %v1027_v28 = vsub.s32 4294967266, %v1022_v6  ;;  %v2651_v11 = vsel %vm2647_vm8, %v2631_v46, %v2634_v30  ;;  %v2653_v39 = vsel %vm2649_vm9, %v2637_v61, %v2652_v1 }
 0x207   : > { %vm2811_vm15 = vweird.f32 %v5479_v52  ;;  %v5798_v41 = vmul.u32.u64.low %v5737_v63, %v2662_v3  ;;  %v5799_v33 = vmul.u32.u64.high %v5737_v63, %v2662_v3, %v5798_v41  ;;  %v1024_v24 = vshll.u32 %v5740_v8, %v1022_v6 }
 0x208   : > { %v5802_v2 = vmul.u32.u64.low %v5737_v63, %v2658_v25  ;;  %v5803_v43 = vmul.u32.u64.high %v5737_v63, %v2658_v25, %v5802_v2  ;;  %v1025_v59 = vshrl.u32 %v5735_v5, %v1023_v4  ;;  %v1028_v55 = vadd.s32 127, %v1027_v28 }
 0x209   : > { %vm1274_vm0 = vcmp.gt.s32.totalorder %v1273_v48, 0  ;;  %v1044_v30 = vadd.s32 3, %v1040_v60  ;;  %v2654_v45 = vsel %vm2648_vm12, %v2651_v11, %v2653_v39  ;;  %v1270_v0 = vand.u32 8388607, %v1263_v27 }
 0x20a   : > { %v1275_v36 = vsel %vm1274_vm0, %v1273_v48, 0  ;;  %vm2818_vm1 = vcmp.eq.s32.totalorder %v5731_v34, 2  ;;  %v1026_v56 = vor.u32 %v1025_v59, %v1024_v24  ;;  %v1029_v61 = vshll.u32 %v1028_v55, 23 }
 0x20b   : > { %v4449_v53 = vpop.eup %4448  ;;  %v1277_v54 = vand.u32 31, %v1275_v36  ;;  %vm2672_vm2 = vc.u32 %v5799_v33, %v5802_v2  ;;  %v2673_v5 = vadd.s32 1, %v5803_v43  ;;  %v5823_v47 = vadd.f32 %v5819_v42, %v5335_v26 }
 0x20c   : > { %v4451_v17 = vpop.eup %4450  ;;  %v2819_v8 = vxor.u32 2147483648, %v4449_v53  ;;  %v1030_v7 = vor.u32 4788187, %v1029_v61  ;;  %v2670_v40 = vmul.u32 %v5737_v63, %v2654_v45  ;;  %v5826_v46 = vand.u32 3, %v1044_v30 }
 0x20d   : > { %v2816_v19 = vxor.u32 2147483648, %v4451_v17  ;;  %v1278_v48 = vsub.s32 32, %v1277_v54  ;;  %v2674_v38 = vsel %vm2672_vm2, %v2673_v5, %v5803_v43  ;;  %v1271_v15 = vor.u32 8388608, %v1270_v0 }
 0x20e   : > { %v2820_v57 = vsel %vm2818_vm1, %v2819_v8, %v4451_v17  ;;  %v1031_v1 = vand.u32 2147483647, %v1030_v7  ;;  %v1033_v44 = vcvt.s32.f32 %v1026_v56  ;;  %v2675_v58 = vadd.s32 %v2674_v38, %v2670_v40 }
 0x20f   : > { %v2817_v13 = vsel %vm2815_vm13, %v4449_v53, %v2816_v19  ;;  %v1280_v31 = vshll.u32 %v4609_v12, %v1277_v54  ;;  %v1281_v63 = vshrl.u32 %v4610_v16, %v1278_v48  ;;  %v1284_v51 = vshrl.u32 %v4611_v18, %v1278_v48 }
 0x210   : > { %v2821_v26 = vsel %vm2814_vm14, %v2817_v13, %v2820_v57  ;;  %v1034_v6 = vmul.f32 %v1033_v44, %v1031_v1  ;;  %v2676_v60 = vadd.s32 536870912, %v2675_v58  ;;  %v1287_v25 = vshrl.u32 %v4612_v20, %v1278_v48 }
 0x211   : > { %v2822_v32 = vsel %vm2811_vm15, nan, %v2821_v26  ;;  %v1276_v3 = vshrl.u32 %v1275_v36, 5  ;;  %v1283_v4 = vshll.u32 %v4610_v16, %v1277_v54  ;;  %v1286_v34 = vshll.u32 %v4611_v18, %v1277_v54 }
 0x212   : > { %3884 = vst [vmem:[%s5083_s10 + $0xa8] sm:$0xff] %v2822_v32  ;;  %v1290_v28 = vshrl.u32 %v4613_v22, %v1278_v48  ;;  %v1035_v11 = vxor.u32 2147483648, %v1034_v6  ;;  %v2677_v39 = vshrl.u32 %v2676_v60, 30  ;;  %v1282_v41 = vor.u32 %v1281_v63, %v1280_v31 }
 0x213   : > { %v1289_v43 = vshll.u32 %v4612_v20, %v1277_v54  ;;  %v1285_v24 = vor.u32 %v1284_v51, %v1283_v4  ;;  %v1288_v52 = vor.u32 %v1287_v25, %v1286_v34  ;;  %v1292_v59 = vshll.u32 %v4613_v22, %v1277_v54  ;;  %v5865_v51 = vpop.f32.mrb[9].mxu1 }
 0x214   : > { %v1293_v55 = vshrl.u32 %v4614_v29, %v1278_v48  ;;  %v1036_v30 = vsel %vm953_vm6, %v1035_v11, %v1034_v6  ;;  %v2678_v45 = vshll.u32 %v2677_v39, 30  ;;  %v5848_v36 = vshll.u32 %v1271_v15, 8 }
 0x215   : > { %v1291_v0 = vor.u32 %v1290_v28, %v1289_v43  ;;  %v1039_v53 = vsel %vm5749_vm7, %v5552_v35, %v1036_v30  ;;  %v1279_v56 = vshrl.u32 %v4609_v12, %v1278_v48  ;;  %v2930_v17 = vand.u32 2139095040, %v5823_v47 }
 0x216   : > { %v1294_v61 = vor.u32 %v1293_v55, %v1292_v59  ;;  %4452 = vcosq.f32 %v1039_v53  ;;  %v5855_v54 = vsub.s32 %v2675_v58, %v2678_v45  ;;  %vm1295_vm3 = vcmp.lt.s32.totalorder %v1276_v3, 1 }
 0x217   : > { %vm1298_vm4 = vcmp.lt.s32.totalorder %v1276_v3, 4  ;;  %4454 = vsinq.f32 %v1039_v53  ;;  %vm1296_vm5 = vcmp.lt.s32.totalorder %v1276_v3, 2  ;;  %v1303_v5 = vsel %vm1295_vm3, %v1282_v41, %v1285_v24 }
 0x218   : > { %v1300_v8 = vsel %vm1298_vm4, %v1288_v52, 2102212464  ;;  %v2681_v19 = vsub.s32 0, %v5855_v54  ;;  %v2701_v7 = vsub.s32 4, %v2677_v39  ;;  %vm1297_vm6 = vcmp.lt.s32.totalorder %v1276_v3, 3 }
 0x219   : > { %v1304_v21 = vsel %vm1298_vm4, %v1291_v0, 920167782  ;;  %v1299_v40 = vsel %vm1295_vm3, %v1279_v56, %v1282_v41  ;;  %v1307_v48 = vsel %vm1295_vm3, %v1285_v24, %v1288_v52  ;;  %v1308_v38 = vsel %vm1298_vm4, %v1294_v61, 1326507024 }
 0x21a   : > { %v1305_v57 = vsel %vm1297_vm6, %v1288_v52, %v1304_v21  ;;  %v4092_v15 = vmin.u32 %v2681_v19, %v5855_v54  ;;  %v1301_v13 = vsel %vm1297_vm6, %v1285_v24, %v1300_v8  ;;  %v1309_v44 = vsel %vm1297_vm6, %v1291_v0, %v1308_v38 }
 0x21b   : > { %v1306_v1 = vsel %vm1296_vm5, %v1303_v5, %v1305_v57  ;;  %v1310_v58 = vsel %vm1296_vm5, %v1307_v48, %v1309_v44  ;;  %v2931_v63 = vshrl.u32 %v2930_v17, 23  ;;  %vm5869_vm7 = vcmp.le.f32.partialorder %v2615_v37, 0.7853982 }
 0x21c   : > { %v5862_v26 = vmul.u32.u64.low %v5848_v36, %v1306_v1  ;;  %v5863_v31 = vmul.u32.u64.high %v5848_v36, %v1306_v1, %v5862_v26  ;;  %vm2617_vm8 = vcmp.lt.s32.totalorder %v5646_v14, 0  ;;  %v2683_v6 = vclz %v4092_v15 }
 0x21d   : > { %vm1043_vm9 = vweird.f32 %v5552_v35  ;;  %v2702_v60 = vsel %vm2617_vm8, %v2701_v7, %v2677_v39  ;;  %v5878_v25 = vmul.u32.u64.low %v5848_v36, %v1310_v58  ;;  %v5879_v4 = vmul.u32.u64.high %v5848_v36, %v1310_v58, %v5878_v25 }
 0x21e   : > { %v4103_v34 = vadd.s32 4294967169, %v2931_v63  ;;  %v4093_v28 = vadd.s32 4294967294, %v2683_v6  ;;  %v1302_v11 = vsel %vm1296_vm5, %v1299_v40, %v1301_v13  ;;  %v2927_v37 = vand.u32 2147483647, %v5823_v47 }
 0x21f   : > { %v5885_v41 = vadd.f32 %v5819_v42, %v5428_v50  ;;  %vm1046_vm10 = vcmp.lt.s32.totalorder %v5826_v46, 2  ;;  %vm1047_vm11 = vcmp.eq.s32.totalorder %v5826_v46, 0  ;;  %v1321_v39 = vadd.s32 1, %v5863_v31 }
 0x220   : > { %v2937_v43 = vadd.s32 1, %v4103_v34  ;;  %v4453_v24 = vpop.eup %4452  ;;  %vm1050_vm12 = vcmp.eq.s32.totalorder %v5826_v46, 2  ;;  %v2671_v3 = vadd.s32 %v5802_v2, %v5799_v33  ;;  %vm4094_vm13 = vcmp.lt.s32.totalorder %v4093_v28, 0 }
 0x221   : > { %v2704_v52 = vsel %vm5869_vm7, 0, %v2702_v60  ;;  %v4455_v59 = vpop.eup %4454  ;;  %v1051_v50 = vxor.u32 2147483648, %v4453_v24  ;;  %v2686_v55 = vsel %vm4094_vm13, 0, %v4093_v28  ;;  %v1318_v30 = vmul.u32 %v5848_v36, %v1302_v11 }
 0x222   : > { %vm1320_vm14 = vc.u32 %v5879_v4, %v5862_v26  ;;  %v1048_v45 = vxor.u32 2147483648, %v4455_v59  ;;  %v2687_v0 = vsub.s32 32, %v2686_v55  ;;  %v2691_v53 = vsub.s32 4294967266, %v2686_v55 }
 0x223   : > { %v2934_v56 = vand.u32 8388607, %v2927_v37  ;;  %v1052_v61 = vsel %vm1050_vm12, %v1051_v50, %v4455_v59  ;;  %v2688_v33 = vshll.u32 %v5855_v54, %v2686_v55  ;;  %v1322_v2 = vsel %vm1320_vm14, %v1321_v39, %v5863_v31 }
 0x224   : > { %vm2938_vm15 = vcmp.gt.s32.totalorder %v2937_v43, 0  ;;  %v1049_v17 = vsel %vm1047_vm11, %v4453_v24, %v1048_v45  ;;  %v2689_v8 = vshrl.u32 %v2671_v3, %v2687_v0  ;;  %v2692_v36 = vadd.s32 127, %v2691_v53 }
 0x225   : > { %v1323_v5 = vadd.s32 %v1322_v2, %v1318_v30  ;;  %v1053_v19 = vsel %vm1046_vm10, %v1049_v17, %v1052_v61  ;;  %v2708_v7 = vadd.s32 3, %v2704_v52  ;;  %v2939_v21 = vsel %vm2938_vm15, %v2937_v43, 0 }
 0x226   : > { %v1159_v40 = vand.u32 2147483647, %v5885_v41  ;;  %v1054_v57 = vsel %vm1043_vm9, nan, %v1053_v19  ;;  %v2690_v54 = vor.u32 %v2689_v8, %v2688_v33  ;;  %v2693_v48 = vshll.u32 %v2692_v36, 23 }
 0x227   : > { %v1324_v38 = vadd.s32 536870912, %v1323_v5  ;;  %3867 = vst [vmem:[%s5083_s10 + $0x20] sm:$0xff] %v1054_v57  ;;  %v2935_v15 = vor.u32 8388608, %v2934_v56  ;;  %v2941_v13 = vand.u32 31, %v2939_v21  ;;  %v5911_v58 = vand.u32 3, %v2708_v7 }
 0x228   : > { %v2694_v1 = vor.u32 4788187, %v2693_v48  ;;  %v1162_v31 = vand.u32 2139095040, %v5885_v41  ;;  %v5916_v63 = vand.u32 8388607, %v1159_v40  ;;  %v2697_v6 = vcvt.s32.f32 %v2690_v54 }
 0x229   : > { %v5909_v44 = vshrl.u32 %v1324_v38, 30  ;;  %v2942_v46 = vsub.s32 32, %v2941_v13  ;;  %v5919_v60 = vadd.s32 %v5862_v26, %v5879_v4  ;;  %v5925_v39 = vshll.u32 %v2935_v15, 8 }
 0x22a   : > { %v2695_v35 = vand.u32 2147483647, %v2694_v1  ;;  %v2944_v3 = vshll.u32 %v4609_v12, %v2941_v13  ;;  %v2940_v59 = vshrl.u32 %v2939_v21, 5  ;;  %v2947_v26 = vshll.u32 %v4610_v16, %v2941_v13 }
 0x22b   : > { %v1326_v25 = vshll.u32 %v5909_v44, 30  ;;  %v2945_v34 = vshrl.u32 %v4610_v16, %v2942_v46  ;;  %v2948_v28 = vshrl.u32 %v4611_v18, %v2942_v46  ;;  %v2951_v11 = vshrl.u32 %v4612_v20, %v2942_v46 }
 0x22c   : > { %v2698_v43 = vmul.f32 %v2697_v6, %v2695_v35  ;;  %v2954_v52 = vshrl.u32 %v4613_v22, %v2942_v46  ;;  %v2950_v4 = vshll.u32 %v4611_v18, %v2941_v13  ;;  %v1163_v50 = vshrl.u32 %v1162_v31, 23 }
 0x22d   : > { %v5927_v24 = vsub.s32 %v1323_v5, %v1326_v25  ;;  %v2946_v45 = vor.u32 %v2945_v34, %v2944_v3  ;;  %v2953_v0 = vshll.u32 %v4612_v20, %v2941_v13  ;;  %v2949_v53 = vor.u32 %v2948_v28, %v2947_v26 }
 0x22e   : > { %v2699_v55 = vxor.u32 2147483648, %v2698_v43  ;;  %v2952_v56 = vor.u32 %v2951_v11, %v2950_v4  ;;  %v2956_v61 = vshll.u32 %v4613_v22, %v2941_v13  ;;  %v2957_v33 = vshrl.u32 %v4614_v29, %v2942_v46 }
 0x22f   : > { %v1329_v30 = vsub.s32 0, %v5927_v24  ;;  %v2955_v8 = vor.u32 %v2954_v52, %v2953_v0  ;;  %v1167_v36 = vor.u32 8388608, %v5916_v63  ;;  %v2943_v19 = vshrl.u32 %v4609_v12, %v2942_v46 }
 0x230   : > { %v2700_v2 = vsel %vm2617_vm8, %v2699_v55, %v2698_v43  ;;  %v2958_v7 = vor.u32 %v2957_v33, %v2956_v61  ;;  %v4035_v21 = vadd.s32 4294967169, %v1163_v50  ;;  %vm2959_vm0 = vcmp.lt.s32.totalorder %v2940_v59, 1 }
 0x231   : > { %v4040_v17 = vmin.u32 %v1329_v30, %v5927_v24  ;;  %v2703_v5 = vsel %vm5869_vm7, %v5646_v14, %v2700_v2  ;;  %vm2962_vm1 = vcmp.lt.s32.totalorder %v2940_v59, 4  ;;  %vm1265_vm2 = vcmp.lt.s32.totalorder %v5705_v62, 0  ;;  %v5960_v30 = vpop.f32.mrb[10].mxu0 }
 0x232   : > { %4456 = vcosq.f32 %v2703_v5  ;;  %vm2960_vm3 = vcmp.lt.s32.totalorder %v2940_v59, 2  ;;  %v2964_v54 = vsel %vm2962_vm1, %v2952_v56, 2102212464  ;;  %v2967_v48 = vsel %vm2959_vm0, %v2946_v45, %v2949_v53 }
 0x233   : > { %v1331_v57 = vclz %v4040_v17  ;;  %4458 = vsinq.f32 %v2703_v5  ;;  %vm2961_vm4 = vcmp.lt.s32.totalorder %v2940_v59, 3  ;;  %v2968_v15 = vsel %vm2962_vm1, %v2955_v8, 920167782 }
 0x234   : > { %v2971_v13 = vsel %vm2959_vm0, %v2949_v53, %v2952_v56  ;;  %v2963_v32 = vsel %vm2959_vm0, %v2943_v19, %v2946_v45  ;;  %v2969_v1 = vsel %vm2961_vm4, %v2952_v56, %v2968_v15  ;;  %v2972_v31 = vsel %vm2962_vm1, %v2958_v7, 1326507024 }
 0x235   : > { %v4041_v38 = vadd.s32 4294967294, %v1331_v57  ;;  %v1169_v46 = vadd.s32 1, %v4035_v21  ;;  %v2965_v63 = vsel %vm2961_vm4, %v2949_v53, %v2964_v54  ;;  %v2970_v35 = vsel %vm2960_vm3, %v2967_v48, %v2969_v1 }
 0x236   : > { %v2973_v6 = vsel %vm2961_vm4, %v2955_v8, %v2972_v31  ;;  %v5949_v28 = vmul.u32.u64.low %v5925_v39, %v2970_v35  ;;  %v5950_v11 = vmul.u32.u64.high %v5925_v39, %v2970_v35, %v5949_v28  ;;  %v1349_v52 = vsub.s32 4, %v5909_v44 }
 0x237   : > { %vm4042_vm5 = vcmp.lt.s32.totalorder %v4041_v38, 0  ;;  %v2974_v34 = vsel %vm2960_vm3, %v2971_v13, %v2973_v6  ;;  %vm1170_vm6 = vcmp.gt.s32.totalorder %v1169_v46, 0  ;;  %vm2707_vm7 = vweird.f32 %v5646_v14 }
 0x238   : > { %v1334_v25 = vsel %vm4042_vm5, 0, %v4041_v38  ;;  %v2966_v26 = vsel %vm2960_vm3, %v2963_v32, %v2965_v63  ;;  %v5957_v4 = vmul.u32.u64.low %v5925_v39, %v2974_v34  ;;  %v5958_v50 = vmul.u32.u64.high %v5925_v39, %v2974_v34, %v5957_v4 }
 0x239   : > { %v1335_v43 = vsub.s32 32, %v1334_v25  ;;  %v1339_v3 = vsub.s32 4294967266, %v1334_v25  ;;  %v1171_v55 = vsel %vm1170_vm6, %v1169_v46, 0  ;;  %v1336_v45 = vshll.u32 %v5927_v24, %v1334_v25 }
 0x23a   : > { %v1173_v56 = vand.u32 31, %v1171_v55  ;;  %vm2710_vm8 = vcmp.lt.s32.totalorder %v5911_v58, 2  ;;  %vm2711_vm9 = vcmp.eq.s32.totalorder %v5911_v58, 0  ;;  %vm5968_vm10 = vcmp.le.f32.partialorder %v1263_v27, 0.7853982 }
 0x23b   : > { %v1337_v0 = vshrl.u32 %v5919_v60, %v1335_v43  ;;  %v1340_v53 = vadd.s32 127, %v1339_v3  ;;  %v2985_v61 = vadd.s32 1, %v5950_v11  ;;  %vm2714_vm11 = vcmp.eq.s32.totalorder %v5911_v58, 2 }
 0x23c   : > { %v4457_v33 = vpop.eup %4456  ;;  %v1350_v60 = vsel %vm1265_vm2, %v1349_v52, %v5909_v44  ;;  %v2982_v5 = vmul.u32 %v5925_v39, %v2966_v26  ;;  %vm2984_vm12 = vc.u32 %v5958_v50, %v5949_v28  ;;  %v1174_v27 = vsub.s32 32, %v1173_v56 }
 0x23d   : > { %v1338_v24 = vor.u32 %v1337_v0, %v1336_v45  ;;  %v1341_v2 = vshll.u32 %v1340_v53, 23  ;;  %v4459_v17 = vpop.eup %4458  ;;  %v2715_v8 = vxor.u32 2147483648, %v4457_v33  ;;  %v2986_v21 = vsel %vm2984_vm12, %v2985_v61, %v5950_v11 }
 0x23e   : > { %v2712_v19 = vxor.u32 2147483648, %v4459_v17  ;;  %v5981_v57 = vshll.u32 %v1167_v36, 8  ;;  %v1352_v48 = vsel %vm5968_vm10, 0, %v1350_v60  ;;  %v2987_v44 = vadd.s32 %v2986_v21, %v2982_v5 }
 0x23f   : > { %v1342_v7 = vor.u32 4788187, %v1341_v2  ;;  %v2716_v54 = vsel %vm2714_vm11, %v2715_v8, %v4459_v17  ;;  %v5987_v38 = vadd.f32 %v5819_v42, %v5510_v23  ;;  %v1345_v13 = vcvt.s32.f32 %v1338_v24 }
 0x240   : > { %v2713_v39 = vsel %vm2711_vm9, %v4457_v33, %v2712_v19  ;;  %v5991_v32 = vshrl.u32 %v1171_v55, 5  ;;  %v2988_v1 = vadd.s32 536870912, %v2987_v44  ;;  %v1177_v31 = vshrl.u32 %v4610_v16, %v1174_v27 }
 0x241   : > { %v1343_v15 = vand.u32 2147483647, %v1342_v7  ;;  %v2717_v36 = vsel %vm2710_vm8, %v2713_v39, %v2716_v54  ;;  %v1180_v46 = vshrl.u32 %v4611_v18, %v1174_v27  ;;  %v1176_v35 = vshll.u32 %v4609_v12, %v1173_v56 }
 0x242   : > { %v2718_v63 = vsel %vm2707_vm7, nan, %v2717_v36  ;;  %v1183_v6 = vshrl.u32 %v4612_v20, %v1174_v27  ;;  %v2989_v25 = vshrl.u32 %v2988_v1, 30  ;;  %v1179_v34 = vshll.u32 %v4610_v16, %v1173_v56 }
 0x243   : > { %v1346_v23 = vmul.f32 %v1345_v13, %v1343_v15  ;;  %3883 = vst [vmem:[%s5083_s10 + $0xa0] sm:$0xff] %v2718_v63  ;;  %v1182_v58 = vshll.u32 %v4611_v18, %v1173_v56  ;;  %v1186_v11 = vshrl.u32 %v4613_v22, %v1174_v27  ;;  %v1185_v3 = vshll.u32 %v4612_v20, %v1173_v56 }
 0x244   : > { %v1188_v52 = vshll.u32 %v4613_v22, %v1173_v56  ;;  %v1189_v14 = vshrl.u32 %v4614_v29, %v1174_v27  ;;  %v1356_v26 = vadd.s32 3, %v1352_v48  ;;  %v2990_v4 = vshll.u32 %v2989_v25, 30 }
 0x245   : > { %v1347_v43 = vxor.u32 2147483648, %v1346_v23  ;;  %v1178_v55 = vor.u32 %v1177_v31, %v1176_v35  ;;  %v1181_v45 = vor.u32 %v1180_v46, %v1179_v34  ;;  %v1184_v53 = vor.u32 %v1183_v6, %v1182_v58 }
 0x246   : > { %v1187_v61 = vor.u32 %v1186_v11, %v1185_v3  ;;  %v1190_v33 = vor.u32 %v1189_v14, %v1188_v52  ;;  %v6013_v2 = vsub.s32 %v2987_v44, %v2990_v4  ;;  %v1175_v56 = vshrl.u32 %v4609_v12, %v1174_v27 }
 0x247   : > { %v1348_v0 = vsel %vm1265_vm2, %v1347_v43, %v1346_v23  ;;  %v2826_v60 = vand.u32 2139095040, %v5987_v38  ;;  %vm1191_vm13 = vcmp.lt.s32.totalorder %v5991_v32, 1  ;;  %vm1192_vm14 = vcmp.lt.s32.totalorder %v5991_v32, 2 }
 0x248   : > { %v1351_v24 = vsel %vm5968_vm10, %v5705_v62, %v1348_v0  ;;  %vm1193_vm15 = vcmp.lt.s32.totalorder %v5991_v32, 3  ;;  %v2993_v17 = vsub.s32 0, %v6013_v2  ;;  %vm1194_vm0 = vcmp.lt.s32.totalorder %v5991_v32, 4 }
 0x249   : > { %4460 = vcosq.f32 %v1351_v24  ;;  %v1199_v59 = vsel %vm1191_vm13, %v1178_v55, %v1181_v45  ;;  %v1196_v8 = vsel %vm1194_vm0, %v1184_v53, 2102212464  ;;  %v1200_v5 = vsel %vm1194_vm0, %v1187_v61, 920167782 }
 0x24a   : > { %4462 = vsinq.f32 %v1351_v24  ;;  %v1203_v27 = vsel %vm1191_vm13, %v1181_v45, %v1184_v53  ;;  %v1204_v19 = vsel %vm1194_vm0, %v1190_v33, 1326507024  ;;  %v4104_v7 = vmin.u32 %v2993_v17, %v6013_v2 }
 0x24b   : > { %v3013_v21 = vsub.s32 4, %v2989_v25  ;;  %v1201_v54 = vsel %vm1193_vm15, %v1184_v53, %v1200_v5  ;;  %v1205_v48 = vsel %vm1193_vm15, %v1187_v61, %v1204_v19  ;;  %v1357_v44 = vand.u32 3, %v1356_v26 }
 0x24c   : > { %v1202_v39 = vsel %vm1192_vm14, %v1199_v59, %v1201_v54  ;;  %v1206_v15 = vsel %vm1192_vm14, %v1203_v27, %v1205_v48  ;;  %v2827_v13 = vshrl.u32 %v2826_v60, 23  ;;  %vm2929_vm1 = vcmp.lt.s32.totalorder %v5823_v47, 0 }
 0x24d   : > { %v2995_v36 = vclz %v4104_v7  ;;  %v1195_v1 = vsel %vm1191_vm13, %v1175_v56, %v1178_v55  ;;  %v1197_v31 = vsel %vm1193_vm15, %v1181_v45, %v1196_v8  ;;  %vm1355_vm2 = vweird.f32 %v5705_v62 }
 0x24e   : > { %v6041_v46 = vmul.u32.u64.low %v5981_v57, %v1206_v15  ;;  %v6042_v63 = vmul.u32.u64.high %v5981_v57, %v1206_v15, %v6041_v46  ;;  %v6045_v23 = vmul.u32.u64.low %v5981_v57, %v1202_v39  ;;  %v6046_v35 = vmul.u32.u64.high %v5981_v57, %v1202_v39, %v6045_v23 }
 0x24f   : > { %vm6052_vm3 = vcmp.le.f32.partialorder %v2927_v37, 0.7853982  ;;  %v4105_v34 = vadd.s32 4294967294, %v2995_v36  ;;  %v3014_v58 = vsel %vm2929_vm1, %v3013_v21, %v2989_v25  ;;  %v4099_v11 = vadd.s32 4294967169, %v2827_v13 }
 0x250   : > { %vm1358_vm4 = vcmp.lt.s32.totalorder %v1357_v44, 2  ;;  %vm1359_vm5 = vcmp.eq.s32.totalorder %v1357_v44, 0  ;;  %vm1362_vm6 = vcmp.eq.s32.totalorder %v1357_v44, 2  ;;  %v1198_v43 = vsel %vm1192_vm14, %v1195_v1, %v1197_v31 }
 0x251   : > { %v2983_v3 = vadd.s32 %v5949_v28, %v5958_v50  ;;  %vm4106_vm7 = vcmp.lt.s32.totalorder %v4105_v34, 0  ;;  %v2823_v37 = vand.u32 2147483647, %v5987_v38  ;;  %v2833_v52 = vadd.s32 1, %v4099_v11 }
 0x252   : > { %v2998_v26 = vsel %vm4106_vm7, 0, %v4105_v34  ;;  %v3016_v4 = vsel %vm6052_vm3, 0, %v3014_v58  ;;  %vm1216_vm8 = vc.u32 %v6042_v63, %v6045_v23  ;;  %v1217_v25 = vadd.s32 1, %v6046_v35  ;;  %v6091_v34 = vpop.f32.mrb[10].mxu1 }
 0x253   : > { %v4461_v14 = vpop.eup %4460  ;;  %v2999_v45 = vsub.s32 32, %v2998_v26  ;;  %v3003_v0 = vsub.s32 4294967266, %v2998_v26  ;;  %v1214_v28 = vmul.u32 %v5981_v57, %v1198_v43  ;;  %v3000_v53 = vshll.u32 %v6013_v2, %v2998_v26 }
 0x254   : > { %v4463_v55 = vpop.eup %4462  ;;  %v1363_v32 = vxor.u32 2147483648, %v4461_v14  ;;  %v1218_v61 = vsel %vm1216_vm8, %v1217_v25, %v6046_v35  ;;  %vm2834_vm9 = vcmp.gt.s32.totalorder %v2833_v52, 0  ;;  %v3020_v59 = vadd.s32 3, %v3016_v4 }
 0x255   : > { %v1360_v50 = vxor.u32 2147483648, %v4463_v55  ;;  %v3001_v24 = vshrl.u32 %v2983_v3, %v2999_v45  ;;  %v3004_v56 = vadd.s32 127, %v3003_v0  ;;  %v1219_v60 = vadd.s32 %v1218_v61, %v1214_v28 }
 0x256   : > { %v1364_v33 = vsel %vm1362_vm6, %v1363_v32, %v4463_v55  ;;  %v2830_v8 = vand.u32 8388607, %v2823_v37  ;;  %v2835_v5 = vsel %vm2834_vm9, %v2833_v52, 0  ;;  %v6081_v1 = vand.u32 3, %v3020_v59 }
 0x257   : > { %v1361_v17 = vsel %vm1359_vm5, %v4461_v14, %v1360_v50  ;;  %v3002_v27 = vor.u32 %v3001_v24, %v3000_v53  ;;  %v3005_v2 = vshll.u32 %v3004_v56, 23  ;;  %v1220_v19 = vadd.s32 536870912, %v1219_v60 }
 0x258   : > { %v1365_v57 = vsel %vm1358_vm4, %v1361_v17, %v1364_v33  ;;  %v2837_v21 = vand.u32 31, %v2835_v5  ;;  %v2831_v39 = vor.u32 8388608, %v2830_v8  ;;  %v6089_v35 = vadd.f32 %v5819_v42, %v5630_v10 }
 0x259   : > { %v1366_v7 = vsel %vm1355_vm2, nan, %v1365_v57  ;;  %v3006_v54 = vor.u32 4788187, %v3005_v2  ;;  %v6079_v48 = vshrl.u32 %v1220_v19, 30  ;;  %v3009_v36 = vcvt.s32.f32 %v3002_v27 }
 0x25a   : > { %3870 = vst [vmem:[%s5083_s10 + $0x38] sm:$0xff] %v1366_v7  ;;  %v2838_v15 = vsub.s32 32, %v2837_v21  ;;  %v2840_v43 = vshll.u32 %v4609_v12, %v2837_v21  ;;  %v2836_v52 = vshrl.u32 %v2835_v5, 5  ;;  %v2843_v14 = vshll.u32 %v4610_v16, %v2837_v21 }
 0x25b   : > { %v3007_v13 = vand.u32 2147483647, %v3006_v54  ;;  %v1222_v44 = vshll.u32 %v6079_v48, 30  ;;  %v2846_v26 = vshll.u32 %v4611_v18, %v2837_v21  ;;  %v6099_v4 = vshll.u32 %v2831_v39, 8 }
 0x25c   : > { %v2841_v31 = vshrl.u32 %v4610_v16, %v2838_v15  ;;  %v2844_v46 = vshrl.u32 %v4611_v18, %v2838_v15  ;;  %v2847_v62 = vshrl.u32 %v4612_v20, %v2838_v15  ;;  %v2850_v3 = vshrl.u32 %v4613_v22, %v2838_v15 }
 0x25d   : > { %v3010_v58 = vmul.f32 %v3009_v36, %v3007_v13  ;;  %v6093_v11 = vsub.s32 %v1219_v60, %v1222_v44  ;;  %v2849_v32 = vshll.u32 %v4612_v20, %v2837_v21  ;;  %v2852_v28 = vshll.u32 %v4613_v22, %v2837_v21 }
 0x25e   : > { %v2842_v55 = vor.u32 %v2841_v31, %v2840_v43  ;;  %v2845_v45 = vor.u32 %v2844_v46, %v2843_v14  ;;  %v2848_v0 = vor.u32 %v2847_v62, %v2846_v26  ;;  %v2853_v50 = vshrl.u32 %v4614_v29, %v2838_v15 }
 0x25f   : > { %v3011_v25 = vxor.u32 2147483648, %v3010_v58  ;;  %v1225_v10 = vsub.s32 0, %v6093_v11  ;;  %vm1161_vm10 = vcmp.lt.s32.totalorder %v5885_v41, 0  ;;  %v2851_v33 = vor.u32 %v2850_v3, %v2849_v32 }
 0x260   : > { %v1474_v24 = vand.u32 2139095040, %v6089_v35  ;;  %v1245_v60 = vsub.s32 4, %v6079_v48  ;;  %v2839_v17 = vshrl.u32 %v4609_v12, %v2838_v15  ;;  %v2854_v59 = vor.u32 %v2853_v50, %v2852_v28 }
 0x261   : > { %v3012_v53 = vsel %vm2929_vm1, %v3011_v25, %v3010_v58  ;;  %v4036_v61 = vmin.u32 %v1225_v10, %v6093_v11  ;;  %vm2855_vm11 = vcmp.lt.s32.totalorder %v2836_v52, 1  ;;  %vm2858_vm12 = vcmp.lt.s32.totalorder %v2836_v52, 4 }
 0x262   : > { %v3015_v56 = vsel %vm6052_vm3, %v5823_v47, %v3012_v53  ;;  %vm6117_vm13 = vcmp.le.f32.partialorder %v1159_v40, 0.7853982  ;;  %vm2856_vm14 = vcmp.lt.s32.totalorder %v2836_v52, 2  ;;  %v2860_v57 = vsel %vm2858_vm12, %v2848_v0, 2102212464 }
 0x263   : > { %4464 = vcosq.f32 %v3015_v56  ;;  %v1227_v8 = vclz %v4036_v61  ;;  %v2863_v6 = vsel %vm2855_vm11, %v2842_v55, %v2845_v45  ;;  %vm2857_vm15 = vcmp.lt.s32.totalorder %v2836_v52, 3 }
 0x264   : > { %4466 = vsinq.f32 %v3015_v56  ;;  %v2864_v2 = vsel %vm2858_vm12, %v2851_v33, 920167782  ;;  %v2867_v19 = vsel %vm2855_vm11, %v2845_v45, %v2848_v0  ;;  %v2859_v7 = vsel %vm2855_vm11, %v2839_v17, %v2842_v55 }
 0x265   : > { %v4037_v27 = vadd.s32 4294967294, %v1227_v8  ;;  %v2865_v21 = vsel %vm2857_vm15, %v2848_v0, %v2864_v2  ;;  %v2868_v54 = vsel %vm2858_vm12, %v2854_v59, 1326507024  ;;  %v1475_v39 = vshrl.u32 %v1474_v24, 23 }
 0x266   : > { %v2861_v15 = vsel %vm2857_vm15, %v2845_v45, %v2860_v57  ;;  %v2866_v13 = vsel %vm2856_vm14, %v2863_v6, %v2865_v21  ;;  %v2869_v36 = vsel %vm2857_vm15, %v2851_v33, %v2868_v54  ;;  %vm3023_vm1 = vcmp.eq.s32.totalorder %v6081_v1, 0 }
 0x267   : > { %vm4038_vm0 = vcmp.lt.s32.totalorder %v4037_v27, 0  ;;  %v2870_v44 = vsel %vm2856_vm14, %v2867_v19, %v2869_v36  ;;  %v6125_v31 = vmul.u32.u64.low %v6099_v4, %v2866_v13  ;;  %v6126_v46 = vmul.u32.u64.high %v6099_v4, %v2866_v13, %v6125_v31 }
 0x268   : > { %v1230_v40 = vsel %vm4038_vm0, 0, %v4037_v27  ;;  %vm3022_vm2 = vcmp.lt.s32.totalorder %v6081_v1, 2  ;;  %v1215_v62 = vadd.s32 %v6045_v23, %v6042_v63  ;;  %v4047_v3 = vadd.s32 4294967169, %v1475_v39  ;;  %v6142_v23 = vpop.f32.mrb[11].mxu0 }
 0x269   : > { %v1231_v58 = vsub.s32 32, %v1230_v40  ;;  %v1235_v43 = vsub.s32 4294967266, %v1230_v40  ;;  %vm3019_vm3 = vweird.f32 %v5823_v47  ;;  %v1246_v14 = vsel %vm1161_vm10, %v1245_v60, %v6079_v48 }
 0x26a   : > { %v2862_v26 = vsel %vm2856_vm14, %v2859_v7, %v2861_v15  ;;  %v6138_v25 = vmul.u32.u64.low %v6099_v4, %v2870_v44  ;;  %v6139_v10 = vmul.u32.u64.high %v6099_v4, %v2870_v44, %v6138_v25  ;;  %v1232_v55 = vshll.u32 %v6093_v11, %v1230_v40 }
 0x26b   : > { %v1233_v32 = vshrl.u32 %v1215_v62, %v1231_v58  ;;  %v1236_v45 = vadd.s32 127, %v1235_v43  ;;  %v1481_v63 = vadd.s32 1, %v4047_v3  ;;  %vm3026_vm4 = vcmp.eq.s32.totalorder %v6081_v1, 2 }
 0x26c   : > { %v2881_v0 = vadd.s32 1, %v6126_v46  ;;  %v1471_v28 = vand.u32 2147483647, %v6089_v35  ;;  %v6149_v48 = vadd.f32 %v5819_v42, %v5707_v9  ;;  %v1248_v11 = vsel %vm6117_vm13, 0, %v1246_v14 }
 0x26d   : > { %v4465_v52 = vpop.eup %4464  ;;  %v1234_v50 = vor.u32 %v1233_v32, %v1232_v55  ;;  %v1237_v53 = vshll.u32 %v1236_v45, 23  ;;  %vm1482_vm5 = vcmp.gt.s32.totalorder %v1481_v63, 0  ;;  %v2878_v24 = vmul.u32 %v6099_v4, %v2862_v26 }
 0x26e   : > { %v4467_v61 = vpop.eup %4466  ;;  %v3027_v33 = vxor.u32 2147483648, %v4465_v52  ;;  %vm2880_vm6 = vc.u32 %v6139_v10, %v6125_v31  ;;  %v1483_v56 = vsel %vm1482_vm5, %v1481_v63, 0  ;;  %v6159_v59 = vadd.f32 %v5819_v42, %v5789_v49 }
 0x26f   : > { %v3024_v60 = vxor.u32 2147483648, %v4467_v61  ;;  %v1238_v17 = vor.u32 4788187, %v1237_v53  ;;  %v2882_v9 = vsel %vm2880_vm6, %v2881_v0, %v6126_v46  ;;  %v1478_v4 = vand.u32 8388607, %v1471_v28 }
 0x270   : > { %v3028_v8 = vsel %vm3026_vm4, %v3027_v33, %v4467_v61  ;;  %v2883_v57 = vadd.s32 %v2882_v9, %v2878_v24  ;;  %v1485_v6 = vand.u32 31, %v1483_v56  ;;  %v1241_v19 = vcvt.s32.f32 %v1234_v50 }
 0x271   : > { %v3025_v27 = vsel %vm3023_vm1, %v4465_v52, %v3024_v60  ;;  %v1239_v2 = vand.u32 2147483647, %v1238_v17  ;;  %v1252_v7 = vadd.s32 3, %v1248_v11  ;;  %v3138_v54 = vand.u32 2139095040, %v6149_v48 }
 0x272   : > { %v3029_v21 = vsel %vm3022_vm2, %v3025_v27, %v3028_v8  ;;  %v2884_v49 = vadd.s32 536870912, %v2883_v57  ;;  %v1486_v42 = vsub.s32 32, %v1485_v6  ;;  %v1488_v13 = vshll.u32 %v4609_v12, %v1485_v6 }
 0x273   : > { %v3030_v39 = vsel %vm3019_vm3, nan, %v3029_v21  ;;  %v1242_v15 = vmul.f32 %v1241_v19, %v1239_v2  ;;  %v1491_v36 = vshll.u32 %v4610_v16, %v1485_v6  ;;  %v1494_v1 = vshll.u32 %v4611_v18, %v1485_v6  ;;  %v6204_v19 = vpop.f32.mrb[11].mxu1 }
 0x274   : > { %3886 = vst [vmem:[%s5083_s10 + $0xb8] sm:$0xff] %v3030_v39  ;;  %v2885_v40 = vshrl.u32 %v2884_v49, 30  ;;  %v1489_v44 = vshrl.u32 %v4610_v16, %v1486_v42  ;;  %v1492_v46 = vshrl.u32 %v4611_v18, %v1486_v42  ;;  %v1495_v58 = vshrl.u32 %v4612_v20, %v1486_v42 }
 0x275   : > { %v1243_v62 = vxor.u32 2147483648, %v1242_v15  ;;  %v1497_v43 = vshll.u32 %v4612_v20, %v1485_v6  ;;  %v1498_v47 = vshrl.u32 %v4613_v22, %v1486_v42  ;;  %v6181_v3 = vand.u32 3, %v1252_v7 }
 0x276   : > { %vm2825_vm7 = vcmp.lt.s32.totalorder %v5987_v38, 0  ;;  %v2886_v14 = vshll.u32 %v2885_v40, 30  ;;  %v1484_v26 = vshrl.u32 %v1483_v56, 5  ;;  %v1490_v25 = vor.u32 %v1489_v44, %v1488_v13 }
 0x277   : > { %v1244_v55 = vsel %vm1161_vm10, %v1243_v62, %v1242_v15  ;;  %v1493_v32 = vor.u32 %v1492_v46, %v1491_v36  ;;  %v1496_v45 = vor.u32 %v1495_v58, %v1494_v1  ;;  %v1499_v63 = vor.u32 %v1498_v47, %v1497_v43 }
 0x278   : > { %v1247_v0 = vsel %vm6117_vm13, %v5885_v41, %v1244_v55  ;;  %v6189_v52 = vsub.s32 %v2883_v57, %v2886_v14  ;;  %v1500_v50 = vshll.u32 %v4613_v22, %v1485_v6  ;;  %v1501_v53 = vshrl.u32 %v4614_v29, %v1486_v42 }
 0x279   : > { %4468 = vcosq.f32 %v1247_v0  ;;  %v1479_v11 = vor.u32 8388608, %v1478_v4  ;;  %v3135_v61 = vand.u32 2147483647, %v6149_v48  ;;  %v3139_v33 = vshrl.u32 %v3138_v54, 23 }
 0x27a   : > { %4470 = vsinq.f32 %v1247_v0  ;;  %vm6196_vm8 = vcmp.le.f32.partialorder %v2823_v37, 0.7853982  ;;  %v2889_v5 = vsub.s32 0, %v6189_v52  ;;  %v1487_v56 = vshrl.u32 %v4609_v12, %v1486_v42 }
 0x27b   : > { %v1502_v60 = vor.u32 %v1501_v53, %v1500_v50  ;;  %v2909_v17 = vsub.s32 4, %v2885_v40  ;;  %vm1503_vm9 = vcmp.lt.s32.totalorder %v1484_v26, 1  ;;  %vm1505_vm10 = vcmp.lt.s32.totalorder %v1484_v26, 3 }
 0x27c   : > { %vm1506_vm11 = vcmp.lt.s32.totalorder %v1484_v26, 4  ;;  %v4100_v9 = vmin.u32 %v2889_v5, %v6189_v52  ;;  %v1511_v57 = vsel %vm1503_vm9, %v1490_v25, %v1493_v32  ;;  %v1515_v37 = vsel %vm1503_vm9, %v1493_v32, %v1496_v45 }
 0x27d   : > { %v1508_v8 = vsel %vm1506_vm11, %v1496_v45, 2102212464  ;;  %v1512_v4 = vsel %vm1506_vm11, %v1499_v63, 920167782  ;;  %v1516_v27 = vsel %vm1506_vm11, %v1502_v60, 1326507024  ;;  %v1507_v21 = vsel %vm1503_vm9, %v1487_v56, %v1490_v25 }
 0x27e   : > { %v1513_v6 = vsel %vm1505_vm10, %v1496_v45, %v1512_v4  ;;  %v1519_v2 = vshll.u32 %v1479_v11, 8  ;;  %v2891_v7 = vclz %v4100_v9  ;;  %vm1504_vm12 = vcmp.lt.s32.totalorder %v1484_v26, 2 }
 0x27f   : > { %v1509_v49 = vsel %vm1505_vm10, %v1493_v32, %v1508_v8  ;;  %v2910_v42 = vsel %vm2825_vm7, %v2909_v17, %v2885_v40  ;;  %v1514_v54 = vsel %vm1504_vm12, %v1511_v57, %v1513_v6  ;;  %v1517_v39 = vsel %vm1505_vm10, %v1499_v63, %v1516_v27 }
 0x280   : > { %v4111_v15 = vadd.s32 4294967169, %v3139_v33  ;;  %vm1251_vm13 = vweird.f32 %v5885_v41  ;;  %v4101_v13 = vadd.s32 4294967294, %v2891_v7  ;;  %v1518_v36 = vsel %vm1504_vm12, %v1515_v37, %v1517_v39 }
 0x281   : > { %v6211_v44 = vmul.u32.u64.low %v1519_v2, %v1514_v54  ;;  %v6212_v46 = vmul.u32.u64.high %v1519_v2, %v1514_v54, %v6211_v44  ;;  %vm1254_vm14 = vcmp.lt.s32.totalorder %v6181_v3, 2  ;;  %v1510_v1 = vsel %vm1504_vm12, %v1507_v21, %v1509_v49 }
 0x282   : > { %v6216_v62 = vmul.u32.u64.low %v1519_v2, %v1518_v36  ;;  %v6217_v58 = vmul.u32.u64.high %v1519_v2, %v1518_v36, %v6216_v62  ;;  %vm1255_vm15 = vcmp.eq.s32.totalorder %v6181_v3, 0  ;;  %vm1258_vm0 = vcmp.eq.s32.totalorder %v6181_v3, 2 }
 0x283   : > { %vm4102_vm1 = vcmp.lt.s32.totalorder %v4101_v13, 0  ;;  %v3145_v40 = vadd.s32 1, %v4111_v15  ;;  %v4469_v43 = vpop.eup %4468  ;;  %v2879_v47 = vadd.s32 %v6125_v31, %v6139_v10  ;;  %v2912_v26 = vsel %vm6196_vm8, 0, %v2910_v42 }
 0x284   : > { %v2894_v14 = vsel %vm4102_vm1, 0, %v4101_v13  ;;  %v3142_v25 = vand.u32 8388607, %v3135_v61  ;;  %v4471_v55 = vpop.eup %4470  ;;  %v1259_v32 = vxor.u32 2147483648, %v4469_v43  ;;  %v1526_v0 = vmul.u32 %v1519_v2, %v1510_v1 }
 0x285   : > { %v2895_v45 = vsub.s32 32, %v2894_v14  ;;  %v2899_v63 = vsub.s32 4294967266, %v2894_v14  ;;  %v1256_v50 = vxor.u32 2147483648, %v4471_v55  ;;  %v2896_v53 = vshll.u32 %v6189_v52, %v2894_v14 }
 0x286   : > { %vm1528_vm2 = vc.u32 %v6217_v58, %v6211_v44  ;;  %v1529_v31 = vadd.s32 1, %v6212_v46  ;;  %v1260_v10 = vsel %vm1258_vm0, %v1259_v32, %v4471_v55  ;;  %vm3146_vm3 = vcmp.gt.s32.totalorder %v3145_v40, 0 }
 0x287   : > { %v2897_v11 = vshrl.u32 %v2879_v47, %v2895_v45  ;;  %v2900_v33 = vadd.s32 127, %v2899_v63  ;;  %v1257_v5 = vsel %vm1255_vm15, %v4469_v43, %v1256_v50  ;;  %v2916_v56 = vadd.s32 3, %v2912_v26 }
 0x288   : > { %v1530_v60 = vsel %vm1528_vm2, %v1529_v31, %v6212_v46  ;;  %v3147_v17 = vsel %vm3146_vm3, %v3145_v40, 0  ;;  %v1261_v52 = vsel %vm1254_vm14, %v1257_v5, %v1260_v10  ;;  %v3143_v7 = vor.u32 8388608, %v3142_v25 }
 0x289   : > { %v2898_v9 = vor.u32 %v2897_v11, %v2896_v53  ;;  %v2901_v8 = vshll.u32 %v2900_v33, 23  ;;  %v1531_v57 = vadd.s32 %v1530_v60, %v1526_v0  ;;  %v1262_v4 = vsel %vm1251_vm13, nan, %v1261_v52 }
 0x28a   : > { %v3149_v6 = vand.u32 31, %v3147_v17  ;;  %3869 = vst [vmem:[%s5083_s10 + $0x30] sm:$0xff] %v1262_v4  ;;  %v6241_v2 = vand.u32 3, %v2916_v56  ;;  %v1370_v3 = vand.u32 2139095040, %v6159_v59  ;;  %v3148_v39 = vshrl.u32 %v3147_v17, 5 }
 0x28b   : > { %v2902_v37 = vor.u32 4788187, %v2901_v8  ;;  %v1532_v27 = vadd.s32 536870912, %v1531_v57  ;;  %v2905_v42 = vcvt.s32.f32 %v2898_v9  ;;  %v1367_v32 = vand.u32 2147483647, %v6159_v59 }
 0x28c   : > { %v3150_v21 = vsub.s32 32, %v3149_v6  ;;  %v3158_v1 = vshll.u32 %v4611_v18, %v3149_v6  ;;  %v3152_v40 = vshll.u32 %v4609_v12, %v3149_v6  ;;  %v3155_v43 = vshll.u32 %v4610_v16, %v3149_v6 }
 0x28d   : > { %v2903_v49 = vand.u32 2147483647, %v2902_v37  ;;  %v6243_v54 = vshrl.u32 %v1532_v27, 30  ;;  %v3161_v47 = vshll.u32 %v4612_v20, %v3149_v6  ;;  %v3164_v50 = vshll.u32 %v4613_v22, %v3149_v6 }
 0x28e   : > { %v3153_v15 = vshrl.u32 %v4610_v16, %v3150_v21  ;;  %v3156_v41 = vshrl.u32 %v4611_v18, %v3150_v21  ;;  %v3159_v13 = vshrl.u32 %v4612_v20, %v3150_v21  ;;  %v3162_v62 = vshrl.u32 %v4613_v22, %v3150_v21 }
 0x28f   : > { %v2906_v36 = vmul.f32 %v2905_v42, %v2903_v49  ;;  %v1534_v46 = vshll.u32 %v6243_v54, 30  ;;  %v3165_v14 = vshrl.u32 %v4614_v29, %v3150_v21  ;;  %v6263_v10 = vshll.u32 %v3143_v7, 8 }
 0x290   : > { %v3160_v55 = vor.u32 %v3159_v13, %v3158_v1  ;;  %v3154_v45 = vor.u32 %v3153_v15, %v3152_v40  ;;  %v3157_v63 = vor.u32 %v3156_v41, %v3155_v43  ;;  %v3163_v0 = vor.u32 %v3162_v62, %v3161_v47 }
 0x291   : > { %v2907_v26 = vxor.u32 2147483648, %v2906_v36  ;;  %v6256_v25 = vsub.s32 %v1531_v57, %v1534_v46  ;;  %v1371_v11 = vshrl.u32 %v1370_v3, 23  ;;  %v3151_v5 = vshrl.u32 %v4609_v12, %v3150_v21 }
 0x292   : > { %v3166_v56 = vor.u32 %v3165_v14, %v3164_v50  ;;  %vm3170_vm4 = vcmp.lt.s32.totalorder %v3148_v39, 4  ;;  %vm3167_vm5 = vcmp.lt.s32.totalorder %v3148_v39, 1  ;;  %vm3169_vm6 = vcmp.lt.s32.totalorder %v3148_v39, 3 }
 0x293   : > { %v2908_v53 = vsel %vm2825_vm7, %v2907_v26, %v2906_v36  ;;  %v1537_v31 = vsub.s32 0, %v6256_v25  ;;  %v3172_v17 = vsel %vm3170_vm4, %v3160_v55, 2102212464  ;;  %v3175_v52 = vsel %vm3167_vm5, %v3154_v45, %v3157_v63 }
 0x294   : > { %v2911_v33 = vsel %vm6196_vm8, %v5987_v38, %v2908_v53  ;;  %v3176_v9 = vsel %vm3170_vm4, %v3163_v0, 920167782  ;;  %vm6274_vm7 = vcmp.le.f32.partialorder %v1471_v28, 0.7853982  ;;  %v3171_v57 = vsel %vm3167_vm5, %v3151_v5, %v3154_v45 }
 0x295   : > { %4472 = vcosq.f32 %v2911_v33  ;;  %v4048_v60 = vmin.u32 %v1537_v31, %v6256_v25  ;;  %v3173_v4 = vsel %vm3169_vm6, %v3157_v63, %v3172_v17  ;;  %v3179_v6 = vsel %vm3167_vm5, %v3157_v63, %v3160_v55 }
 0x296   : > { %4474 = vsinq.f32 %v2911_v33  ;;  %vm3168_vm8 = vcmp.lt.s32.totalorder %v3148_v39, 2  ;;  %v3177_v37 = vsel %vm3169_vm6, %v3160_v55, %v3176_v9  ;;  %v3180_v27 = vsel %vm3170_vm4, %v3166_v56, 1326507024 }
 0x297   : > { %v1539_v8 = vclz %v4048_v60  ;;  %v4043_v7 = vadd.s32 4294967169, %v1371_v11  ;;  %v1557_v49 = vsub.s32 4, %v6243_v54  ;;  %v3178_v42 = vsel %vm3168_vm8, %v3175_v52, %v3177_v37  ;;  %v6307_v11 = vpop.f32.mrb[12].mxu0  ;;  %v6315_v52 = vld [vmem:[%s7488_s2] ss:$0 sm:$0xff] }
 0x298   : > { %v3181_v3 = vsel %vm3169_vm6, %v3163_v0, %v3180_v27  ;;  %v3174_v15 = vsel %vm3168_vm8, %v3171_v57, %v3173_v4  ;;  %v6281_v28 = vmul.u32.u64.low %v6263_v10, %v3178_v42  ;;  %v6282_v13 = vmul.u32.u64.high %v6263_v10, %v3178_v42, %v6281_v28 }
 0x299   : > { %v4049_v21 = vadd.s32 4294967294, %v1539_v8  ;;  %v3182_v41 = vsel %vm3168_vm8, %v3179_v6, %v3181_v3  ;;  %v1377_v39 = vadd.s32 1, %v4043_v7  ;;  %vm2915_vm10 = vweird.f32 %v5987_v38 }
 0x29a   : > { %v6286_v36 = vmul.u32.u64.low %v6263_v10, %v3182_v41  ;;  %v6287_v46 = vmul.u32.u64.high %v6263_v10, %v3182_v41, %v6286_v36  ;;  %vm2922_vm11 = vcmp.eq.s32.totalorder %v6241_v2, 2  ;;  %vm1473_vm12 = vcmp.lt.s32.totalorder %v6089_v35, 0 }
 0x29b   : > { %vm4050_vm9 = vcmp.lt.s32.totalorder %v4049_v21, 0  ;;  %v1527_v1 = vadd.s32 %v6211_v44, %v6217_v58  ;;  %v1558_v47 = vsel %vm1473_vm12, %v1557_v49, %v6243_v54  ;;  %vm1378_vm13 = vcmp.gt.s32.totalorder %v1377_v39, 0 }
 0x29c   : > { %v1542_v62 = vsel %vm4050_vm9, 0, %v4049_v21  ;;  %v3190_v14 = vmul.u32 %v6263_v10, %v3174_v15  ;;  %v3193_v26 = vadd.s32 1, %v6282_v13  ;;  %v1374_v55 = vand.u32 8388607, %v1367_v32 }
 0x29d   : > { %v1543_v40 = vsub.s32 32, %v1542_v62  ;;  %v1547_v43 = vsub.s32 4294967266, %v1542_v62  ;;  %v1379_v45 = vsel %vm1378_vm13, %v1377_v39, 0  ;;  %v1544_v0 = vshll.u32 %v6256_v25, %v1542_v62 }
 0x29e   : > { %vm3192_vm14 = vc.u32 %v6287_v46, %v6281_v28  ;;  %v1560_v54 = vsel %vm6274_vm7, 0, %v1558_v47  ;;  %v1381_v10 = vand.u32 31, %v1379_v45  ;;  %vm2919_vm15 = vcmp.eq.s32.totalorder %v6241_v2, 0 }
 0x29f   : > { %v4473_v63 = vpop.eup %4472  ;;  %v1545_v44 = vshrl.u32 %v1527_v1, %v1543_v40  ;;  %v1548_v58 = vadd.s32 127, %v1547_v43  ;;  %v3194_v31 = vsel %vm3192_vm14, %v3193_v26, %v6282_v13  ;;  %v6319_v9 = vadd.f32 %v6315_v52, %v5865_v51 }
 0x2a0   : > { %v4475_v50 = vpop.eup %4474  ;;  %v2923_v53 = vxor.u32 2147483648, %v4473_v63  ;;  %v3195_v60 = vadd.s32 %v3194_v31, %v3190_v14  ;;  %v1382_v17 = vsub.s32 32, %v1381_v10  ;;  %vm2918_vm0 = vcmp.lt.s32.totalorder %v6241_v2, 2 }
 0x2a1   : > { %v2920_v33 = vxor.u32 2147483648, %v4475_v50  ;;  %v1546_v5 = vor.u32 %v1545_v44, %v1544_v0  ;;  %v1549_v56 = vshll.u32 %v1548_v58, 23  ;;  %v1564_v37 = vadd.s32 3, %v1560_v54 }
 0x2a2   : > { %v2924_v25 = vsel %vm2922_vm11, %v2923_v53, %v4475_v50  ;;  %v3196_v4 = vadd.s32 536870912, %v3195_v60  ;;  %v1375_v27 = vor.u32 8388608, %v1374_v55  ;;  %v6324_v7 = vadd.f32 %v6315_v52, %v5960_v30 }
 0x2a3   : > { %v2921_v8 = vsel %vm2919_vm15, %v4473_v63, %v2920_v33  ;;  %v1550_v57 = vor.u32 4788187, %v1549_v56  ;;  %v1553_v42 = vcvt.s32.f32 %v1546_v5  ;;  %v1380_v51 = vshrl.u32 %v1379_v45, 5 }
 0x2a4   : > { %v2925_v6 = vsel %vm2918_vm0, %v2921_v8, %v2924_v25  ;;  %v3197_v3 = vshrl.u32 %v3196_v4, 30  ;;  %v1385_v2 = vshrl.u32 %v4610_v16, %v1382_v17  ;;  %v1388_v15 = vshrl.u32 %v4611_v18, %v1382_v17 }
 0x2a5   : > { %v2926_v21 = vsel %vm2915_vm10, nan, %v2925_v6  ;;  %v1551_v49 = vand.u32 2147483647, %v1550_v57  ;;  %v1391_v41 = vshrl.u32 %v4612_v20, %v1382_v17  ;;  %v1390_v39 = vshll.u32 %v4611_v18, %v1381_v10 }
 0x2a6   : > { %3885 = vst [vmem:[%s5083_s10 + $0xb0] sm:$0xff] %v2926_v21  ;;  %v3198_v36 = vshll.u32 %v3197_v3, 30  ;;  %v1394_v30 = vshrl.u32 %v4613_v22, %v1382_v17  ;;  %vm3137_vm1 = vcmp.lt.s32.totalorder %v6149_v48, 0  ;;  %v1384_v38 = vshll.u32 %v4609_v12, %v1381_v10 }
 0x2a7   : > { %v1554_v13 = vmul.f32 %v1553_v42, %v1551_v49  ;;  %v1387_v1 = vshll.u32 %v4610_v16, %v1381_v10  ;;  %v1393_v62 = vshll.u32 %v4612_v20, %v1381_v10  ;;  %v1397_v40 = vshrl.u32 %v4614_v29, %v1382_v17 }
 0x2a8   : > { %v6339_v47 = vand.u32 3, %v1564_v37  ;;  %v6341_v14 = vsub.s32 %v3195_v60, %v3198_v36  ;;  %v1392_v26 = vor.u32 %v1391_v41, %v1390_v39  ;;  %v1386_v55 = vor.u32 %v1385_v2, %v1384_v38  ;;  %v6362_v37 = vpop.f32.mrb[12].mxu1 }
 0x2a9   : > { %v1555_v43 = vxor.u32 2147483648, %v1554_v13  ;;  %v1389_v45 = vor.u32 %v1388_v15, %v1387_v1  ;;  %v1395_v63 = vor.u32 %v1394_v30, %v1393_v62  ;;  %v1396_v0 = vshll.u32 %v4613_v22, %v1381_v10 }
 0x2aa   : > { %v3201_v58 = vsub.s32 0, %v6341_v14  ;;  %v1383_v50 = vshrl.u32 %v4609_v12, %v1382_v17  ;;  %v1415_v53 = vshll.u32 %v1375_v27, 8  ;;  %v3221_v31 = vsub.s32 4, %v3197_v3 }
 0x2ab   : > { %v1556_v44 = vsel %vm1473_vm12, %v1555_v43, %v1554_v13  ;;  %v1398_v33 = vor.u32 %v1397_v40, %v1396_v0  ;;  %vm1402_vm2 = vcmp.lt.s32.totalorder %v1380_v51, 4  ;;  %vm6353_vm3 = vcmp.le.f32.partialorder %v3135_v61, 0.7853982 }
 0x2ac   : > { %v1559_v54 = vsel %vm6274_vm7, %v6089_v35, %v1556_v44  ;;  %v4112_v5 = vmin.u32 %v3201_v58, %v6341_v14  ;;  %vm1399_vm4 = vcmp.lt.s32.totalorder %v1380_v51, 1  ;;  %v1404_v56 = vsel %vm1402_vm2, %v1392_v26, 2102212464 }
 0x2ad   : > { %4476 = vcosq.f32 %v1559_v54  ;;  %vm1400_vm5 = vcmp.lt.s32.totalorder %v1380_v51, 2  ;;  %v1407_v60 = vsel %vm1399_vm4, %v1386_v55, %v1389_v45  ;;  %v1408_v24 = vsel %vm1402_vm2, %v1395_v63, 920167782 }
 0x2ae   : > { %4478 = vsinq.f32 %v1559_v54  ;;  %v3203_v25 = vclz %v4112_v5  ;;  %vm1401_vm6 = vcmp.lt.s32.totalorder %v1380_v51, 3  ;;  %v1403_v17 = vsel %vm1399_vm4, %v1383_v50, %v1386_v55 }
 0x2af   : > { %v1411_v8 = vsel %vm1399_vm4, %v1389_v45, %v1392_v26  ;;  %v1405_v57 = vsel %vm1401_vm6, %v1389_v45, %v1404_v56  ;;  %v1409_v4 = vsel %vm1401_vm6, %v1392_v26, %v1408_v24  ;;  %v1412_v61 = vsel %vm1402_vm2, %v1398_v33, 1326507024 }
 0x2b0   : > { %v3034_v6 = vand.u32 2139095040, %v6319_v9  ;;  %v4113_v27 = vadd.s32 4294967294, %v3203_v25  ;;  %v3222_v21 = vsel %vm3137_vm1, %v3221_v31, %v3197_v3  ;;  %v1410_v49 = vsel %vm1400_vm5, %v1407_v60, %v1409_v4 }
 0x2b1   : > { %v1413_v42 = vsel %vm1401_vm6, %v1395_v63, %v1412_v61  ;;  %v6368_v15 = vmul.u32.u64.low %v1415_v53, %v1410_v49  ;;  %v6369_v41 = vmul.u32.u64.high %v1415_v53, %v1410_v49, %v6368_v15  ;;  %v1406_v36 = vsel %vm1400_vm5, %v1403_v17, %v1405_v57 }
 0x2b2   : > { %v1414_v2 = vsel %vm1400_vm5, %v1411_v8, %v1413_v42  ;;  %v3035_v13 = vshrl.u32 %v3034_v6, 23  ;;  %vm4114_vm7 = vcmp.lt.s32.totalorder %v4113_v27, 0  ;;  %vm1566_vm8 = vcmp.lt.s32.totalorder %v6339_v47, 2 }
 0x2b3   : > { %v6373_v39 = vmul.u32.u64.low %v1415_v53, %v1414_v2  ;;  %v6374_v30 = vmul.u32.u64.high %v1415_v53, %v1414_v2, %v6373_v39  ;;  %vm1567_vm9 = vcmp.eq.s32.totalorder %v6339_v47, 0  ;;  %v3206_v3 = vsel %vm4114_vm7, 0, %v4113_v27 }
 0x2b4   : > { %v4107_v38 = vadd.s32 4294967169, %v3035_v13  ;;  %v3191_v1 = vadd.s32 %v6281_v28, %v6287_v46  ;;  %v3207_v62 = vsub.s32 32, %v3206_v3  ;;  %v3211_v40 = vsub.s32 4294967266, %v3206_v3 }
 0x2b5   : > { %v3031_v43 = vand.u32 2147483647, %v6319_v9  ;;  %v3224_v51 = vsel %vm6353_vm3, 0, %v3222_v21  ;;  %v1422_v26 = vmul.u32 %v1415_v53, %v1406_v36  ;;  %v1425_v55 = vadd.s32 1, %v6369_v41 }
 0x2b6   : > { %v3041_v45 = vadd.s32 1, %v4107_v38  ;;  %v3208_v0 = vshll.u32 %v6341_v14, %v3206_v3  ;;  %v3209_v44 = vshrl.u32 %v3191_v1, %v3207_v62  ;;  %v3212_v58 = vadd.s32 127, %v3211_v40 }
 0x2b7   : > { %v4477_v63 = vpop.eup %4476  ;;  %vm1424_vm10 = vc.u32 %v6374_v30, %v6368_v15  ;;  %vm1570_vm11 = vcmp.eq.s32.totalorder %v6339_v47, 2  ;;  %v3228_v56 = vadd.s32 3, %v3224_v51  ;;  %v3038_v14 = vand.u32 8388607, %v3031_v43 }
 0x2b8   : > { %v4479_v28 = vpop.eup %4478  ;;  %v1571_v46 = vxor.u32 2147483648, %v4477_v63  ;;  %v1426_v50 = vsel %vm1424_vm10, %v1425_v55, %v6369_v41  ;;  %vm3042_vm12 = vcmp.gt.s32.totalorder %v3041_v45, 0  ;;  %v3210_v53 = vor.u32 %v3209_v44, %v3208_v0 }
 0x2b9   : > { %v1568_v54 = vxor.u32 2147483648, %v4479_v28  ;;  %v3213_v31 = vshll.u32 %v3212_v58, 23  ;;  %v1427_v33 = vadd.s32 %v1426_v50, %v1422_v26  ;;  %v3043_v60 = vsel %vm3042_vm12, %v3041_v45, 0 }
 0x2ba   : > { %v1572_v5 = vsel %vm1570_vm11, %v1571_v46, %v4479_v28  ;;  %v1682_v8 = vand.u32 2139095040, %v6324_v7  ;;  %vm1563_vm13 = vweird.f32 %v6089_v35  ;;  %v3045_v4 = vand.u32 31, %v3043_v60 }
 0x2bb   : > { %v1569_v24 = vsel %vm1567_vm9, %v4477_v63, %v1568_v54  ;;  %v3214_v25 = vor.u32 4788187, %v3213_v31  ;;  %v1428_v17 = vadd.s32 536870912, %v1427_v33  ;;  %v3217_v27 = vcvt.s32.f32 %v3210_v53 }
 0x2bc   : > { %v1573_v57 = vsel %vm1566_vm8, %v1569_v24, %v1572_v5  ;;  %v6400_v49 = vand.u32 3, %v3228_v56  ;;  %v3039_v42 = vor.u32 8388608, %v3038_v14  ;;  %v3046_v2 = vsub.s32 32, %v3045_v4 }
 0x2bd   : > { %v1574_v61 = vsel %vm1563_vm13, nan, %v1573_v57  ;;  %v3215_v6 = vand.u32 2147483647, %v3214_v25  ;;  %v6397_v21 = vshrl.u32 %v1428_v17, 30  ;;  %v1679_v41 = vand.u32 2147483647, %v6324_v7 }
 0x2be   : > { %3872 = vst [vmem:[%s5083_s10 + $0x48] sm:$0xff] %v1574_v61  ;;  %v3048_v35 = vshll.u32 %v4609_v12, %v3045_v4  ;;  %v1683_v47 = vshrl.u32 %v1682_v8, 23  ;;  %v3049_v39 = vshrl.u32 %v4610_v16, %v3046_v2  ;;  %v3051_v3 = vshll.u32 %v4610_v16, %v3045_v4 }
 0x2bf   : > { %v3218_v13 = vmul.f32 %v3217_v27, %v3215_v6  ;;  %v1430_v36 = vshll.u32 %v6397_v21, 30  ;;  %v3052_v38 = vshrl.u32 %v4611_v18, %v3046_v2  ;;  %v3055_v1 = vshrl.u32 %v4612_v20, %v3046_v2 }
 0x2c0   : > { %v3054_v51 = vshll.u32 %v4611_v18, %v3045_v4  ;;  %v3058_v26 = vshrl.u32 %v4613_v22, %v3046_v2  ;;  %v3044_v55 = vshrl.u32 %v3043_v60, 5  ;;  %v3050_v45 = vor.u32 %v3049_v39, %v3048_v35 }
 0x2c1   : > { %v3219_v62 = vxor.u32 2147483648, %v3218_v13  ;;  %v6409_v40 = vsub.s32 %v1427_v33, %v1430_v36  ;;  %v3057_v63 = vshll.u32 %v4612_v20, %v3045_v4  ;;  %v6414_v0 = vshll.u32 %v3039_v42, 8 }
 0x2c2   : > { %v3053_v28 = vor.u32 %v3052_v38, %v3051_v3  ;;  %v3056_v46 = vor.u32 %v3055_v1, %v3054_v51  ;;  %vm1369_vm14 = vcmp.lt.s32.totalorder %v6159_v59, 0  ;;  %v3060_v53 = vshll.u32 %v4613_v22, %v3045_v4  ;;  %v6455_v51 = vpop.f32.mrb[13].mxu0 }
 0x2c3   : > { %v3220_v44 = vsel %vm3137_vm1, %v3219_v62, %v3218_v13  ;;  %v1433_v58 = vsub.s32 0, %v6409_v40  ;;  %v3059_v54 = vor.u32 %v3058_v26, %v3057_v63  ;;  %v3061_v31 = vshrl.u32 %v4614_v29, %v3046_v2 }
 0x2c4   : > { %v3223_v50 = vsel %vm6353_vm3, %v6149_v48, %v3220_v44  ;;  %v1423_v33 = vadd.s32 %v6368_v15, %v6374_v30  ;;  %v4055_v56 = vadd.s32 4294967169, %v1683_v47  ;;  %v1453_v14 = vsub.s32 4, %v6397_v21 }
 0x2c5   : > { %4480 = vcosq.f32 %v3223_v50  ;;  %v4044_v5 = vmin.u32 %v1433_v58, %v6409_v40  ;;  %v3047_v10 = vshrl.u32 %v4609_v12, %v3046_v2  ;;  %v3062_v60 = vor.u32 %v3061_v31, %v3060_v53 }
 0x2c6   : > { %4482 = vsinq.f32 %v3223_v50  ;;  %vm6432_vm15 = vcmp.le.f32.partialorder %v1367_v32, 0.7853982  ;;  %vm3063_vm0 = vcmp.lt.s32.totalorder %v3044_v55, 1  ;;  %vm3064_vm1 = vcmp.lt.s32.totalorder %v3044_v55, 2 }
 0x2c7   : > { %v1435_v25 = vclz %v4044_v5  ;;  %vm3066_vm2 = vcmp.lt.s32.totalorder %v3044_v55, 4  ;;  %vm3065_vm3 = vcmp.lt.s32.totalorder %v3044_v55, 3  ;;  %v3071_v30 = vsel %vm3063_vm0, %v3050_v45, %v3053_v28 }
 0x2c8   : > { %v3068_v15 = vsel %vm3066_vm2, %v3056_v46, 2102212464  ;;  %v3072_v17 = vsel %vm3066_vm2, %v3059_v54, 920167782  ;;  %vm3234_vm4 = vcmp.eq.s32.totalorder %v6400_v49, 2  ;;  %v3067_v57 = vsel %vm3063_vm0, %v3047_v10, %v3050_v45 }
 0x2c9   : > { %v4045_v8 = vadd.s32 4294967294, %v1435_v25  ;;  %v3073_v4 = vsel %vm3065_vm3, %v3056_v46, %v3072_v17  ;;  %v3075_v61 = vsel %vm3063_vm0, %v3053_v28, %v3056_v46  ;;  %vm3231_vm5 = vcmp.eq.s32.totalorder %v6400_v49, 0 }
 0x2ca   : > { %v3069_v32 = vsel %vm3065_vm3, %v3053_v28, %v3068_v15  ;;  %v3074_v6 = vsel %vm3064_vm1, %v3071_v30, %v3073_v4  ;;  %v3076_v27 = vsel %vm3066_vm2, %v3062_v60, 1326507024  ;;  %v1689_v42 = vadd.s32 1, %v4055_v56 }
 0x2cb   : > { %vm3230_vm6 = vcmp.lt.s32.totalorder %v6400_v49, 2  ;;  %vm4046_vm7 = vcmp.lt.s32.totalorder %v4045_v8, 0  ;;  %v3077_v2 = vsel %vm3065_vm3, %v3059_v54, %v3076_v27  ;;  %vm3227_vm8 = vweird.f32 %v6149_v48 }
 0x2cc   : > { %v6444_v13 = vmul.u32.u64.low %v6414_v0, %v3074_v6  ;;  %v6445_v36 = vmul.u32.u64.high %v6414_v0, %v3074_v6, %v6444_v13  ;;  %v1438_v35 = vsel %vm4046_vm7, 0, %v4045_v8  ;;  %v3078_v47 = vsel %vm3064_vm1, %v3075_v61, %v3077_v2 }
 0x2cd   : > { %v1686_v39 = vand.u32 8388607, %v1679_v41  ;;  %vm1690_vm9 = vcmp.gt.s32.totalorder %v1689_v42, 0  ;;  %v1439_v3 = vsub.s32 32, %v1438_v35  ;;  %v1443_v38 = vsub.s32 4294967266, %v1438_v35 }
 0x2ce   : > { %v1454_v1 = vsel %vm1369_vm14, %v1453_v14, %v6397_v21  ;;  %v1691_v62 = vsel %vm1690_vm9, %v1689_v42, 0  ;;  %v3070_v26 = vsel %vm3064_vm1, %v3067_v57, %v3069_v32  ;;  %v1440_v28 = vshll.u32 %v6409_v40, %v1438_v35 }
 0x2cf   : > { %v6459_v45 = vmul.u32.u64.low %v6414_v0, %v3078_v47  ;;  %v6460_v63 = vmul.u32.u64.high %v6414_v0, %v3078_v47, %v6459_v45  ;;  %v1693_v44 = vand.u32 31, %v1691_v62  ;;  %v4481_v58 = vpop.eup %4480  ;;  %v1441_v46 = vshrl.u32 %v1423_v33, %v1439_v3 }
 0x2d0   : > { %v1444_v50 = vadd.s32 127, %v1443_v38  ;;  %v3089_v54 = vadd.s32 1, %v6445_v36  ;;  %v4483_v53 = vpop.eup %4482  ;;  %v3235_v31 = vxor.u32 2147483648, %v4481_v58  ;;  %v1456_v21 = vsel %vm6432_vm15, 0, %v1454_v1 }
 0x2d1   : > { %v1687_v5 = vor.u32 8388608, %v1686_v39  ;;  %v1694_v55 = vsub.s32 32, %v1693_v44  ;;  %v3232_v56 = vxor.u32 2147483648, %v4483_v53  ;;  %v1442_v14 = vor.u32 %v1441_v46, %v1440_v28 }
 0x2d2   : > { %v1445_v10 = vshll.u32 %v1444_v50, 23  ;;  %v3086_v60 = vmul.u32 %v6414_v0, %v3070_v26  ;;  %v3236_v25 = vsel %vm3234_vm4, %v3235_v31, %v4483_v53  ;;  %vm3088_vm10 = vc.u32 %v6460_v63, %v6444_v13 }
 0x2d3   : > { %v6471_v40 = vshrl.u32 %v1691_v62, 5  ;;  %v1696_v33 = vshll.u32 %v4609_v12, %v1693_v44  ;;  %v3233_v15 = vsel %vm3231_vm5, %v4481_v58, %v3232_v56  ;;  %v3090_v17 = vsel %vm3088_vm10, %v3089_v54, %v6445_v36 }
 0x2d4   : > { %v1446_v30 = vor.u32 4788187, %v1445_v10  ;;  %v1699_v8 = vshll.u32 %v4610_v16, %v1693_v44  ;;  %v3237_v0 = vsel %vm3230_vm6, %v3233_v15, %v3236_v25  ;;  %v3091_v57 = vadd.s32 %v3090_v17, %v3086_v60 }
 0x2d5   : > { %v1697_v4 = vshrl.u32 %v4610_v16, %v1694_v55  ;;  %v1700_v61 = vshrl.u32 %v4611_v18, %v1694_v55  ;;  %v3238_v32 = vsel %vm3227_vm8, nan, %v3237_v0  ;;  %v1449_v27 = vcvt.s32.f32 %v1442_v14 }
 0x2d6   : > { %v1447_v6 = vand.u32 2147483647, %v1446_v30  ;;  %v1703_v42 = vshrl.u32 %v4612_v20, %v1694_v55  ;;  %3888 = vst [vmem:[%s5083_s10 + $0xc8] sm:$0xff] %v3238_v32  ;;  %v3092_v2 = vadd.s32 536870912, %v3091_v57  ;;  %v1702_v36 = vshll.u32 %v4611_v18, %v1693_v44  ;;  %v6538_v32 = vpop.f32.mrb[13].mxu1 }
 0x2d7   : > { %v1705_v35 = vshll.u32 %v4612_v20, %v1693_v44  ;;  %v1706_v49 = vshrl.u32 %v4613_v22, %v1694_v55  ;;  %v1698_v39 = vor.u32 %v1697_v4, %v1696_v33  ;;  %v1701_v3 = vor.u32 %v1700_v61, %v1699_v8 }
 0x2d8   : > { %v1450_v47 = vmul.f32 %v1449_v27, %v1447_v6  ;;  %v1709_v38 = vshrl.u32 %v4614_v29, %v1694_v55  ;;  %v3093_v1 = vshrl.u32 %v3092_v2, 30  ;;  %v1460_v26 = vadd.s32 3, %v1456_v21 }
 0x2d9   : > { %v1707_v48 = vor.u32 %v1706_v49, %v1705_v35  ;;  %v1704_v45 = vor.u32 %v1703_v42, %v1702_v36  ;;  %v1708_v58 = vshll.u32 %v4613_v22, %v1693_v44  ;;  %vm1711_vm11 = vcmp.lt.s32.totalorder %v6471_v40, 1 }
 0x2da   : > { %v1451_v62 = vxor.u32 2147483648, %v1450_v47  ;;  %v3094_v28 = vshll.u32 %v3093_v1, 30  ;;  %vm1714_vm12 = vcmp.lt.s32.totalorder %v6471_v40, 4  ;;  %v6493_v46 = vshll.u32 %v1687_v5, 8 }
 0x2db   : > { %v1710_v54 = vor.u32 %v1709_v38, %v1708_v58  ;;  %v1719_v53 = vsel %vm1711_vm11, %v1698_v39, %v1701_v3  ;;  %v1720_v31 = vsel %vm1714_vm12, %v1707_v48, 920167782  ;;  %v1695_v56 = vshrl.u32 %v4609_v12, %v1694_v55 }
 0x2dc   : > { %v1452_v50 = vsel %vm1369_vm14, %v1451_v62, %v1450_v47  ;;  %v6504_v21 = vsub.s32 %v3091_v57, %v3094_v28  ;;  %vm1713_vm13 = vcmp.lt.s32.totalorder %v6471_v40, 3  ;;  %vm1712_vm14 = vcmp.lt.s32.totalorder %v6471_v40, 2 }
 0x2dd   : > { %v1455_v44 = vsel %vm6432_vm15, %v6159_v59, %v1452_v50  ;;  %v1716_v5 = vsel %vm1714_vm12, %v1704_v45, 2102212464  ;;  %v1721_v14 = vsel %vm1713_vm13, %v1704_v45, %v1720_v31  ;;  %v1723_v55 = vsel %vm1711_vm11, %v1701_v3, %v1704_v45 }
 0x2de   : > { %4484 = vcosq.f32 %v1455_v44  ;;  %v3097_v10 = vsub.s32 0, %v6504_v21  ;;  %v1722_v24 = vsel %vm1712_vm14, %v1719_v53, %v1721_v14  ;;  %v3117_v60 = vsub.s32 4, %v3093_v1 }
 0x2df   : > { %4486 = vsinq.f32 %v1455_v44  ;;  %v1724_v25 = vsel %vm1714_vm12, %v1710_v54, 1326507024  ;;  %v6521_v33 = vmul.u32.u64.low %v6493_v46, %v1722_v24  ;;  %v6522_v15 = vmul.u32.u64.high %v6493_v46, %v1722_v24, %v6521_v33 }
 0x2e0   : > { %v1461_v30 = vand.u32 3, %v1460_v26  ;;  %v4108_v17 = vmin.u32 %v3097_v10, %v6504_v21  ;;  %v1725_v8 = vsel %vm1713_vm13, %v1707_v48, %v1724_v25  ;;  %v1715_v0 = vsel %vm1711_vm11, %v1695_v56, %v1698_v39 }
 0x2e1   : > { %v1717_v57 = vsel %vm1713_vm13, %v1701_v3, %v1716_v5  ;;  %v1726_v4 = vsel %vm1712_vm14, %v1723_v55, %v1725_v8  ;;  %v6536_v61 = vadd.f32 %v6315_v52, %v6091_v34  ;;  %vm3033_vm15 = vcmp.lt.s32.totalorder %v6319_v9, 0 }
 0x2e2   : > { %v3099_v6 = vclz %v4108_v17  ;;  %v3118_v27 = vsel %vm3033_vm15, %v3117_v60, %v3093_v1  ;;  %v6544_v42 = vmul.u32.u64.low %v6493_v46, %v1726_v4  ;;  %v6545_v2 = vmul.u32.u64.high %v6493_v46, %v1726_v4, %v6544_v42 }
 0x2e3   : > { %vm1459_vm0 = vweird.f32 %v6159_v59  ;;  %v1718_v35 = vsel %vm1712_vm14, %v1715_v0, %v1717_v57  ;;  %v3346_v34 = vand.u32 2139095040, %v6536_v61  ;;  %v6553_v49 = vadd.f32 %v6315_v52, %v6142_v23 }
 0x2e4   : > { %v4109_v36 = vadd.s32 4294967294, %v3099_v6  ;;  %vm1463_vm1 = vcmp.eq.s32.totalorder %v1461_v30, 0  ;;  %vm1466_vm2 = vcmp.eq.s32.totalorder %v1461_v30, 2  ;;  %vm6557_vm3 = vcmp.le.f32.partialorder %v3031_v43, 0.7853982 }
 0x2e5   : > { %v1737_v39 = vadd.s32 1, %v6522_v15  ;;  %v3087_v40 = vadd.s32 %v6444_v13, %v6460_v63  ;;  %v3120_v3 = vsel %vm6557_vm3, 0, %v3118_v27  ;;  %v3347_v38 = vshrl.u32 %v3346_v34, 23 }
 0x2e6   : > { %vm4110_vm4 = vcmp.lt.s32.totalorder %v4109_v36, 0  ;;  %v1734_v48 = vmul.u32 %v6493_v46, %v1718_v35  ;;  %vm1736_vm5 = vc.u32 %v6545_v2, %v6521_v33  ;;  %v3343_v43 = vand.u32 2147483647, %v6536_v61 }
 0x2e7   : > { %v3102_v1 = vsel %vm4110_vm4, 0, %v4109_v36  ;;  %v1578_v13 = vand.u32 2139095040, %v6553_v49  ;;  %v1738_v50 = vsel %vm1736_vm5, %v1737_v39, %v6522_v15  ;;  %v4119_v54 = vadd.s32 4294967169, %v3347_v38 }
 0x2e8   : > { %v4485_v23 = vpop.eup %4484  ;;  %v3103_v45 = vsub.s32 32, %v3102_v1  ;;  %v3107_v58 = vsub.s32 4294967266, %v3102_v1  ;;  %v3104_v28 = vshll.u32 %v6504_v21, %v3102_v1  ;;  %v1739_v44 = vadd.s32 %v1738_v50, %v1734_v48 }
 0x2e9   : > { %v4487_v62 = vpop.eup %4486  ;;  %v1467_v26 = vxor.u32 2147483648, %v4485_v23  ;;  %vm1462_vm6 = vcmp.lt.s32.totalorder %v1461_v30, 2  ;;  %v3124_v5 = vadd.s32 3, %v3120_v3  ;;  %v3353_v14 = vadd.s32 1, %v4119_v54 }
 0x2ea   : > { %v1464_v63 = vxor.u32 2147483648, %v4487_v62  ;;  %v3105_v53 = vshrl.u32 %v3087_v40, %v3103_v45  ;;  %v3108_v31 = vadd.s32 127, %v3107_v58  ;;  %v1740_v60 = vadd.s32 536870912, %v1739_v44 }
 0x2eb   : > { %v1468_v46 = vsel %vm1466_vm2, %v1467_v26, %v4487_v62  ;;  %v3350_v25 = vand.u32 8388607, %v3343_v43  ;;  %vm3354_vm7 = vcmp.gt.s32.totalorder %v3353_v14, 0  ;;  %v1579_v0 = vshrl.u32 %v1578_v13, 23 }
 0x2ec   : > { %v1465_v56 = vsel %vm1463_vm1, %v4485_v23, %v1464_v63  ;;  %v3106_v24 = vor.u32 %v3105_v53, %v3104_v28  ;;  %v3109_v55 = vshll.u32 %v3108_v31, 23  ;;  %v1741_v17 = vshrl.u32 %v1740_v60, 30 }
 0x2ed   : > { %v1469_v10 = vsel %vm1462_vm6, %v1465_v56, %v1468_v46  ;;  %v3355_v8 = vsel %vm3354_vm7, %v3353_v14, 0  ;;  %v6580_v30 = vand.u32 3, %v3124_v5  ;;  %vm1681_vm8 = vcmp.lt.s32.totalorder %v6324_v7, 0 }
 0x2ee   : > { %v1470_v21 = vsel %vm1459_vm0, nan, %v1469_v10  ;;  %v3110_v15 = vor.u32 4788187, %v3109_v55  ;;  %v3357_v57 = vand.u32 31, %v3355_v8  ;;  %v3113_v6 = vcvt.s32.f32 %v3106_v24 }
 0x2ef   : > { %3871 = vst [vmem:[%s5083_s10 + $0x40] sm:$0xff] %v1470_v21  ;;  %v1742_v27 = vshll.u32 %v1741_v17, 30  ;;  %v6585_v59 = vadd.f32 %v6315_v52, %v6204_v19  ;;  %v1735_v42 = vadd.s32 %v6521_v33, %v6545_v2  ;;  %v3351_v36 = vor.u32 8388608, %v3350_v25 }
 0x2f0   : > { %v3111_v4 = vand.u32 2147483647, %v3110_v15  ;;  %v3358_v35 = vsub.s32 32, %v3357_v57  ;;  %v1575_v34 = vand.u32 2147483647, %v6553_v49  ;;  %v6592_v3 = vshrl.u32 %v3355_v8, 5 }
 0x2f1   : > { %v6590_v40 = vsub.s32 %v1739_v44, %v1742_v27  ;;  %v4051_v38 = vadd.s32 4294967169, %v1579_v0  ;;  %v1765_v23 = vsub.s32 4, %v1741_v17  ;;  %v3360_v1 = vshll.u32 %v4609_v12, %v3357_v57 }
 0x2f2   : > { %v3114_v39 = vmul.f32 %v3113_v6, %v3111_v4  ;;  %v3361_v48 = vshrl.u32 %v4610_v16, %v3358_v35  ;;  %v3364_v19 = vshrl.u32 %v4611_v18, %v3358_v35  ;;  %v3363_v2 = vshll.u32 %v4610_v16, %v3357_v57 }
 0x2f3   : > { %v1745_v33 = vsub.s32 0, %v6590_v40  ;;  %v3367_v26 = vshrl.u32 %v4612_v20, %v3358_v35  ;;  %v3366_v58 = vshll.u32 %v4611_v18, %v3357_v57  ;;  %v3369_v13 = vshll.u32 %v4612_v20, %v3357_v57 }
 0x2f4   : > { %v3115_v62 = vxor.u32 2147483648, %v3114_v39  ;;  %v3362_v45 = vor.u32 %v3361_v48, %v3360_v1  ;;  %v3370_v63 = vshrl.u32 %v4613_v22, %v3358_v35  ;;  %v3365_v54 = vor.u32 %v3364_v19, %v3363_v2 }
 0x2f5   : > { %v4056_v50 = vmin.u32 %v1745_v33, %v6590_v40  ;;  %v3372_v46 = vshll.u32 %v4613_v22, %v3357_v57  ;;  %v3368_v31 = vor.u32 %v3367_v26, %v3366_v58  ;;  %v3373_v56 = vshrl.u32 %v4614_v29, %v3358_v35  ;;  %v6648_v26 = vpop.f32.mrb[14].mxu0 }
 0x2f6   : > { %v3116_v28 = vsel %vm3033_vm15, %v3115_v62, %v3114_v39  ;;  %v3371_v44 = vor.u32 %v3370_v63, %v3369_v13  ;;  %v6611_v14 = vshll.u32 %v3351_v36, 8  ;;  %v1585_v10 = vadd.s32 1, %v4051_v38 }
 0x2f7   : > { %v3119_v53 = vsel %vm6557_vm3, %v6319_v9, %v3116_v28  ;;  %v1747_v5 = vclz %v4056_v50  ;;  %vm6615_vm9 = vcmp.le.f32.partialorder %v1679_v41, 0.7853982  ;;  %v1766_v47 = vsel %vm1681_vm8, %v1765_v23, %v1741_v17 }
 0x2f8   : > { %4488 = vcosq.f32 %v3119_v53  ;;  %v3359_v55 = vshrl.u32 %v4609_v12, %v3358_v35  ;;  %v3374_v60 = vor.u32 %v3373_v56, %v3372_v46  ;;  %vm3375_vm10 = vcmp.lt.s32.totalorder %v6592_v3, 1 }
 0x2f9   : > { %4490 = vsinq.f32 %v3119_v53  ;;  %v4057_v21 = vadd.s32 4294967294, %v1747_v5  ;;  %vm3377_vm11 = vcmp.lt.s32.totalorder %v6592_v3, 3  ;;  %vm3378_vm12 = vcmp.lt.s32.totalorder %v6592_v3, 4 }
 0x2fa   : > { %v3380_v25 = vsel %vm3378_vm12, %v3368_v31, 2102212464  ;;  %v3383_v15 = vsel %vm3375_vm10, %v3362_v45, %v3365_v54  ;;  %v3384_v8 = vsel %vm3378_vm12, %v3371_v44, 920167782  ;;  %v3387_v41 = vsel %vm3375_vm10, %v3365_v54, %v3368_v31 }
 0x2fb   : > { %vm4058_vm13 = vcmp.lt.s32.totalorder %v4057_v21, 0  ;;  %vm3376_vm14 = vcmp.lt.s32.totalorder %v6592_v3, 2  ;;  %v3385_v17 = vsel %vm3377_vm11, %v3368_v31, %v3384_v8  ;;  %v3388_v0 = vsel %vm3378_vm12, %v3374_v60, 1326507024 }
 0x2fc   : > { %v1750_v57 = vsel %vm4058_vm13, 0, %v4057_v21  ;;  %v3379_v4 = vsel %vm3375_vm10, %v3359_v55, %v3362_v45  ;;  %v3386_v6 = vsel %vm3376_vm14, %v3383_v15, %v3385_v17  ;;  %v3389_v27 = vsel %vm3377_vm11, %v3371_v44, %v3388_v0 }
 0x2fd   : > { %vm3126_vm15 = vcmp.lt.s32.totalorder %v6580_v30, 2  ;;  %v1751_v36 = vsub.s32 32, %v1750_v57  ;;  %v1755_v35 = vsub.s32 4294967266, %v1750_v57  ;;  %v3381_v39 = vsel %vm3377_vm11, %v3365_v54, %v3380_v25 }
 0x2fe   : > { %v3390_v38 = vsel %vm3376_vm14, %v3387_v41, %v3389_v27  ;;  %vm3123_vm0 = vweird.f32 %v6319_v9  ;;  %v6643_v48 = vmul.u32.u64.low %v6611_v14, %v3386_v6  ;;  %v6644_v19 = vmul.u32.u64.high %v6611_v14, %v3386_v6, %v6643_v48 }
 0x2ff   : > { %v6639_v23 = vmul.u32.u64.low %v6611_v14, %v3390_v38  ;;  %v6640_v1 = vmul.u32.u64.high %v6611_v14, %v3390_v38, %v6639_v23  ;;  %v1752_v62 = vshll.u32 %v6590_v40, %v1750_v57  ;;  %v1753_v33 = vshrl.u32 %v1735_v42, %v1751_v36 }
 0x300   : > { %v1756_v2 = vadd.s32 127, %v1755_v35  ;;  %vm1586_vm1 = vcmp.gt.s32.totalorder %v1585_v10, 0  ;;  %vm3127_vm2 = vcmp.eq.s32.totalorder %v6580_v30, 0  ;;  %v3382_v45 = vsel %vm3376_vm14, %v3379_v4, %v3381_v39 }
 0x301   : > { %v1582_v58 = vand.u32 8388607, %v1575_v34  ;;  %v1587_v13 = vsel %vm1586_vm1, %v1585_v10, 0  ;;  %v1754_v28 = vor.u32 %v1753_v33, %v1752_v62  ;;  %v1768_v40 = vsel %vm6615_vm9, 0, %v1766_v47 }
 0x302   : > { %v4489_v63 = vpop.eup %4488  ;;  %v1757_v50 = vshll.u32 %v1756_v2, 23  ;;  %v1589_v42 = vand.u32 31, %v1587_v13  ;;  %vm3130_vm3 = vcmp.eq.s32.totalorder %v6580_v30, 2  ;;  %vm3400_vm4 = vc.u32 %v6640_v1, %v6643_v48 }
 0x303   : > { %v4491_v54 = vpop.eup %4490  ;;  %v3131_v46 = vxor.u32 2147483648, %v4489_v63  ;;  %v3401_v3 = vadd.s32 1, %v6644_v19  ;;  %v3398_v44 = vmul.u32 %v6611_v14, %v3382_v45  ;;  %v1772_v10 = vadd.s32 3, %v1768_v40 }
 0x304   : > { %v3128_v53 = vxor.u32 2147483648, %v4491_v54  ;;  %v1758_v31 = vor.u32 4788187, %v1757_v50  ;;  %v1590_v56 = vsub.s32 32, %v1589_v42  ;;  %v1583_v55 = vor.u32 8388608, %v1582_v58 }
 0x305   : > { %v3132_v5 = vsel %vm3130_vm3, %v3131_v46, %v4491_v54  ;;  %v3402_v47 = vsel %vm3400_vm4, %v3401_v3, %v6644_v19  ;;  %v1761_v25 = vcvt.s32.f32 %v1754_v28  ;;  %v1592_v41 = vshll.u32 %v4609_v12, %v1589_v42 }
 0x306   : > { %v3129_v60 = vsel %vm3127_vm2, %v4489_v63, %v3128_v53  ;;  %v1759_v21 = vand.u32 2147483647, %v1758_v31  ;;  %v3403_v15 = vadd.s32 %v3402_v47, %v3398_v44  ;;  %v1593_v14 = vshrl.u32 %v4610_v16, %v1590_v56 }
 0x307   : > { %v3133_v8 = vsel %vm3126_vm15, %v3129_v60, %v3132_v5  ;;  %v1596_v17 = vshrl.u32 %v4611_v18, %v1590_v56  ;;  %v1599_v6 = vshrl.u32 %v4612_v20, %v1590_v56  ;;  %v1588_v27 = vshrl.u32 %v1587_v13, 5 }
 0x308   : > { %v3134_v0 = vsel %vm3123_vm0, nan, %v3133_v8  ;;  %v1762_v57 = vmul.f32 %v1761_v25, %v1759_v21  ;;  %v3404_v4 = vadd.s32 536870912, %v3403_v15  ;;  %v1595_v36 = vshll.u32 %v4610_v16, %v1589_v42 }
 0x309   : > { %3887 = vst [vmem:[%s5083_s10 + $0xc0] sm:$0xff] %v3134_v0  ;;  %v1598_v30 = vshll.u32 %v4611_v18, %v1589_v42  ;;  %v1602_v35 = vshrl.u32 %v4613_v22, %v1590_v56  ;;  %v1594_v23 = vor.u32 %v1593_v14, %v1592_v41  ;;  %v1601_v19 = vshll.u32 %v4612_v20, %v1589_v42 }
 0x30a   : > { %v1763_v39 = vxor.u32 2147483648, %v1762_v57  ;;  %v3405_v38 = vshrl.u32 %v3404_v4, 30  ;;  %vm3345_vm5 = vcmp.lt.s32.totalorder %v6536_v61, 0  ;;  %v1597_v9 = vor.u32 %v1596_v17, %v1595_v36 }
 0x30b   : > { %v1600_v62 = vor.u32 %v1599_v6, %v1598_v30  ;;  %v1604_v33 = vshll.u32 %v4613_v22, %v1589_v42  ;;  %v1605_v2 = vshrl.u32 %v4614_v29, %v1590_v56  ;;  %v6683_v58 = vand.u32 3, %v1772_v10 }
 0x30c   : > { %v1764_v45 = vsel %vm1681_vm8, %v1763_v39, %v1762_v57  ;;  %v3406_v13 = vshll.u32 %v3405_v38, 30  ;;  %v1603_v63 = vor.u32 %v1602_v35, %v1601_v19  ;;  %v1591_v50 = vshrl.u32 %v4609_v12, %v1590_v56 }
 0x30d   : > { %v1767_v28 = vsel %vm6615_vm9, %v6324_v7, %v1764_v45  ;;  %v1606_v40 = vor.u32 %v1605_v2, %v1604_v33  ;;  %v6689_v54 = vshll.u32 %v1583_v55, 8  ;;  %vm1607_vm6 = vcmp.lt.s32.totalorder %v1588_v27, 1 }
 0x30e   : > { %4492 = vcosq.f32 %v1767_v28  ;;  %v6691_v42 = vsub.s32 %v3403_v15, %v3406_v13  ;;  %vm1610_vm7 = vcmp.lt.s32.totalorder %v1588_v27, 4  ;;  %vm1608_vm8 = vcmp.lt.s32.totalorder %v1588_v27, 2 }
 0x30f   : > { %4494 = vsinq.f32 %v1767_v28  ;;  %v1612_v46 = vsel %vm1610_vm7, %v1600_v62, 2102212464  ;;  %v1615_v3 = vsel %vm1607_vm6, %v1594_v23, %v1597_v9  ;;  %v3429_v31 = vsub.s32 4, %v3405_v38 }
 0x310   : > { %v3409_v53 = vsub.s32 0, %v6691_v42  ;;  %vm1609_vm10 = vcmp.lt.s32.totalorder %v1588_v27, 3  ;;  %v1616_v24 = vsel %vm1610_vm7, %v1603_v63, 920167782  ;;  %v1611_v44 = vsel %vm1607_vm6, %v1591_v50, %v1594_v23  ;;  %v6721_v27 = vpop.f32.mrb[14].mxu1 }
 0x311   : > { %v1617_v5 = vsel %vm1609_vm10, %v1600_v62, %v1616_v24  ;;  %v1619_v56 = vsel %vm1607_vm6, %v1597_v9, %v1600_v62  ;;  %v1620_v10 = vsel %vm1610_vm7, %v1606_v40, 1326507024  ;;  %v1613_v55 = vsel %vm1609_vm10, %v1597_v9, %v1612_v46 }
 0x312   : > { %v4120_v47 = vmin.u32 %v3409_v53, %v6691_v42  ;;  %v1618_v60 = vsel %vm1608_vm8, %v1615_v3, %v1617_v5  ;;  %v1621_v21 = vsel %vm1609_vm10, %v1603_v63, %v1620_v10  ;;  %v3242_v41 = vand.u32 2139095040, %v6585_v59 }
 0x313   : > { %v1622_v25 = vsel %vm1608_vm8, %v1619_v56, %v1621_v21  ;;  %v6698_v15 = vmul.u32.u64.low %v6689_v54, %v1618_v60  ;;  %v6699_v8 = vmul.u32.u64.high %v6689_v54, %v1618_v60, %v6698_v15  ;;  %v3430_v17 = vsel %vm3345_vm5, %v3429_v31, %v3405_v38 }
 0x314   : > { %v3411_v14 = vclz %v4120_v47  ;;  %v3239_v0 = vand.u32 2147483647, %v6585_v59  ;;  %v1614_v57 = vsel %vm1608_vm8, %v1611_v44, %v1613_v55  ;;  %v3243_v36 = vshrl.u32 %v3242_v41, 23 }
 0x315   : > { %v6707_v4 = vmul.u32.u64.low %v6689_v54, %v1622_v25  ;;  %v6708_v6 = vmul.u32.u64.high %v6689_v54, %v1622_v25, %v6707_v4  ;;  %vm1774_vm9 = vcmp.lt.s32.totalorder %v6683_v58, 2  ;;  %vm6713_vm11 = vcmp.le.f32.partialorder %v3343_v43, 0.7853982 }
 0x316   : > { %v4121_v35 = vadd.s32 4294967294, %v3411_v14  ;;  %v6719_v39 = vadd.f32 %v6315_v52, %v6307_v11  ;;  %vm1775_vm12 = vcmp.eq.s32.totalorder %v6683_v58, 0  ;;  %vm1778_vm13 = vcmp.eq.s32.totalorder %v6683_v58, 2 }
 0x317   : > { %v1633_v38 = vadd.s32 1, %v6699_v8  ;;  %v4115_v23 = vadd.s32 4294967169, %v3243_v36  ;;  %v3399_v43 = vadd.s32 %v6643_v48, %v6640_v1  ;;  %v3432_v9 = vsel %vm6713_vm11, 0, %v3430_v17 }
 0x318   : > { %v4493_v19 = vpop.eup %4492  ;;  %vm4122_vm14 = vcmp.lt.s32.totalorder %v4121_v35, 0  ;;  %v1630_v11 = vmul.u32 %v6689_v54, %v1614_v57  ;;  %vm1632_vm15 = vc.u32 %v6708_v6, %v6698_v15  ;;  %v3246_v2 = vand.u32 8388607, %v3239_v0 }
 0x319   : > { %v4495_v52 = vpop.eup %4494  ;;  %v1779_v62 = vxor.u32 2147483648, %v4493_v19  ;;  %v3414_v33 = vsel %vm4122_vm14, 0, %v4121_v35  ;;  %v1890_v28 = vand.u32 2139095040, %v6719_v39  ;;  %v1634_v50 = vsel %vm1632_vm15, %v1633_v38, %v6699_v8 }
 0x31a   : > { %v1776_v45 = vxor.u32 2147483648, %v4495_v52  ;;  %v3415_v13 = vsub.s32 32, %v3414_v33  ;;  %v3419_v63 = vsub.s32 4294967266, %v3414_v33  ;;  %v3416_v48 = vshll.u32 %v6691_v42, %v3414_v33 }
 0x31b   : > { %v1780_v1 = vsel %vm1778_vm13, %v1779_v62, %v4495_v52  ;;  %v3249_v40 = vadd.s32 1, %v4115_v23  ;;  %v1635_v53 = vadd.s32 %v1634_v50, %v1630_v11  ;;  %vm1771_vm0 = vweird.f32 %v6324_v7 }
 0x31c   : > { %v1777_v54 = vsel %vm1775_vm12, %v4493_v19, %v1776_v45  ;;  %v3417_v46 = vshrl.u32 %v3399_v43, %v3415_v13  ;;  %v3420_v3 = vadd.s32 127, %v3419_v63  ;;  %v3436_v24 = vadd.s32 3, %v3432_v9 }
 0x31d   : > { %v1781_v31 = vsel %vm1774_vm9, %v1777_v54, %v1780_v1  ;;  %vm3250_vm1 = vcmp.gt.s32.totalorder %v3249_v40, 0  ;;  %v1636_v42 = vadd.s32 536870912, %v1635_v53  ;;  %v3247_v10 = vor.u32 8388608, %v3246_v2 }
 0x31e   : > { %v1782_v44 = vsel %vm1771_vm0, nan, %v1781_v31  ;;  %v3418_v5 = vor.u32 %v3417_v46, %v3416_v48  ;;  %v3421_v56 = vshll.u32 %v3420_v3, 23  ;;  %v3251_v47 = vsel %vm3250_vm1, %v3249_v40, 0 }
 0x31f   : > { %3874 = vst [vmem:[%s5083_s10 + $0x58] sm:$0xff] %v1782_v44  ;;  %v1637_v60 = vshrl.u32 %v1636_v42, 30  ;;  %v1891_v21 = vshrl.u32 %v1890_v28, 23  ;;  %v3253_v25 = vand.u32 31, %v3251_v47  ;;  %v6745_v14 = vand.u32 3, %v3436_v24 }
 0x320   : > { %v3422_v55 = vor.u32 4788187, %v3421_v56  ;;  %v3425_v41 = vcvt.s32.f32 %v3418_v5  ;;  %vm1577_vm2 = vcmp.lt.s32.totalorder %v6553_v49, 0  ;;  %v6749_v58 = vadd.s32 %v6698_v15, %v6708_v6 }
 0x321   : > { %v1638_v7 = vshll.u32 %v1637_v60, 30  ;;  %v3254_v17 = vsub.s32 32, %v3253_v25  ;;  %v6751_v57 = vshll.u32 %v3247_v10, 8  ;;  %v1887_v4 = vand.u32 2147483647, %v6719_v39 }
 0x322   : > { %v3423_v8 = vand.u32 2147483647, %v3422_v55  ;;  %v6756_v38 = vshrl.u32 %v3251_v47, 5  ;;  %v4063_v23 = vadd.s32 4294967169, %v1891_v21  ;;  %v1661_v19 = vsub.s32 4, %v1637_v60 }
 0x323   : > { %v6754_v35 = vsub.s32 %v1635_v53, %v1638_v7  ;;  %v3256_v43 = vshll.u32 %v4609_v12, %v3253_v25  ;;  %v3257_v9 = vshrl.u32 %v4610_v16, %v3254_v17  ;;  %v3260_v11 = vshrl.u32 %v4611_v18, %v3254_v17  ;;  %v6803_v7 = vpop.f32.mrb[15].mxu0 }
 0x324   : > { %v3426_v36 = vmul.f32 %v3425_v41, %v3423_v8  ;;  %vm6763_vm3 = vcmp.le.f32.partialorder %v1575_v34, 0.7853982  ;;  %v3259_v62 = vshll.u32 %v4610_v16, %v3253_v25  ;;  %v3263_v33 = vshrl.u32 %v4612_v20, %v3254_v17 }
 0x325   : > { %v1641_v52 = vsub.s32 0, %v6754_v35  ;;  %v3258_v2 = vor.u32 %v3257_v9, %v3256_v43  ;;  %v3262_v45 = vshll.u32 %v4611_v18, %v3253_v25  ;;  %v3265_v13 = vshll.u32 %v4612_v20, %v3253_v25 }
 0x326   : > { %v3427_v15 = vxor.u32 2147483648, %v3426_v36  ;;  %v3266_v63 = vshrl.u32 %v4613_v22, %v3254_v17  ;;  %v3261_v1 = vor.u32 %v3260_v11, %v3259_v62  ;;  %v3268_v48 = vshll.u32 %v4613_v22, %v3253_v25 }
 0x327   : > { %v4052_v34 = vmin.u32 %v1641_v52, %v6754_v35  ;;  %v3264_v40 = vor.u32 %v3263_v33, %v3262_v45  ;;  %v3269_v46 = vshrl.u32 %v4614_v29, %v3254_v17  ;;  %vm3271_vm4 = vcmp.lt.s32.totalorder %v6756_v38, 1 }
 0x328   : > { %v3428_v28 = vsel %vm3345_vm5, %v3427_v15, %v3426_v36  ;;  %v3267_v54 = vor.u32 %v3266_v63, %v3265_v13  ;;  %v1897_v53 = vadd.s32 1, %v4063_v23  ;;  %v1662_v31 = vsel %vm1577_vm2, %v1661_v19, %v1637_v60 }
 0x329   : > { %v3431_v50 = vsel %vm6713_vm11, %v6536_v61, %v3428_v28  ;;  %v1643_v3 = vclz %v4052_v34  ;;  %v3255_v24 = vshrl.u32 %v4609_v12, %v3254_v17  ;;  %v3270_v44 = vor.u32 %v3269_v46, %v3268_v48 }
 0x32a   : > { %4496 = vcosq.f32 %v3431_v50  ;;  %vm3273_vm5 = vcmp.lt.s32.totalorder %v6756_v38, 3  ;;  %vm3274_vm6 = vcmp.lt.s32.totalorder %v6756_v38, 4  ;;  %v3279_v30 = vsel %vm3271_vm4, %v3258_v2, %v3261_v1 }
 0x32b   : > { %4498 = vsinq.f32 %v3431_v50  ;;  %v4053_v5 = vadd.s32 4294967294, %v1643_v3  ;;  %v3276_v56 = vsel %vm3274_vm6, %v3264_v40, 2102212464  ;;  %v3280_v42 = vsel %vm3274_vm6, %v3267_v54, 920167782 }
 0x32c   : > { %v3283_v10 = vsel %vm3271_vm4, %v3261_v1, %v3264_v40  ;;  %v3284_v47 = vsel %vm3274_vm6, %v3270_v44, 1326507024  ;;  %vm3272_vm8 = vcmp.lt.s32.totalorder %v6756_v38, 2  ;;  %v3281_v55 = vsel %vm3273_vm5, %v3264_v40, %v3280_v42  ;;  %v6833_v38 = vld [vmem:[%s7488_s2] ss:$0 sm:$0xff] }
 0x32d   : > { %vm4054_vm7 = vcmp.lt.s32.totalorder %v4053_v5, 0  ;;  %v3285_v60 = vsel %vm3273_vm5, %v3267_v54, %v3284_v47  ;;  %vm3439_vm10 = vcmp.eq.s32.totalorder %v6745_v14, 0  ;;  %v1664_v25 = vsel %vm6763_vm3, 0, %v1662_v31 }
 0x32e   : > { %v1646_v21 = vsel %vm4054_vm7, 0, %v4053_v5  ;;  %v3282_v8 = vsel %vm3272_vm8, %v3279_v30, %v3281_v55  ;;  %v3286_v41 = vsel %vm3272_vm8, %v3283_v10, %v3285_v60  ;;  %vm3438_vm9 = vcmp.lt.s32.totalorder %v6745_v14, 2 }
 0x32f   : > { %v1647_v17 = vsub.s32 32, %v1646_v21  ;;  %v1651_v36 = vsub.s32 4294967266, %v1646_v21  ;;  %v3275_v23 = vsel %vm3271_vm4, %v3255_v24, %v3258_v2  ;;  %v3277_v19 = vsel %vm3273_vm5, %v3261_v1, %v3276_v56 }
 0x330   : > { %vm3435_vm11 = vweird.f32 %v6536_v61  ;;  %v6812_v43 = vmul.u32.u64.low %v6751_v57, %v3286_v41  ;;  %v6813_v9 = vmul.u32.u64.high %v6751_v57, %v3286_v41, %v6812_v43  ;;  %v1648_v52 = vshll.u32 %v6754_v35, %v1646_v21 }
 0x331   : > { %v6816_v11 = vmul.u32.u64.low %v6751_v57, %v3282_v8  ;;  %v6817_v15 = vmul.u32.u64.high %v6751_v57, %v3282_v8, %v6816_v11  ;;  %v1649_v62 = vshrl.u32 %v6749_v58, %v1647_v17  ;;  %v1652_v33 = vadd.s32 127, %v1651_v36 }
 0x332   : > { %vm1898_vm12 = vcmp.gt.s32.totalorder %v1897_v53, 0  ;;  %v1668_v2 = vadd.s32 3, %v1664_v25  ;;  %v3278_v45 = vsel %vm3272_vm8, %v3275_v23, %v3277_v19  ;;  %v1894_v13 = vand.u32 8388607, %v1887_v4 }
 0x333   : > { %v1899_v63 = vsel %vm1898_vm12, %v1897_v53, 0  ;;  %vm3442_vm13 = vcmp.eq.s32.totalorder %v6745_v14, 2  ;;  %v1650_v34 = vor.u32 %v1649_v62, %v1648_v52  ;;  %v1653_v1 = vshll.u32 %v1652_v33, 23 }
 0x334   : > { %v4497_v28 = vpop.eup %4496  ;;  %v1901_v48 = vand.u32 31, %v1899_v63  ;;  %vm3296_vm14 = vc.u32 %v6813_v9, %v6816_v11  ;;  %v3297_v58 = vadd.s32 1, %v6817_v15  ;;  %v6837_v40 = vadd.f32 %v6833_v38, %v6362_v37 }
 0x335   : > { %v4499_v50 = vpop.eup %4498  ;;  %v3443_v35 = vxor.u32 2147483648, %v4497_v28  ;;  %v1654_v46 = vor.u32 4788187, %v1653_v1  ;;  %v3294_v3 = vmul.u32 %v6751_v57, %v3278_v45  ;;  %v6840_v24 = vand.u32 3, %v1668_v2 }
 0x336   : > { %v3440_v54 = vxor.u32 2147483648, %v4499_v50  ;;  %v1902_v53 = vsub.s32 32, %v1901_v48  ;;  %v3298_v44 = vsel %vm3296_vm14, %v3297_v58, %v6817_v15  ;;  %v1895_v5 = vor.u32 8388608, %v1894_v13 }
 0x337   : > { %v3444_v31 = vsel %vm3442_vm13, %v3443_v35, %v4499_v50  ;;  %v1655_v56 = vand.u32 2147483647, %v1654_v46  ;;  %v1657_v42 = vcvt.s32.f32 %v1650_v34  ;;  %v3299_v10 = vadd.s32 %v3298_v44, %v3294_v3 }
 0x338   : > { %v3441_v30 = vsel %vm3439_vm10, %v4497_v28, %v3440_v54  ;;  %v1904_v47 = vshll.u32 %v4609_v12, %v1901_v48  ;;  %v1905_v57 = vshrl.u32 %v4610_v16, %v1902_v53  ;;  %v1908_v55 = vshrl.u32 %v4611_v18, %v1902_v53 }
 0x339   : > { %v3445_v37 = vsel %vm3438_vm9, %v3441_v30, %v3444_v31  ;;  %v1658_v21 = vmul.f32 %v1657_v42, %v1655_v56  ;;  %v3300_v25 = vadd.s32 536870912, %v3299_v10  ;;  %v1911_v8 = vshrl.u32 %v4612_v20, %v1902_v53 }
 0x33a   : > { %v3446_v60 = vsel %vm3435_vm11, nan, %v3445_v37  ;;  %v1900_v41 = vshrl.u32 %v1899_v63, 5  ;;  %v1907_v17 = vshll.u32 %v4610_v16, %v1901_v48  ;;  %v1910_v14 = vshll.u32 %v4611_v18, %v1901_v48 }
 0x33b   : > { %3890 = vst [vmem:[%s5083_s10 + $0xd8] sm:$0xff] %v3446_v60  ;;  %v1914_v36 = vshrl.u32 %v4613_v22, %v1902_v53  ;;  %v1659_v23 = vxor.u32 2147483648, %v1658_v21  ;;  %v3301_v19 = vshrl.u32 %v3300_v25, 30  ;;  %v1906_v43 = vor.u32 %v1905_v57, %v1904_v47 }
 0x33c   : > { %v1913_v15 = vshll.u32 %v4612_v20, %v1901_v48  ;;  %v1909_v52 = vor.u32 %v1908_v55, %v1907_v17  ;;  %v1912_v61 = vor.u32 %v1911_v8, %v1910_v14  ;;  %v1916_v62 = vshll.u32 %v4613_v22, %v1901_v48  ;;  %v6879_v55 = vpop.f32.mrb[15].mxu1 }
 0x33d   : > { %v1917_v33 = vshrl.u32 %v4614_v29, %v1902_v53  ;;  %v1660_v2 = vsel %vm1577_vm2, %v1659_v23, %v1658_v21  ;;  %v3302_v45 = vshll.u32 %v3301_v19, 30  ;;  %v6862_v63 = vshll.u32 %v1895_v5, 8 }
 0x33e   : > { %v1915_v13 = vor.u32 %v1914_v36, %v1913_v15  ;;  %v1663_v28 = vsel %vm6763_vm3, %v6553_v49, %v1660_v2  ;;  %v1903_v34 = vshrl.u32 %v4609_v12, %v1902_v53  ;;  %v3554_v50 = vand.u32 2139095040, %v6837_v40 }
 0x33f   : > { %v1918_v1 = vor.u32 %v1917_v33, %v1916_v62  ;;  %4500 = vcosq.f32 %v1663_v28  ;;  %v6869_v48 = vsub.s32 %v3299_v10, %v3302_v45  ;;  %vm1919_vm15 = vcmp.lt.s32.totalorder %v1900_v41, 1 }
 0x340   : > { %vm1922_vm0 = vcmp.lt.s32.totalorder %v1900_v41, 4  ;;  %4502 = vsinq.f32 %v1663_v28  ;;  %vm1920_vm1 = vcmp.lt.s32.totalorder %v1900_v41, 2  ;;  %v1927_v58 = vsel %vm1919_vm15, %v1906_v43, %v1909_v52 }
 0x341   : > { %v1924_v35 = vsel %vm1922_vm0, %v1912_v61, 2102212464  ;;  %v3305_v54 = vsub.s32 0, %v6869_v48  ;;  %v3325_v46 = vsub.s32 4, %v3301_v19  ;;  %vm1921_vm2 = vcmp.lt.s32.totalorder %v1900_v41, 3 }
 0x342   : > { %v1928_v6 = vsel %vm1922_vm0, %v1915_v13, 920167782  ;;  %v1923_v3 = vsel %vm1919_vm15, %v1903_v34, %v1906_v43  ;;  %v1931_v53 = vsel %vm1919_vm15, %v1909_v52, %v1912_v61  ;;  %v1932_v44 = vsel %vm1922_vm0, %v1918_v1, 1326507024 }
 0x343   : > { %v1929_v31 = vsel %vm1921_vm2, %v1912_v61, %v1928_v6  ;;  %v4116_v5 = vmin.u32 %v3305_v54, %v6869_v48  ;;  %v1925_v30 = vsel %vm1921_vm2, %v1909_v52, %v1924_v35  ;;  %v1933_v42 = vsel %vm1921_vm2, %v1915_v13, %v1932_v44 }
 0x344   : > { %v1930_v56 = vsel %vm1920_vm1, %v1927_v58, %v1929_v31  ;;  %v1934_v10 = vsel %vm1920_vm1, %v1931_v53, %v1933_v42  ;;  %v3555_v57 = vshrl.u32 %v3554_v50, 23  ;;  %vm6883_vm3 = vcmp.le.f32.partialorder %v3239_v0, 0.7853982 }
 0x345   : > { %v6876_v37 = vmul.u32.u64.low %v6862_v63, %v1930_v56  ;;  %v6877_v47 = vmul.u32.u64.high %v6862_v63, %v1930_v56, %v6876_v37  ;;  %vm3241_vm4 = vcmp.lt.s32.totalorder %v6585_v59, 0  ;;  %v3307_v21 = vclz %v4116_v5 }
 0x346   : > { %vm1667_vm5 = vweird.f32 %v6553_v49  ;;  %v3326_v25 = vsel %vm3241_vm4, %v3325_v46, %v3301_v19  ;;  %v6892_v8 = vmul.u32.u64.low %v6862_v63, %v1934_v10  ;;  %v6893_v17 = vmul.u32.u64.high %v6862_v63, %v1934_v10, %v6892_v8 }
 0x347   : > { %v4127_v14 = vadd.s32 4294967169, %v3555_v57  ;;  %v4117_v36 = vadd.s32 4294967294, %v3307_v21  ;;  %v1926_v23 = vsel %vm1920_vm1, %v1923_v3, %v1925_v30  ;;  %v3551_v0 = vand.u32 2147483647, %v6837_v40 }
 0x348   : > { %v6899_v43 = vadd.f32 %v6833_v38, %v6455_v51  ;;  %vm1670_vm6 = vcmp.lt.s32.totalorder %v6840_v24, 2  ;;  %vm1671_vm7 = vcmp.eq.s32.totalorder %v6840_v24, 0  ;;  %v1945_v19 = vadd.s32 1, %v6877_v47 }
 0x349   : > { %v3561_v15 = vadd.s32 1, %v4127_v14  ;;  %v4501_v52 = vpop.eup %4500  ;;  %vm1674_vm8 = vcmp.eq.s32.totalorder %v6840_v24, 2  ;;  %v3295_v41 = vadd.s32 %v6816_v11, %v6813_v9  ;;  %vm4118_vm10 = vcmp.lt.s32.totalorder %v4117_v36, 0 }
 0x34a   : > { %v3328_v61 = vsel %vm6883_vm3, 0, %v3326_v25  ;;  %v4503_v62 = vpop.eup %4502  ;;  %v1675_v51 = vxor.u32 2147483648, %v4501_v52  ;;  %v3310_v33 = vsel %vm4118_vm10, 0, %v4117_v36  ;;  %v1942_v2 = vmul.u32 %v6862_v63, %v1926_v23 }
 0x34b   : > { %vm1944_vm9 = vc.u32 %v6893_v17, %v6876_v37  ;;  %v1672_v45 = vxor.u32 2147483648, %v4503_v62  ;;  %v3311_v13 = vsub.s32 32, %v3310_v33  ;;  %v3315_v28 = vsub.s32 4294967266, %v3310_v33 }
 0x34c   : > { %v3558_v34 = vand.u32 8388607, %v3551_v0  ;;  %v1676_v1 = vsel %vm1674_vm8, %v1675_v51, %v4503_v62  ;;  %v3312_v9 = vshll.u32 %v6869_v48, %v3310_v33  ;;  %v1946_v11 = vsel %vm1944_vm9, %v1945_v19, %v6877_v47 }
 0x34d   : > { %vm3562_vm11 = vcmp.gt.s32.totalorder %v3561_v15, 0  ;;  %v1673_v50 = vsel %vm1671_vm7, %v4501_v52, %v1672_v45  ;;  %v3313_v35 = vshrl.u32 %v3295_v41, %v3311_v13  ;;  %v3316_v63 = vadd.s32 127, %v3315_v28 }
 0x34e   : > { %v1947_v58 = vadd.s32 %v1946_v11, %v1942_v2  ;;  %v1677_v54 = vsel %vm1670_vm6, %v1673_v50, %v1676_v1  ;;  %v3332_v46 = vadd.s32 3, %v3328_v61  ;;  %v3563_v6 = vsel %vm3562_vm11, %v3561_v15, 0 }
 0x34f   : > { %v1783_v3 = vand.u32 2147483647, %v6899_v43  ;;  %v1678_v31 = vsel %vm1667_vm5, nan, %v1677_v54  ;;  %v3314_v48 = vor.u32 %v3313_v35, %v3312_v9  ;;  %v3317_v53 = vshll.u32 %v3316_v63, 23 }
 0x350   : > { %v1948_v44 = vadd.s32 536870912, %v1947_v58  ;;  %3873 = vst [vmem:[%s5083_s10 + $0x50] sm:$0xff] %v1678_v31  ;;  %v3559_v5 = vor.u32 8388608, %v3558_v34  ;;  %v3565_v30 = vand.u32 31, %v3563_v6  ;;  %v6925_v10 = vand.u32 3, %v3332_v46 }
 0x351   : > { %v3318_v56 = vor.u32 4788187, %v3317_v53  ;;  %v1786_v47 = vand.u32 2139095040, %v6899_v43  ;;  %v6930_v57 = vand.u32 8388607, %v1783_v3  ;;  %v3321_v21 = vcvt.s32.f32 %v3314_v48 }
 0x352   : > { %v6923_v42 = vshrl.u32 %v1948_v44, 30  ;;  %v3566_v24 = vsub.s32 32, %v3565_v30  ;;  %v6933_v25 = vadd.s32 %v6876_v37, %v6893_v17  ;;  %v6939_v19 = vshll.u32 %v3559_v5, 8 }
 0x353   : > { %v3319_v49 = vand.u32 2147483647, %v3318_v56  ;;  %v3568_v41 = vshll.u32 %v4609_v12, %v3565_v30  ;;  %v3564_v62 = vshrl.u32 %v3563_v6, 5  ;;  %v3571_v37 = vshll.u32 %v4610_v16, %v3565_v30 }
 0x354   : > { %v1950_v8 = vshll.u32 %v6923_v42, 30  ;;  %v3569_v14 = vshrl.u32 %v4610_v16, %v3566_v24  ;;  %v3572_v36 = vshrl.u32 %v4611_v18, %v3566_v24  ;;  %v3575_v23 = vshrl.u32 %v4612_v20, %v3566_v24 }
 0x355   : > { %v3322_v15 = vmul.f32 %v3321_v21, %v3319_v49  ;;  %v3578_v61 = vshrl.u32 %v4613_v22, %v3566_v24  ;;  %v3574_v17 = vshll.u32 %v4611_v18, %v3565_v30  ;;  %v1787_v51 = vshrl.u32 %v1786_v47, 23 }
 0x356   : > { %v6941_v52 = vsub.s32 %v1947_v58, %v1950_v8  ;;  %v3570_v45 = vor.u32 %v3569_v14, %v3568_v41  ;;  %v3577_v13 = vshll.u32 %v4612_v20, %v3565_v30  ;;  %v3573_v28 = vor.u32 %v3572_v36, %v3571_v37 }
 0x357   : > { %v3323_v33 = vxor.u32 2147483648, %v3322_v15  ;;  %v3576_v34 = vor.u32 %v3575_v23, %v3574_v17  ;;  %v3580_v1 = vshll.u32 %v4613_v22, %v3565_v30  ;;  %v3581_v9 = vshrl.u32 %v4614_v29, %v3566_v24 }
 0x358   : > { %v1953_v2 = vsub.s32 0, %v6941_v52  ;;  %v3579_v35 = vor.u32 %v3578_v61, %v3577_v13  ;;  %v1791_v63 = vor.u32 8388608, %v6930_v57  ;;  %v3567_v54 = vshrl.u32 %v4609_v12, %v3566_v24 }
 0x359   : > { %v3324_v11 = vsel %vm3241_vm4, %v3323_v33, %v3322_v15  ;;  %v3582_v46 = vor.u32 %v3581_v9, %v3580_v1  ;;  %v4059_v6 = vadd.s32 4294967169, %v1787_v51  ;;  %vm3583_vm12 = vcmp.lt.s32.totalorder %v3564_v62, 1 }
 0x35a   : > { %v4064_v50 = vmin.u32 %v1953_v2, %v6941_v52  ;;  %v3327_v58 = vsel %vm6883_vm3, %v6585_v59, %v3324_v11  ;;  %vm3586_vm13 = vcmp.lt.s32.totalorder %v3564_v62, 4  ;;  %vm1889_vm14 = vcmp.lt.s32.totalorder %v6719_v39, 0 }
 0x35b   : > { %4504 = vcosq.f32 %v3327_v58  ;;  %vm3584_vm15 = vcmp.lt.s32.totalorder %v3564_v62, 2  ;;  %v3588_v48 = vsel %vm3586_vm13, %v3576_v34, 2102212464  ;;  %v3591_v53 = vsel %vm3583_vm12, %v3570_v45, %v3573_v28 }
 0x35c   : > { %v1955_v31 = vclz %v4064_v50  ;;  %4506 = vsinq.f32 %v3327_v58  ;;  %vm3585_vm0 = vcmp.lt.s32.totalorder %v3564_v62, 3  ;;  %v3592_v5 = vsel %vm3586_vm13, %v3579_v35, 920167782 }
 0x35d   : > { %v3595_v30 = vsel %vm3583_vm12, %v3573_v28, %v3576_v34  ;;  %v3587_v60 = vsel %vm3583_vm12, %v3567_v54, %v3570_v45  ;;  %v3593_v56 = vsel %vm3585_vm0, %v3576_v34, %v3592_v5  ;;  %v3596_v47 = vsel %vm3586_vm13, %v3582_v46, 1326507024 }
 0x35e   : > { %v4065_v44 = vadd.s32 4294967294, %v1955_v31  ;;  %v1793_v24 = vadd.s32 1, %v4059_v6  ;;  %v3589_v57 = vsel %vm3585_vm0, %v3573_v28, %v3588_v48  ;;  %v3594_v49 = vsel %vm3584_vm15, %v3591_v53, %v3593_v56 }
 0x35f   : > { %v3597_v21 = vsel %vm3585_vm0, %v3579_v35, %v3596_v47  ;;  %v6963_v36 = vmul.u32.u64.low %v6939_v19, %v3594_v49  ;;  %v6964_v23 = vmul.u32.u64.high %v6939_v19, %v3594_v49, %v6963_v36  ;;  %v1973_v61 = vsub.s32 4, %v6923_v42 }
 0x360   : > { %vm4066_vm1 = vcmp.lt.s32.totalorder %v4065_v44, 0  ;;  %v3598_v14 = vsel %vm3584_vm15, %v3595_v30, %v3597_v21  ;;  %vm1794_vm2 = vcmp.gt.s32.totalorder %v1793_v24, 0  ;;  %vm3331_vm3 = vweird.f32 %v6585_v59 }
 0x361   : > { %v1958_v8 = vsel %vm4066_vm1, 0, %v4065_v44  ;;  %v3590_v37 = vsel %vm3584_vm15, %v3587_v60, %v3589_v57  ;;  %v6971_v17 = vmul.u32.u64.low %v6939_v19, %v3598_v14  ;;  %v6972_v51 = vmul.u32.u64.high %v6939_v19, %v3598_v14, %v6971_v17 }
 0x362   : > { %v1959_v15 = vsub.s32 32, %v1958_v8  ;;  %v1963_v41 = vsub.s32 4294967266, %v1958_v8  ;;  %v1795_v33 = vsel %vm1794_vm2, %v1793_v24, 0  ;;  %v1960_v2 = vshll.u32 %v6941_v52, %v1958_v8 }
 0x363   : > { %v1797_v28 = vand.u32 31, %v1795_v33  ;;  %vm3334_vm4 = vcmp.lt.s32.totalorder %v6925_v10, 2  ;;  %vm3335_vm5 = vcmp.eq.s32.totalorder %v6925_v10, 0  ;;  %vm6980_vm6 = vcmp.le.f32.partialorder %v1887_v4, 0.7853982 }
 0x364   : > { %v1961_v45 = vshrl.u32 %v6933_v25, %v1959_v15  ;;  %v1964_v13 = vadd.s32 127, %v1963_v41  ;;  %v3609_v34 = vadd.s32 1, %v6964_v23  ;;  %vm3338_vm7 = vcmp.eq.s32.totalorder %v6925_v10, 2 }
 0x365   : > { %v4505_v1 = vpop.eup %4504  ;;  %v1974_v25 = vsel %vm1889_vm14, %v1973_v61, %v6923_v42  ;;  %v3606_v35 = vmul.u32 %v6939_v19, %v3590_v37  ;;  %vm3608_vm8 = vc.u32 %v6972_v51, %v6963_v36  ;;  %v1798_v4 = vsub.s32 32, %v1797_v28 }
 0x366   : > { %v1962_v52 = vor.u32 %v1961_v45, %v1960_v2  ;;  %v1965_v9 = vshll.u32 %v1964_v13, 23  ;;  %v4507_v11 = vpop.eup %4506  ;;  %v3339_v50 = vxor.u32 2147483648, %v4505_v1  ;;  %v3610_v46 = vsel %vm3608_vm8, %v3609_v34, %v6964_v23 }
 0x367   : > { %v3336_v58 = vxor.u32 2147483648, %v4507_v11  ;;  %v6993_v6 = vshll.u32 %v1791_v63, 8  ;;  %v1976_v48 = vsel %vm6980_vm6, 0, %v1974_v25  ;;  %v3611_v42 = vadd.s32 %v3610_v46, %v3606_v35 }
 0x368   : > { %v1966_v54 = vor.u32 4788187, %v1965_v9  ;;  %v3340_v31 = vsel %vm3338_vm7, %v3339_v50, %v4507_v11  ;;  %v6999_v53 = vadd.f32 %v6833_v38, %v6538_v32  ;;  %v1969_v5 = vcvt.s32.f32 %v1962_v52 }
 0x369   : > { %v3337_v19 = vsel %vm3335_vm5, %v4505_v1, %v3336_v58  ;;  %v7003_v30 = vshrl.u32 %v1795_v33, 5  ;;  %v3612_v60 = vadd.s32 536870912, %v3611_v42  ;;  %v1801_v56 = vshrl.u32 %v4610_v16, %v1798_v4 }
 0x36a   : > { %v1967_v44 = vand.u32 2147483647, %v1966_v54  ;;  %v3341_v63 = vsel %vm3334_vm4, %v3337_v19, %v3340_v31  ;;  %v1804_v47 = vshrl.u32 %v4611_v18, %v1798_v4  ;;  %v1800_v57 = vshll.u32 %v4609_v12, %v1797_v28 }
 0x36b   : > { %v3342_v24 = vsel %vm3331_vm3, nan, %v3341_v63  ;;  %v1807_v49 = vshrl.u32 %v4612_v20, %v1798_v4  ;;  %v3613_v21 = vshrl.u32 %v3612_v60, 30  ;;  %v1803_v8 = vshll.u32 %v4610_v16, %v1797_v28 }
 0x36c   : > { %v1970_v32 = vmul.f32 %v1969_v5, %v1967_v44  ;;  %3889 = vst [vmem:[%s5083_s10 + $0xd0] sm:$0xff] %v3342_v24  ;;  %v1806_v10 = vshll.u32 %v4611_v18, %v1797_v28  ;;  %v1810_v14 = vshrl.u32 %v4613_v22, %v1798_v4  ;;  %v1809_v15 = vshll.u32 %v4612_v20, %v1797_v28 }
 0x36d   : > { %v1812_v41 = vshll.u32 %v4613_v22, %v1797_v28  ;;  %v1813_v59 = vshrl.u32 %v4614_v29, %v1798_v4  ;;  %v1980_v61 = vadd.s32 3, %v1976_v48  ;;  %v3614_v37 = vshll.u32 %v3613_v21, 30 }
 0x36e   : > { %v1971_v23 = vxor.u32 2147483648, %v1970_v32  ;;  %v1802_v17 = vor.u32 %v1801_v56, %v1800_v57  ;;  %v1805_v33 = vor.u32 %v1804_v47, %v1803_v8  ;;  %v1808_v45 = vor.u32 %v1807_v49, %v1806_v10 }
 0x36f   : > { %v1811_v13 = vor.u32 %v1810_v14, %v1809_v15  ;;  %v1814_v34 = vor.u32 %v1813_v59, %v1812_v41  ;;  %v7025_v52 = vsub.s32 %v3611_v42, %v3614_v37  ;;  %v1799_v28 = vshrl.u32 %v4609_v12, %v1798_v4 }
 0x370   : > { %v1972_v2 = vsel %vm1889_vm14, %v1971_v23, %v1970_v32  ;;  %v3450_v9 = vand.u32 2139095040, %v6999_v53  ;;  %vm1815_vm10 = vcmp.lt.s32.totalorder %v7003_v30, 1  ;;  %vm1816_vm9 = vcmp.lt.s32.totalorder %v7003_v30, 2 }
 0x371   : > { %v1975_v1 = vsel %vm6980_vm6, %v6719_v39, %v1972_v2  ;;  %vm1817_vm11 = vcmp.lt.s32.totalorder %v7003_v30, 3  ;;  %v3617_v25 = vsub.s32 0, %v7025_v52  ;;  %vm1818_vm12 = vcmp.lt.s32.totalorder %v7003_v30, 4 }
 0x372   : > { %4508 = vcosq.f32 %v1975_v1  ;;  %v1823_v62 = vsel %vm1815_vm10, %v1802_v17, %v1805_v33  ;;  %v1820_v11 = vsel %vm1818_vm12, %v1808_v45, 2102212464  ;;  %v1824_v50 = vsel %vm1818_vm12, %v1811_v13, 920167782 }
 0x373   : > { %4510 = vsinq.f32 %v1975_v1  ;;  %v1827_v35 = vsel %vm1815_vm10, %v1805_v33, %v1808_v45  ;;  %v1828_v4 = vsel %vm1818_vm12, %v1814_v34, 1326507024  ;;  %v4128_v58 = vmin.u32 %v3617_v25, %v7025_v52 }
 0x374   : > { %v3637_v54 = vsub.s32 4, %v3613_v21  ;;  %v1825_v46 = vsel %vm1817_vm11, %v1808_v45, %v1824_v50  ;;  %v1829_v31 = vsel %vm1817_vm11, %v1811_v13, %v1828_v4  ;;  %v1981_v48 = vand.u32 3, %v1980_v61 }
 0x375   : > { %v1826_v42 = vsel %vm1816_vm9, %v1823_v62, %v1825_v46  ;;  %v1830_v19 = vsel %vm1816_vm9, %v1827_v35, %v1829_v31  ;;  %v3451_v44 = vshrl.u32 %v3450_v9, 23  ;;  %vm3553_vm13 = vcmp.lt.s32.totalorder %v6837_v40, 0 }
 0x376   : > { %v3619_v5 = vclz %v4128_v58  ;;  %v1819_v63 = vsel %vm1815_vm10, %v1799_v28, %v1802_v17  ;;  %v1821_v60 = vsel %vm1817_vm11, %v1805_v33, %v1820_v11  ;;  %vm1979_vm14 = vweird.f32 %v6719_v39 }
 0x377   : > { %v7053_v56 = vmul.u32.u64.low %v6993_v6, %v1830_v19  ;;  %v7054_v47 = vmul.u32.u64.high %v6993_v6, %v1830_v19, %v7053_v56  ;;  %v7057_v24 = vmul.u32.u64.low %v6993_v6, %v1826_v42  ;;  %v7058_v32 = vmul.u32.u64.high %v6993_v6, %v1826_v42, %v7057_v24 }
 0x378   : > { %vm7064_vm15 = vcmp.le.f32.partialorder %v3551_v0, 0.7853982  ;;  %v4129_v49 = vadd.s32 4294967294, %v3619_v5  ;;  %v3638_v8 = vsel %vm3553_vm13, %v3637_v54, %v3613_v21  ;;  %v4123_v10 = vadd.s32 4294967169, %v3451_v44 }
 0x379   : > { %vm1982_vm0 = vcmp.lt.s32.totalorder %v1981_v48, 2  ;;  %vm1983_vm1 = vcmp.eq.s32.totalorder %v1981_v48, 0  ;;  %vm1986_vm2 = vcmp.eq.s32.totalorder %v1981_v48, 2  ;;  %v1822_v14 = vsel %vm1816_vm9, %v1819_v63, %v1821_v60 }
 0x37a   : > { %v3607_v23 = vadd.s32 %v6963_v36, %v6972_v51  ;;  %vm4130_vm3 = vcmp.lt.s32.totalorder %v4129_v49, 0  ;;  %v3447_v0 = vand.u32 2147483647, %v6999_v53  ;;  %v3457_v15 = vadd.s32 1, %v4123_v10 }
 0x37b   : > { %v3622_v59 = vsel %vm4130_vm3, 0, %v4129_v49  ;;  %v3640_v61 = vsel %vm7064_vm15, 0, %v3638_v8  ;;  %vm1840_vm4 = vc.u32 %v7054_v47, %v7057_v24  ;;  %v1841_v21 = vadd.s32 1, %v7058_v32 }
 0x37c   : > { %v4509_v41 = vpop.eup %4508  ;;  %v3623_v17 = vsub.s32 32, %v3622_v59  ;;  %v3627_v33 = vsub.s32 4294967266, %v3622_v59  ;;  %v1838_v36 = vmul.u32 %v6993_v6, %v1822_v14  ;;  %v3624_v2 = vshll.u32 %v7025_v52, %v3622_v59 }
 0x37d   : > { %v4511_v37 = vpop.eup %4510  ;;  %v1987_v30 = vxor.u32 2147483648, %v4509_v41  ;;  %v1842_v45 = vsel %vm1840_vm4, %v1841_v21, %v7058_v32  ;;  %vm3458_vm5 = vcmp.gt.s32.totalorder %v3457_v15, 0  ;;  %v3644_v25 = vadd.s32 3, %v3640_v61 }
 0x37e   : > { %v1984_v51 = vxor.u32 2147483648, %v4511_v37  ;;  %v3625_v34 = vshrl.u32 %v3607_v23, %v3623_v17  ;;  %v3628_v1 = vadd.s32 127, %v3627_v33  ;;  %v1843_v28 = vadd.s32 %v1842_v45, %v1838_v36 }
 0x37f   : > { %v1988_v13 = vsel %vm1986_vm2, %v1987_v30, %v4511_v37  ;;  %v3454_v62 = vand.u32 8388607, %v3447_v0  ;;  %v3459_v11 = vsel %vm3458_vm5, %v3457_v15, 0  ;;  %v7093_v5 = vand.u32 3, %v3644_v25 }
 0x380   : > { %v1985_v9 = vsel %vm1983_vm1, %v4509_v41, %v1984_v51  ;;  %v3626_v50 = vor.u32 %v3625_v34, %v3624_v2  ;;  %v3629_v52 = vshll.u32 %v3628_v1, 23  ;;  %v1844_v35 = vadd.s32 536870912, %v1843_v28 }
 0x381   : > { %v1989_v6 = vsel %vm1982_vm0, %v1985_v9, %v1988_v13  ;;  %v3461_v58 = vand.u32 31, %v3459_v11  ;;  %v3455_v31 = vor.u32 8388608, %v3454_v62  ;;  %v7101_v56 = vadd.f32 %v6833_v38, %v6648_v26 }
 0x382   : > { %v1990_v4 = vsel %vm1979_vm14, nan, %v1989_v6  ;;  %v3630_v54 = vor.u32 4788187, %v3629_v52  ;;  %v7091_v46 = vshrl.u32 %v1844_v35, 30  ;;  %v3633_v44 = vcvt.s32.f32 %v3626_v50 }
 0x383   : > { %3876 = vst [vmem:[%s5083_s10 + $0x68] sm:$0xff] %v1990_v4  ;;  %v3462_v42 = vsub.s32 32, %v3461_v58  ;;  %v3464_v8 = vshll.u32 %v4609_v12, %v3461_v58  ;;  %v3460_v14 = vshrl.u32 %v3459_v11, 5  ;;  %v3467_v23 = vshll.u32 %v4610_v16, %v3461_v58 }
 0x384   : > { %v3631_v19 = vand.u32 2147483647, %v3630_v54  ;;  %v1846_v48 = vshll.u32 %v7091_v46, 30  ;;  %v3470_v15 = vshll.u32 %v4611_v18, %v3461_v58  ;;  %v7109_v41 = vshll.u32 %v3455_v31, 8 }
 0x385   : > { %v3465_v63 = vshrl.u32 %v4610_v16, %v3462_v42  ;;  %v3468_v60 = vshrl.u32 %v4611_v18, %v3462_v42  ;;  %v3471_v39 = vshrl.u32 %v4612_v20, %v3462_v42  ;;  %v3474_v10 = vshrl.u32 %v4613_v22, %v3462_v42 }
 0x386   : > { %v3634_v32 = vmul.f32 %v3633_v44, %v3631_v19  ;;  %v7103_v49 = vsub.s32 %v1843_v28, %v1846_v48  ;;  %v3473_v26 = vshll.u32 %v4612_v20, %v3461_v58  ;;  %v3476_v17 = vshll.u32 %v4613_v22, %v3461_v58 }
 0x387   : > { %v3466_v21 = vor.u32 %v3465_v63, %v3464_v8  ;;  %v3469_v37 = vor.u32 %v3468_v60, %v3467_v23  ;;  %v3472_v30 = vor.u32 %v3471_v39, %v3470_v15  ;;  %v3477_v33 = vshrl.u32 %v4614_v29, %v3462_v42 }
 0x388   : > { %v3635_v59 = vxor.u32 2147483648, %v3634_v32  ;;  %v1849_v61 = vsub.s32 0, %v7103_v49  ;;  %v3475_v2 = vor.u32 %v3474_v10, %v3473_v26  ;;  %v2098_v45 = vand.u32 2139095040, %v7101_v56 }
 0x389   : > { %v1869_v34 = vsub.s32 4, %v7091_v46  ;;  %v3463_v1 = vshrl.u32 %v4609_v12, %v3462_v42  ;;  %v3478_v28 = vor.u32 %v3477_v33, %v3476_v17  ;;  %vm1785_vm6 = vcmp.lt.s32.totalorder %v6899_v43, 0 }
 0x38a   : > { %v3636_v36 = vsel %vm3553_vm13, %v3635_v59, %v3634_v32  ;;  %v4060_v51 = vmin.u32 %v1849_v61, %v7103_v49  ;;  %vm3479_vm7 = vcmp.lt.s32.totalorder %v3460_v14, 1  ;;  %vm3482_vm8 = vcmp.lt.s32.totalorder %v3460_v14, 4 }
 0x38b   : > { %v3639_v13 = vsel %vm7064_vm15, %v6837_v40, %v3636_v36  ;;  %vm3480_vm10 = vcmp.lt.s32.totalorder %v3460_v14, 2  ;;  %v3484_v25 = vsel %vm3482_vm8, %v3472_v30, 2102212464  ;;  %v3487_v62 = vsel %vm3479_vm7, %v3466_v21, %v3469_v37 }
 0x38c   : > { %4512 = vcosq.f32 %v3639_v13  ;;  %v1851_v9 = vclz %v4060_v51  ;;  %vm3481_vm9 = vcmp.lt.s32.totalorder %v3460_v14, 3  ;;  %v3488_v6 = vsel %vm3482_vm8, %v3475_v2, 920167782 }
 0x38d   : > { %4514 = vsinq.f32 %v3639_v13  ;;  %v3491_v57 = vsel %vm3479_vm7, %v3469_v37, %v3472_v30  ;;  %vm7127_vm11 = vcmp.le.f32.partialorder %v1783_v3, 0.7853982  ;;  %v3483_v52 = vsel %vm3479_vm7, %v3463_v1, %v3466_v21 }
 0x38e   : > { %v4061_v11 = vadd.s32 4294967294, %v1851_v9  ;;  %v3489_v35 = vsel %vm3481_vm9, %v3472_v30, %v3488_v6  ;;  %v3492_v4 = vsel %vm3482_vm8, %v3478_v28, 1326507024  ;;  %v2099_v58 = vshrl.u32 %v2098_v45, 23 }
 0x38f   : > { %v3485_v54 = vsel %vm3481_vm9, %v3469_v37, %v3484_v25  ;;  %v3490_v31 = vsel %vm3480_vm10, %v3487_v62, %v3489_v35  ;;  %v3493_v42 = vsel %vm3481_vm9, %v3475_v2, %v3492_v4  ;;  %vm3646_vm13 = vcmp.lt.s32.totalorder %v7093_v5, 2 }
 0x390   : > { %vm4062_vm12 = vcmp.lt.s32.totalorder %v4061_v11, 0  ;;  %v3494_v44 = vsel %vm3480_vm10, %v3491_v57, %v3493_v42  ;;  %v7134_v48 = vmul.u32.u64.low %v7109_v41, %v3490_v31  ;;  %v7135_v63 = vmul.u32.u64.high %v7109_v41, %v3490_v31, %v7134_v48 }
 0x391   : > { %v1854_v19 = vsel %vm4062_vm12, 0, %v4061_v11  ;;  %v1839_v3 = vadd.s32 %v7057_v24, %v7054_v47  ;;  %v4071_v32 = vadd.s32 4294967169, %v2099_v58  ;;  %vm3643_vm14 = vweird.f32 %v6837_v40 }
 0x392   : > { %v1855_v60 = vsub.s32 32, %v1854_v19  ;;  %v1859_v39 = vsub.s32 4294967266, %v1854_v19  ;;  %vm3647_vm15 = vcmp.eq.s32.totalorder %v7093_v5, 0  ;;  %v3486_v8 = vsel %vm3480_vm10, %v3483_v52, %v3485_v54 }
 0x393   : > { %v7145_v10 = vmul.u32.u64.low %v7109_v41, %v3494_v44  ;;  %v7146_v23 = vmul.u32.u64.high %v7109_v41, %v3494_v44, %v7145_v10  ;;  %v1856_v15 = vshll.u32 %v7103_v49, %v1854_v19  ;;  %v2105_v21 = vadd.s32 1, %v4071_v32 }
 0x394   : > { %v1857_v59 = vshrl.u32 %v1839_v3, %v1855_v60  ;;  %v1860_v61 = vadd.s32 127, %v1859_v39  ;;  %vm3650_vm0 = vcmp.eq.s32.totalorder %v7093_v5, 2  ;;  %v1870_v47 = vsel %vm1785_vm6, %v1869_v34, %v7091_v46 }
 0x395   : > { %v3505_v24 = vadd.s32 1, %v7135_v63  ;;  %v7156_v14 = vadd.f32 %v6833_v38, %v6721_v27  ;;  %v2095_v49 = vand.u32 2147483647, %v7101_v56  ;;  %vm2106_vm1 = vcmp.gt.s32.totalorder %v2105_v21, 0 }
 0x396   : > { %v4513_v26 = vpop.eup %4512  ;;  %v1858_v37 = vor.u32 %v1857_v59, %v1856_v15  ;;  %v1861_v30 = vshll.u32 %v1860_v61, 23  ;;  %v3502_v36 = vmul.u32 %v7109_v41, %v3486_v8  ;;  %vm3504_vm2 = vc.u32 %v7146_v23, %v7134_v48 }
 0x397   : > { %v4515_v17 = vpop.eup %4514  ;;  %v3651_v33 = vxor.u32 2147483648, %v4513_v26  ;;  %v2107_v46 = vsel %vm2106_vm1, %v2105_v21, 0  ;;  %v1872_v27 = vsel %vm7127_vm11, 0, %v1870_v47  ;;  %v3506_v45 = vsel %vm3504_vm2, %v3505_v24, %v7135_v63 }
 0x398   : > { %v3648_v51 = vxor.u32 2147483648, %v4515_v17  ;;  %v1862_v2 = vor.u32 4788187, %v1861_v30  ;;  %v3507_v34 = vadd.s32 %v3506_v45, %v3502_v36  ;;  %v2109_v1 = vand.u32 31, %v2107_v46 }
 0x399   : > { %v3652_v13 = vsel %vm3650_vm0, %v3651_v33, %v4515_v17  ;;  %v7169_v41 = vadd.f32 %v6833_v38, %v6803_v7  ;;  %v1865_v25 = vcvt.s32.f32 %v1858_v37  ;;  %v2102_v62 = vand.u32 8388607, %v2095_v49 }
 0x39a   : > { %v3649_v28 = vsel %vm3647_vm15, %v4513_v26, %v3648_v51  ;;  %v1863_v9 = vand.u32 2147483647, %v1862_v2  ;;  %v1876_v6 = vadd.s32 3, %v1872_v27  ;;  %v3508_v57 = vadd.s32 536870912, %v3507_v34 }
 0x39b   : > { %v3653_v11 = vsel %vm3646_vm13, %v3649_v28, %v3652_v13  ;;  %v2110_v52 = vsub.s32 32, %v2109_v1  ;;  %v2112_v7 = vshll.u32 %v4609_v12, %v2109_v1  ;;  %v2115_v38 = vshll.u32 %v4610_v16, %v2109_v1 }
 0x39c   : > { %v3654_v35 = vsel %vm3643_vm14, nan, %v3653_v11  ;;  %v1866_v4 = vmul.f32 %v1865_v25, %v1863_v9  ;;  %v7182_v58 = vshrl.u32 %v3508_v57, 30  ;;  %v2118_v5 = vshll.u32 %v4611_v18, %v2109_v1 }
 0x39d   : > { %3892 = vst [vmem:[%s5083_s10 + $0xe8] sm:$0xff] %v3654_v35  ;;  %v2113_v54 = vshrl.u32 %v4610_v16, %v2110_v52  ;;  %v2116_v31 = vshrl.u32 %v4611_v18, %v2110_v52  ;;  %v2119_v19 = vshrl.u32 %v4612_v20, %v2110_v52  ;;  %v2121_v40 = vshll.u32 %v4612_v20, %v2109_v1 }
 0x39e   : > { %v1867_v42 = vxor.u32 2147483648, %v1866_v4  ;;  %v2122_v44 = vshrl.u32 %v4613_v22, %v2110_v52  ;;  %v3510_v63 = vshll.u32 %v7182_v58, 30  ;;  %v2108_v3 = vshrl.u32 %v2107_v46, 5 }
 0x39f   : > { %v2114_v60 = vor.u32 %v2113_v54, %v2112_v7  ;;  %v3762_v39 = vand.u32 2139095040, %v7156_v14  ;;  %v2117_v8 = vor.u32 %v2116_v31, %v2115_v38  ;;  %v2120_v10 = vor.u32 %v2119_v19, %v2118_v5 }
 0x3a0   : > { %v1868_v32 = vsel %vm1785_vm6, %v1867_v42, %v1866_v4  ;;  %v2123_v15 = vor.u32 %v2122_v44, %v2121_v40  ;;  %v7197_v61 = vsub.s32 %v3507_v34, %v3510_v63  ;;  %v2124_v21 = vshll.u32 %v4613_v22, %v2109_v1 }
 0x3a1   : > { %v1871_v59 = vsel %vm7127_vm11, %v6899_v43, %v1868_v32  ;;  %v2125_v47 = vshrl.u32 %v4614_v29, %v2110_v52  ;;  %v7201_v24 = vand.u32 3, %v1876_v6  ;;  %v2103_v26 = vor.u32 8388608, %v2102_v62 }
 0x3a2   : > { %4516 = vcosq.f32 %v1871_v59  ;;  %v3759_v37 = vand.u32 2147483647, %v7156_v14  ;;  %vm3449_vm3 = vcmp.lt.s32.totalorder %v6999_v53, 0  ;;  %v3513_v30 = vsub.s32 0, %v7197_v61 }
 0x3a3   : > { %4518 = vsinq.f32 %v1871_v59  ;;  %v2126_v17 = vor.u32 %v2125_v47, %v2124_v21  ;;  %v3763_v50 = vshrl.u32 %v3762_v39, 23  ;;  %v2111_v33 = vshrl.u32 %v4609_v12, %v2110_v52 }
 0x3a4   : > { %vm2127_vm4 = vcmp.lt.s32.totalorder %v2108_v3, 1  ;;  %vm2129_vm5 = vcmp.lt.s32.totalorder %v2108_v3, 3  ;;  %vm2130_vm6 = vcmp.lt.s32.totalorder %v2108_v3, 4  ;;  %v4124_v36 = vmin.u32 %v3513_v30, %v7197_v61 }
 0x3a5   : > { %v2132_v46 = vsel %vm2130_vm6, %v2120_v10, 2102212464  ;;  %v2135_v51 = vsel %vm2127_vm4, %v2114_v60, %v2117_v8  ;;  %v2136_v2 = vsel %vm2130_vm6, %v2123_v15, 920167782  ;;  %v2139_v45 = vsel %vm2127_vm4, %v2117_v8, %v2120_v10 }
 0x3a6   : > { %v2137_v27 = vsel %vm2129_vm5, %v2120_v10, %v2136_v2  ;;  %v2140_v13 = vsel %vm2130_vm6, %v2126_v17, 1326507024  ;;  %v2143_v34 = vshll.u32 %v2103_v26, 8  ;;  %vm7211_vm7 = vcmp.le.f32.partialorder %v3447_v0, 0.7853982 }
 0x3a7   : > { %v3515_v28 = vclz %v4124_v36  ;;  %vm2128_vm8 = vcmp.lt.s32.totalorder %v2108_v3, 2  ;;  %v2131_v9 = vsel %vm2127_vm4, %v2111_v33, %v2114_v60  ;;  %v2133_v25 = vsel %vm2129_vm5, %v2117_v8, %v2132_v46 }
 0x3a8   : > { %v3533_v62 = vsub.s32 4, %v7182_v58  ;;  %v2138_v11 = vsel %vm2128_vm8, %v2135_v51, %v2137_v27  ;;  %v2141_v6 = vsel %vm2129_vm5, %v2123_v15, %v2140_v13  ;;  %v4135_v57 = vadd.s32 4294967169, %v3763_v50 }
 0x3a9   : > { %vm1875_vm10 = vweird.f32 %v6899_v43  ;;  %v4125_v52 = vadd.s32 4294967294, %v3515_v28  ;;  %v2142_v35 = vsel %vm2128_vm8, %v2139_v45, %v2141_v6  ;;  %vm1878_vm9 = vcmp.lt.s32.totalorder %v7201_v24, 2 }
 0x3aa   : > { %v7219_v4 = vmul.u32.u64.low %v2143_v34, %v2138_v11  ;;  %v7220_v0 = vmul.u32.u64.high %v2143_v34, %v2138_v11, %v7219_v4  ;;  %v2134_v7 = vsel %vm2128_vm8, %v2131_v9, %v2133_v25  ;;  %vm1879_vm11 = vcmp.eq.s32.totalorder %v7201_v24, 0 }
 0x3ab   : > { %v7224_v38 = vmul.u32.u64.low %v2143_v34, %v2142_v35  ;;  %v7225_v54 = vmul.u32.u64.high %v2143_v34, %v2142_v35, %v7224_v38  ;;  %vm1882_vm12 = vcmp.eq.s32.totalorder %v7201_v24, 2  ;;  %vm4126_vm13 = vcmp.lt.s32.totalorder %v4125_v52, 0 }
 0x3ac   : > { %v3769_v31 = vadd.s32 1, %v4135_v57  ;;  %v4517_v5 = vpop.eup %4516  ;;  %v3503_v42 = vadd.s32 %v7134_v48, %v7146_v23  ;;  %v3518_v19 = vsel %vm4126_vm13, 0, %v4125_v52  ;;  %v3534_v40 = vsel %vm3449_vm3, %v3533_v62, %v7182_v58 }
 0x3ad   : > { %v3766_v44 = vand.u32 8388607, %v3759_v37  ;;  %v4519_v63 = vpop.eup %4518  ;;  %v1883_v3 = vxor.u32 2147483648, %v4517_v5  ;;  %v3519_v60 = vsub.s32 32, %v3518_v19  ;;  %v3523_v39 = vsub.s32 4294967266, %v3518_v19 }
 0x3ae   : > { %v2150_v32 = vmul.u32 %v2143_v34, %v2134_v7  ;;  %v1880_v8 = vxor.u32 2147483648, %v4519_v63  ;;  %v3520_v10 = vshll.u32 %v7197_v61, %v3518_v19  ;;  %vm2152_vm14 = vc.u32 %v7225_v54, %v7219_v4 }
 0x3af   : > { %v2153_v48 = vadd.s32 1, %v7220_v0  ;;  %v1884_v23 = vsel %vm1882_vm12, %v1883_v3, %v4519_v63  ;;  %v3521_v58 = vshrl.u32 %v3503_v42, %v3519_v60  ;;  %v3524_v15 = vadd.s32 127, %v3523_v39 }
 0x3b0   : > { %vm3770_vm15 = vcmp.gt.s32.totalorder %v3769_v31, 0  ;;  %v1881_v59 = vsel %vm1879_vm11, %v4517_v5, %v1880_v8  ;;  %v3536_v21 = vsel %vm7211_vm7, 0, %v3534_v40  ;;  %v3767_v27 = vor.u32 8388608, %v3766_v44 }
 0x3b1   : > { %v2154_v61 = vsel %vm2152_vm14, %v2153_v48, %v7220_v0  ;;  %v3771_v47 = vsel %vm3770_vm15, %v3769_v31, 0  ;;  %v1885_v26 = vsel %vm1878_vm9, %v1881_v59, %v1884_v23  ;;  %v3522_v30 = vor.u32 %v3521_v58, %v3520_v10 }
 0x3b2   : > { %v3525_v17 = vshll.u32 %v3524_v15, 23  ;;  %v2155_v50 = vadd.s32 %v2154_v61, %v2150_v32  ;;  %v1886_v33 = vsel %vm1875_vm10, nan, %v1885_v26  ;;  %v3773_v36 = vand.u32 31, %v3771_v47 }
 0x3b3   : > { %3875 = vst [vmem:[%s5083_s10 + $0x60] sm:$0xff] %v1886_v33  ;;  %v3540_v2 = vadd.s32 3, %v3536_v21  ;;  %v3529_v34 = vcvt.s32.f32 %v3522_v30  ;;  %v1994_v24 = vand.u32 2139095040, %v7169_v41  ;;  %v3772_v9 = vshrl.u32 %v3771_v47, 5 }
 0x3b4   : > { %v3526_v46 = vor.u32 4788187, %v3525_v17  ;;  %v2156_v51 = vadd.s32 536870912, %v2155_v50  ;;  %v3774_v45 = vsub.s32 32, %v3773_v36  ;;  %v3782_v57 = vshll.u32 %v4611_v18, %v3773_v36 }
 0x3b5   : > { %v3776_v35 = vshll.u32 %v4609_v12, %v3773_v36  ;;  %v3779_v0 = vshll.u32 %v4610_v16, %v3773_v36  ;;  %v3785_v7 = vshll.u32 %v4612_v20, %v3773_v36  ;;  %v7265_v5 = vand.u32 3, %v3540_v2 }
 0x3b6   : > { %v3527_v13 = vand.u32 2147483647, %v3526_v46  ;;  %v7252_v28 = vshrl.u32 %v2156_v51, 30  ;;  %v3777_v25 = vshrl.u32 %v4610_v16, %v3774_v45  ;;  %v3780_v62 = vshrl.u32 %v4611_v18, %v3774_v45 }
 0x3b7   : > { %v3783_v43 = vshrl.u32 %v4612_v20, %v3774_v45  ;;  %v3786_v52 = vshrl.u32 %v4613_v22, %v3774_v45  ;;  %v3789_v38 = vshrl.u32 %v4614_v29, %v3774_v45  ;;  %v3788_v3 = vshll.u32 %v4613_v22, %v3773_v36 }
 0x3b8   : > { %v3530_v11 = vmul.f32 %v3529_v34, %v3527_v13  ;;  %v2158_v6 = vshll.u32 %v7252_v28, 30  ;;  %v3778_v40 = vor.u32 %v3777_v25, %v3776_v35  ;;  %v3781_v44 = vor.u32 %v3780_v62, %v3779_v0 }
 0x3b9   : > { %v3784_v19 = vor.u32 %v3783_v43, %v3782_v57  ;;  %v3787_v63 = vor.u32 %v3786_v52, %v3785_v7  ;;  %v3807_v32 = vshll.u32 %v3767_v27, 8  ;;  %v1995_v8 = vshrl.u32 %v1994_v24, 23 }
 0x3ba   : > { %v3531_v31 = vxor.u32 2147483648, %v3530_v11  ;;  %v7267_v42 = vsub.s32 %v2155_v50, %v2158_v6  ;;  %v3775_v48 = vshrl.u32 %v4609_v12, %v3774_v45  ;;  %v3790_v23 = vor.u32 %v3789_v38, %v3788_v3 }
 0x3bb   : > { %vm3794_vm0 = vcmp.lt.s32.totalorder %v3772_v9, 4  ;;  %vm3791_vm1 = vcmp.lt.s32.totalorder %v3772_v9, 1  ;;  %vm3793_vm2 = vcmp.lt.s32.totalorder %v3772_v9, 3  ;;  %v4067_v50 = vadd.s32 4294967169, %v1995_v8 }
 0x3bc   : > { %v3532_v60 = vsel %vm3449_vm3, %v3531_v31, %v3530_v11  ;;  %v2161_v39 = vsub.s32 0, %v7267_v42  ;;  %v3796_v15 = vsel %vm3794_vm0, %v3784_v19, 2102212464  ;;  %v3799_v59 = vsel %vm3791_vm1, %v3778_v40, %v3781_v44 }
 0x3bd   : > { %v3535_v10 = vsel %vm7211_vm7, %v6999_v53, %v3532_v60  ;;  %v3800_v21 = vsel %vm3794_vm0, %v3787_v63, 920167782  ;;  %v3795_v47 = vsel %vm3791_vm1, %v3775_v48, %v3778_v40  ;;  %v3797_v26 = vsel %vm3793_vm2, %v3781_v44, %v3796_v15 }
 0x3be   : > { %4520 = vcosq.f32 %v3535_v10  ;;  %v4072_v58 = vmin.u32 %v2161_v39, %v7267_v42  ;;  %v3803_v30 = vsel %vm3791_vm1, %v3781_v44, %v3784_v19  ;;  %vm3792_vm3 = vcmp.lt.s32.totalorder %v3772_v9, 2 }
 0x3bf   : > { %4522 = vsinq.f32 %v3535_v10  ;;  %v3801_v1 = vsel %vm3793_vm2, %v3784_v19, %v3800_v21  ;;  %v3804_v17 = vsel %vm3794_vm0, %v3790_v23, 1326507024  ;;  %v1991_v51 = vand.u32 2147483647, %v7169_v41 }
 0x3c0   : > { %v2163_v61 = vclz %v4072_v58  ;;  %v3802_v36 = vsel %vm3792_vm3, %v3799_v59, %v3801_v1  ;;  %v3805_v46 = vsel %vm3793_vm2, %v3787_v63, %v3804_v17  ;;  %v3798_v2 = vsel %vm3792_vm3, %v3795_v47, %v3797_v26 }
 0x3c1   : > { %v3806_v27 = vsel %vm3792_vm3, %v3803_v30, %v3805_v46  ;;  %v7279_v45 = vmul.u32.u64.low %v3807_v32, %v3802_v36  ;;  %v7280_v13 = vmul.u32.u64.high %v3807_v32, %v3802_v36, %v7279_v45  ;;  %v2001_v25 = vadd.s32 1, %v4067_v50 }
 0x3c2   : > { %v4073_v33 = vadd.s32 4294967294, %v2163_v61  ;;  %v7283_v34 = vmul.u32.u64.low %v3807_v32, %v3806_v27  ;;  %v7284_v24 = vmul.u32.u64.high %v3807_v32, %v3806_v27, %v7283_v34  ;;  %vm3546_vm5 = vcmp.eq.s32.totalorder %v7265_v5, 2 }
 0x3c3   : > { %vm2097_vm6 = vcmp.lt.s32.totalorder %v7101_v56, 0  ;;  %v2181_v62 = vsub.s32 4, %v7252_v28  ;;  %v2151_v43 = vadd.s32 %v7219_v4, %v7225_v54  ;;  %vm2002_vm7 = vcmp.gt.s32.totalorder %v2001_v25, 0 }
 0x3c4   : > { %vm4074_vm4 = vcmp.lt.s32.totalorder %v4073_v33, 0  ;;  %v3814_v57 = vmul.u32 %v3807_v32, %v3798_v2  ;;  %v3817_v52 = vadd.s32 1, %v7280_v13  ;;  %v1998_v35 = vand.u32 8388607, %v1991_v51 }
 0x3c5   : > { %v2166_v9 = vsel %vm4074_vm4, 0, %v4073_v33  ;;  %v2003_v0 = vsel %vm2002_vm7, %v2001_v25, 0  ;;  %vm3816_vm8 = vc.u32 %v7284_v24, %v7279_v45  ;;  %v2182_v54 = vsel %vm2097_vm6, %v2181_v62, %v7252_v28 }
 0x3c6   : > { %v2167_v11 = vsub.s32 32, %v2166_v9  ;;  %v2171_v6 = vsub.s32 4294967266, %v2166_v9  ;;  %v2168_v38 = vshll.u32 %v7267_v42, %v2166_v9  ;;  %v3818_v44 = vsel %vm3816_vm8, %v3817_v52, %v7280_v13  ;;  %v4544_v9 = vld [vmem:[%s7488_s2] ss:$0 sm:$0xff] }
 0x3c7   : > { %v2005_v63 = vand.u32 31, %v2003_v0  ;;  %v3819_v32 = vadd.s32 %v3818_v44, %v3814_v57  ;;  %vm3543_vm10 = vcmp.eq.s32.totalorder %v7265_v5, 0  ;;  %vm7306_vm9 = vcmp.le.f32.partialorder %v2095_v49, 0.7853982 }
 0x3c8   : > { %v4521_v7 = vpop.eup %4520  ;;  %v2169_v31 = vshrl.u32 %v2151_v43, %v2167_v11  ;;  %v2172_v19 = vadd.s32 127, %v2171_v6  ;;  %vm3542_vm11 = vcmp.lt.s32.totalorder %v7265_v5, 2  ;;  %vm3539_vm12 = vweird.f32 %v6999_v53 }
 0x3c9   : > { %v4523_v40 = vpop.eup %4522  ;;  %v3547_v4 = vxor.u32 2147483648, %v4521_v7  ;;  %v2006_v28 = vsub.s32 32, %v2005_v63  ;;  %v3820_v23 = vadd.s32 536870912, %v3819_v32  ;;  %v2184_v15 = vsel %vm7306_vm9, 0, %v2182_v54 }
 0x3ca   : > { %v3544_v3 = vxor.u32 2147483648, %v4523_v40  ;;  %v2170_v60 = vor.u32 %v2169_v31, %v2168_v38  ;;  %v2173_v39 = vshll.u32 %v2172_v19, 23  ;;  %v1999_v59 = vor.u32 8388608, %v1998_v35 }
 0x3cb   : > { %v3548_v42 = vsel %vm3546_vm5, %v3547_v4, %v4523_v40  ;;  %v7314_v49 = vshrl.u32 %v3820_v23, 30  ;;  %v2004_v26 = vshrl.u32 %v2003_v0, 5  ;;  %v2009_v30 = vshrl.u32 %v4610_v16, %v2006_v28 }
 0x3cc   : > { %v3545_v10 = vsel %vm3543_vm10, %v4521_v7, %v3544_v3  ;;  %v2174_v48 = vor.u32 4788187, %v2173_v39  ;;  %v2177_v47 = vcvt.s32.f32 %v2170_v60  ;;  %v2012_v5 = vshrl.u32 %v4611_v18, %v2006_v28 }
 0x3cd   : > { %v3549_v58 = vsel %vm3542_vm11, %v3545_v10, %v3548_v42  ;;  %v2015_v1 = vshrl.u32 %v4612_v20, %v2006_v28  ;;  %v3822_v53 = vshll.u32 %v7314_v49, 30  ;;  %v2014_v50 = vshll.u32 %v4611_v18, %v2005_v63 }
 0x3ce   : > { %v3550_v21 = vsel %vm3539_vm12, nan, %v3549_v58  ;;  %v2175_v61 = vand.u32 2147483647, %v2174_v48  ;;  %v2018_v33 = vshrl.u32 %v4613_v22, %v2006_v28  ;;  %v2008_v36 = vshll.u32 %v4609_v12, %v2005_v63 }
 0x3cf   : > { %3891 = vst [vmem:[%s5083_s10 + $0xe0] sm:$0xff] %v3550_v21  ;;  %v2011_v46 = vshll.u32 %v4610_v16, %v2005_v63  ;;  %v2017_v2 = vshll.u32 %v4612_v20, %v2005_v63  ;;  %v2021_v27 = vshrl.u32 %v4614_v29, %v2006_v28  ;;  %v7327_v34 = vsub.s32 %v3819_v32, %v3822_v53 }
 0x3d0   : > { %v2178_v17 = vmul.f32 %v2177_v47, %v2175_v61  ;;  %v2016_v25 = vor.u32 %v2015_v1, %v2014_v50  ;;  %v7333_v62 = vadd.f32 %v4544_v9, %v6879_v55  ;;  %v2010_v43 = vor.u32 %v2009_v30, %v2008_v36 }
 0x3d1   : > { %v2013_v11 = vor.u32 %v2012_v5, %v2011_v46  ;;  %v2019_v6 = vor.u32 %v2018_v33, %v2017_v2  ;;  %v2020_v57 = vshll.u32 %v4613_v22, %v2005_v63  ;;  %v2188_v35 = vadd.s32 3, %v2184_v15 }
 0x3d2   : > { %v2179_v13 = vxor.u32 2147483648, %v2178_v17  ;;  %v3825_v0 = vsub.s32 0, %v7327_v34  ;;  %v2039_v7 = vshll.u32 %v1999_v59, 8  ;;  %v2007_v31 = vshrl.u32 %v4609_v12, %v2006_v28 }
 0x3d3   : > { %v2022_v55 = vor.u32 %v2021_v27, %v2020_v57  ;;  %vm2026_vm13 = vcmp.lt.s32.totalorder %v2004_v26, 4  ;;  %vm2023_vm14 = vcmp.lt.s32.totalorder %v2004_v26, 1  ;;  %vm2024_vm15 = vcmp.lt.s32.totalorder %v2004_v26, 2 }
 0x3d4   : > { %v2180_v52 = vsel %vm2097_vm6, %v2179_v13, %v2178_v17  ;;  %v4136_v19 = vmin.u32 %v3825_v0, %v7327_v34  ;;  %v2028_v40 = vsel %vm2026_vm13, %v2016_v25, 2102212464  ;;  %v2031_v4 = vsel %vm2023_vm14, %v2010_v43, %v2013_v11 }
 0x3d5   : > { %v2183_v38 = vsel %vm7306_vm9, %v7101_v56, %v2180_v52  ;;  %v2032_v54 = vsel %vm2026_vm13, %v2019_v6, 920167782  ;;  %vm2025_vm0 = vcmp.lt.s32.totalorder %v2004_v26, 3  ;;  %v2027_v63 = vsel %vm2023_vm14, %v2007_v31, %v2010_v43 }
 0x3d6   : > { %4524 = vcosq.f32 %v2183_v38  ;;  %v3827_v44 = vclz %v4136_v19  ;;  %v2035_v3 = vsel %vm2023_vm14, %v2013_v11, %v2016_v25  ;;  %v2029_v60 = vsel %vm2025_vm0, %v2013_v11, %v2028_v40 }
 0x3d7   : > { %4526 = vsinq.f32 %v2183_v38  ;;  %v2033_v39 = vsel %vm2025_vm0, %v2016_v25, %v2032_v54  ;;  %v2036_v32 = vsel %vm2026_vm13, %v2022_v55, 1326507024  ;;  %v3658_v42 = vand.u32 2139095040, %v7333_v62 }
 0x3d8   : > { %v2189_v8 = vand.u32 3, %v2188_v35  ;;  %v4137_v28 = vadd.s32 4294967294, %v3827_v44  ;;  %v2034_v10 = vsel %vm2024_vm15, %v2031_v4, %v2033_v39  ;;  %v2037_v48 = vsel %vm2025_vm0, %v2019_v6, %v2036_v32 }
 0x3d9   : > { %v2038_v23 = vsel %vm2024_vm15, %v2035_v3, %v2037_v48  ;;  %v7347_v58 = vmul.u32.u64.low %v2039_v7, %v2034_v10  ;;  %v7348_v15 = vmul.u32.u64.high %v2039_v7, %v2034_v10, %v7347_v58  ;;  %v3659_v59 = vshrl.u32 %v3658_v42, 23 }
 0x3da   : > { %vm4138_vm1 = vcmp.lt.s32.totalorder %v4137_v28, 0  ;;  %v2030_v21 = vsel %vm2024_vm15, %v2027_v63, %v2029_v60  ;;  %v7352_v61 = vmul.u32.u64.low %v2039_v7, %v2038_v23  ;;  %v7353_v47 = vmul.u32.u64.high %v2039_v7, %v2038_v23, %v7352_v61 }
 0x3db   : > { %v3830_v30 = vsel %vm4138_vm1, 0, %v4137_v28  ;;  %v4131_v5 = vadd.s32 4294967169, %v3659_v59  ;;  %vm3761_vm2 = vcmp.lt.s32.totalorder %v7156_v14, 0  ;;  %v3815_v1 = vadd.s32 %v7279_v45, %v7284_v24 }
 0x3dc   : > { %v3831_v17 = vsub.s32 32, %v3830_v30  ;;  %v3835_v53 = vsub.s32 4294967266, %v3830_v30  ;;  %vm2194_vm3 = vcmp.eq.s32.totalorder %v2189_v8, 2  ;;  %v2046_v50 = vmul.u32 %v2039_v7, %v2030_v21 }
 0x3dd   : > { %v2049_v33 = vadd.s32 1, %v7348_v15  ;;  %v3665_v36 = vadd.s32 1, %v4131_v5  ;;  %v3832_v26 = vshll.u32 %v7327_v34, %v3830_v30  ;;  %vm2048_vm4 = vc.u32 %v7353_v47, %v7347_v58 }
 0x3de   : > { %v3833_v2 = vshrl.u32 %v3815_v1, %v3831_v17  ;;  %v3836_v27 = vadd.s32 127, %v3835_v53  ;;  %v3845_v9 = vsub.s32 4, %v7314_v49  ;;  %vm2191_vm6 = vcmp.eq.s32.totalorder %v2189_v8, 0 }
 0x3df   : > { %v2050_v45 = vsel %vm2048_vm4, %v2049_v33, %v7348_v15  ;;  %vm3666_vm5 = vcmp.gt.s32.totalorder %v3665_v36, 0  ;;  %v3655_v57 = vand.u32 2147483647, %v7333_v62  ;;  %vm2190_vm7 = vcmp.lt.s32.totalorder %v2189_v8, 2 }
 0x3e0   : > { %v4525_v46 = vpop.eup %4524  ;;  %v3834_v43 = vor.u32 %v3833_v2, %v3832_v26  ;;  %v3837_v11 = vshll.u32 %v3836_v27, 23  ;;  %v2051_v6 = vadd.s32 %v2050_v45, %v2046_v50  ;;  %v3667_v52 = vsel %vm3666_vm5, %v3665_v36, 0 }
 0x3e1   : > { %v4527_v13 = vpop.eup %4526  ;;  %v2195_v25 = vxor.u32 2147483648, %v4525_v46  ;;  %vm2187_vm8 = vweird.f32 %v7101_v56  ;;  %v3846_v31 = vsel %vm3761_vm2, %v3845_v9, %v7314_v49  ;;  %v3669_v55 = vand.u32 31, %v3667_v52 }
 0x3e2   : > { %v2192_v24 = vxor.u32 2147483648, %v4527_v13  ;;  %v3838_v0 = vor.u32 4788187, %v3837_v11  ;;  %v2052_v7 = vadd.s32 536870912, %v2051_v6  ;;  %v3841_v4 = vcvt.s32.f32 %v3834_v43 }
 0x3e3   : > { %v2196_v34 = vsel %vm2194_vm3, %v2195_v25, %v4527_v13  ;;  %vm7375_vm10 = vcmp.le.f32.partialorder %v3759_v37, 0.7853982  ;;  %v3662_v56 = vand.u32 8388607, %v3655_v57  ;;  %v3670_v63 = vsub.s32 32, %v3669_v55 }
 0x3e4   : > { %v2193_v35 = vsel %vm2191_vm6, %v4525_v46, %v2192_v24  ;;  %v3839_v40 = vand.u32 2147483647, %v3838_v0  ;;  %v7370_v54 = vshrl.u32 %v2052_v7, 30  ;;  %v3848_v49 = vsel %vm7375_vm10, 0, %v3846_v31 }
 0x3e5   : > { %v2197_v38 = vsel %vm2190_vm7, %v2193_v35, %v2196_v34  ;;  %v3672_v39 = vshll.u32 %v4609_v12, %v3669_v55  ;;  %v3673_v32 = vshrl.u32 %v4610_v16, %v3670_v63  ;;  %v3675_v42 = vshll.u32 %v4610_v16, %v3669_v55 }
 0x3e6   : > { %v2198_v19 = vsel %vm2187_vm8, nan, %v2197_v38  ;;  %v3842_v3 = vmul.f32 %v3841_v4, %v3839_v40  ;;  %v2054_v60 = vshll.u32 %v7370_v54, 30  ;;  %v3676_v37 = vshrl.u32 %v4611_v18, %v3670_v63 }
 0x3e7   : > { %3878 = vst [vmem:[%s5083_s10 + $0x78] sm:$0xff] %v2198_v19  ;;  %v3679_v8 = vshrl.u32 %v4612_v20, %v3670_v63  ;;  %v3678_v48 = vshll.u32 %v4611_v18, %v3669_v55  ;;  %v3682_v23 = vshrl.u32 %v4613_v22, %v3670_v63  ;;  %v3663_v15 = vor.u32 8388608, %v3662_v56 }
 0x3e8   : > { %v3843_v28 = vxor.u32 2147483648, %v3842_v3  ;;  %v2055_v10 = vsub.s32 %v2051_v6, %v2054_v60  ;;  %v3668_v59 = vshrl.u32 %v3667_v52, 5  ;;  %v3674_v21 = vor.u32 %v3673_v32, %v3672_v39 }
 0x3e9   : > { %v3681_v61 = vshll.u32 %v4612_v20, %v3669_v55  ;;  %v3677_v16 = vor.u32 %v3676_v37, %v3675_v42  ;;  %v3680_v1 = vor.u32 %v3679_v8, %v3678_v48  ;;  %v3684_v18 = vshll.u32 %v4613_v22, %v3669_v55 }
 0x3ea   : > { %v3844_v30 = vsel %vm3761_vm2, %v3843_v28, %v3842_v3  ;;  %v2057_v5 = vsub.s32 0, %v2055_v10  ;;  %v3685_v50 = vshrl.u32 %v4614_v29, %v3670_v63  ;;  %v3852_v36 = vadd.s32 3, %v3848_v49 }
 0x3eb   : > { %v3847_v17 = vsel %vm7375_vm10, %v7156_v14, %v3844_v30  ;;  %v3683_v53 = vor.u32 %v3682_v23, %v3681_v61  ;;  %v3703_v46 = vshll.u32 %v3663_v15, 8  ;;  %v3671_v2 = vshrl.u32 %v4609_v12, %v3670_v63 }
 0x3ec   : > { %4528 = vcosq.f32 %v3847_v17  ;;  %v4068_v33 = vmin.u32 %v2057_v5, %v2055_v10  ;;  %v3686_v20 = vor.u32 %v3685_v50, %v3684_v18  ;;  %vm3687_vm9 = vcmp.lt.s32.totalorder %v3668_v59, 1 }
 0x3ed   : > { %4530 = vsinq.f32 %v3847_v17  ;;  %vm3690_vm11 = vcmp.lt.s32.totalorder %v3668_v59, 4  ;;  %vm3689_vm12 = vcmp.lt.s32.totalorder %v3668_v59, 3  ;;  %v3695_v13 = vsel %vm3687_vm9, %v3674_v21, %v3677_v16 }
 0x3ee   : > { %v2059_v26 = vclz %v4068_v33  ;;  %v3692_v27 = vsel %vm3690_vm11, %v3680_v1, 2102212464  ;;  %v3696_v25 = vsel %vm3690_vm11, %v3683_v53, 920167782  ;;  %vm3688_vm13 = vcmp.lt.s32.totalorder %v3668_v59, 2 }
 0x3ef   : > { %v3697_v22 = vsel %vm3689_vm12, %v3680_v1, %v3696_v25  ;;  %v3699_v45 = vsel %vm3687_vm9, %v3677_v16, %v3680_v1  ;;  %v3691_v29 = vsel %vm3687_vm9, %v3671_v2, %v3674_v21  ;;  %v3693_v24 = vsel %vm3689_vm12, %v3677_v16, %v3692_v27 }
 0x3f0   : > { %v4069_v9 = vadd.s32 4294967294, %v2059_v26  ;;  %v3698_v43 = vsel %vm3688_vm13, %v3695_v13, %v3697_v22  ;;  %v3700_v11 = vsel %vm3690_vm11, %v3686_v20, 1326507024  ;;  %v3853_v0 = vand.u32 3, %v3852_v36 }
 0x3f1   : > { %v3701_v6 = vsel %vm3689_vm12, %v3683_v53, %v3700_v11  ;;  %v7401_v34 = vmul.u32.u64.low %v3703_v46, %v3698_v43  ;;  %v7402_v52 = vmul.u32.u64.high %v3703_v46, %v3698_v43, %v7401_v34  ;;  %v2047_v7 = vadd.s32 %v7347_v58, %v7353_v47 }
 0x3f2   : > { %vm4070_vm14 = vcmp.lt.s32.totalorder %v4069_v9, 0  ;;  %v3702_v35 = vsel %vm3688_vm13, %v3699_v45, %v3701_v6  ;;  %v3694_v55 = vsel %vm3688_vm13, %v3691_v29, %v3693_v24  ;;  %vm3858_vm15 = vcmp.eq.s32.totalorder %v3853_v0, 2 }
 0x3f3   : > { %v2062_v12 = vsel %vm4070_vm14, 0, %v4069_v9  ;;  %v7409_v19 = vmul.u32.u64.low %v3703_v46, %v3702_v35  ;;  %v7410_v40 = vmul.u32.u64.high %v3703_v46, %v3702_v35, %v7409_v19  ;;  %v3713_v3 = vadd.s32 1, %v7402_v52 }
 0x3f4   : > { %v2063_v38 = vsub.s32 32, %v2062_v12  ;;  %v2067_v31 = vsub.s32 4294967266, %v2062_v12  ;;  %v2064_v44 = vshll.u32 %v2055_v10, %v2062_v12  ;;  %vm3855_vm0 = vcmp.eq.s32.totalorder %v3853_v0, 0 }
 0x3f5   : > { %v3710_v42 = vmul.u32 %v3703_v46, %v3694_v55  ;;  %vm3712_vm1 = vc.u32 %v7410_v40, %v7401_v34  ;;  %vm3854_vm2 = vcmp.lt.s32.totalorder %v3853_v0, 2  ;;  %vm3851_vm3 = vweird.f32 %v7156_v14 }
 0x3f6   : > { %v4529_v4 = vpop.eup %4528  ;;  %v2065_v56 = vshrl.u32 %v2047_v7, %v2063_v38  ;;  %v2068_v63 = vadd.s32 127, %v2067_v31  ;;  %v3714_v28 = vsel %vm3712_vm1, %v3713_v3, %v7402_v52  ;;  %v2077_v30 = vsub.s32 4, %v7370_v54 }
 0x3f7   : > { %v4531_v49 = vpop.eup %4530  ;;  %v3859_v60 = vxor.u32 2147483648, %v4529_v4  ;;  %v3715_v48 = vadd.s32 %v3714_v28, %v3710_v42  ;;  %vm1993_vm4 = vcmp.lt.s32.totalorder %v7169_v41, 0  ;;  %vm1992_vm5 = vcmp.le.f32.partialorder %v1991_v51, 0.7853982 }
 0x3f8   : > { %v3856_v39 = vxor.u32 2147483648, %v4531_v49  ;;  %v2066_v32 = vor.u32 %v2065_v56, %v2064_v44  ;;  %v2069_v58 = vshll.u32 %v2068_v63, 23  ;;  %v2078_v14 = vsel %vm1993_vm4, %v2077_v30, %v7370_v54 }
 0x3f9   : > { %v3860_v47 = vsel %vm3858_vm15, %v3859_v60, %v4531_v49  ;;  %v3716_v21 = vadd.s32 536870912, %v3715_v48  ;;  %v2080_v50 = vsel %vm1992_vm5, 0, %v2078_v14  ;;  %v3711_v54 = vadd.s32 %v7401_v34, %v7410_v40 }
 0x3fa   : > { %v3857_v37 = vsel %vm3855_vm0, %v4529_v4, %v3856_v39  ;;  %v2070_v8 = vor.u32 4788187, %v2069_v58  ;;  %v2073_v59 = vcvt.s32.f32 %v2066_v32  ;;  %v2084_v20 = vadd.s32 3, %v2080_v50 }
 0x3fb   : > { %v3861_v10 = vsel %vm3854_vm2, %v3857_v37, %v3860_v47  ;;  %v3717_v5 = vshrl.u32 %v3716_v21, 30  ;;  %vm2083_vm9 = vweird.f32 %v7169_v41  ;;  %vm3657_vm11 = vcmp.lt.s32.totalorder %v7333_v62, 0 }
 0x3fc   : > { %v3862_v23 = vsel %vm3851_vm3, nan, %v3861_v10  ;;  %v2071_v15 = vand.u32 2147483647, %v2070_v8  ;;  %v2085_v2 = vand.u32 3, %v2084_v20  ;;  %vm3656_vm12 = vcmp.le.f32.partialorder %v3655_v57, 0.7853982 }
 0x3fd   : > { %3894 = vst [vmem:[%s5083_s10 + $0xf8] sm:$0xff] %v3862_v23  ;;  %v3718_v1 = vshll.u32 %v3717_v5, 30  ;;  %v3741_v55 = vsub.s32 4, %v3717_v5  ;;  %vm3747_vm0 = vweird.f32 %v7333_v62 }
 0x3fe   : > { %v2074_v61 = vmul.f32 %v2073_v59, %v2071_v15  ;;  %vm2087_vm7 = vcmp.eq.s32.totalorder %v2085_v2, 0  ;;  %vm2090_vm8 = vcmp.eq.s32.totalorder %v2085_v2, 2  ;;  %vm2086_vm10 = vcmp.lt.s32.totalorder %v2085_v2, 2 }
 0x3ff   : > { %v3719_v18 = vsub.s32 %v3715_v48, %v3718_v1 }
 0x400   : > { %v2075_v16 = vxor.u32 2147483648, %v2074_v61 }
 0x401   : > { %v3721_v33 = vsub.s32 0, %v3719_v18 }
 0x402   : > { %v2076_v17 = vsel %vm1993_vm4, %v2075_v16, %v2074_v61 }
 0x403   : > { %v2079_v53 = vsel %vm1992_vm5, %v7169_v41, %v2076_v17  ;;  %v4132_v36 = vmin.u32 %v3721_v33, %v3719_v18  ;;  %v3742_v41 = vsel %vm3657_vm11, %v3741_v55, %v3717_v5 }
 0x404   : > { %4532 = vcosq.f32 %v2079_v53  ;;  %v3744_v44 = vsel %vm3656_vm12, 0, %v3742_v41 }
 0x405   : > { %4534 = vsinq.f32 %v2079_v53  ;;  %v3723_v46 = vclz %v4132_v36  ;;  %v3748_v56 = vadd.s32 3, %v3744_v44 }
 0x407   : > { %v4133_v26 = vadd.s32 4294967294, %v3723_v46  ;;  %v3749_v63 = vand.u32 3, %v3748_v56 }
 0x409   : > { %vm4134_vm6 = vcmp.lt.s32.totalorder %v4133_v26, 0  ;;  %vm3754_vm13 = vcmp.eq.s32.totalorder %v3749_v63, 2  ;;  %vm3751_vm14 = vcmp.eq.s32.totalorder %v3749_v63, 0  ;;  %vm3750_vm15 = vcmp.lt.s32.totalorder %v3749_v63, 2 }
 0x40a   : > { %v3726_v13 = vsel %vm4134_vm6, 0, %v4133_v26 }
 0x40b   : > { %v3727_v9 = vsub.s32 32, %v3726_v13  ;;  %v3731_v22 = vsub.s32 4294967266, %v3726_v13  ;;  %v3728_v24 = vshll.u32 %v3719_v18, %v3726_v13 }
 0x40d   : > { %v3729_v43 = vshrl.u32 %v3711_v54, %v3727_v9  ;;  %v3732_v11 = vadd.s32 127, %v3731_v22 }
 0x40e   : > { %v4533_v27 = vpop.eup %4532 }
 0x40f   : > { %v4535_v25 = vpop.eup %4534  ;;  %v2091_v51 = vxor.u32 2147483648, %v4533_v27  ;;  %v3730_v12 = vor.u32 %v3729_v43, %v3728_v24  ;;  %v3733_v35 = vshll.u32 %v3732_v11, 23 }
 0x410   : > { %v2088_v45 = vxor.u32 2147483648, %v4535_v25 }
 0x411   : > { %v2092_v29 = vsel %vm2090_vm8, %v2091_v51, %v4535_v25  ;;  %v3734_v34 = vor.u32 4788187, %v3733_v35  ;;  %v3737_v38 = vcvt.s32.f32 %v3730_v12 }
 0x412   : > { %v2089_v6 = vsel %vm2087_vm7, %v4533_v27, %v2088_v45 }
 0x413   : > { %v2093_v52 = vsel %vm2086_vm10, %v2089_v6, %v2092_v29  ;;  %v3735_v7 = vand.u32 2147483647, %v3734_v34 }
 0x414   : > { %v2094_v0 = vsel %vm2083_vm9, nan, %v2093_v52 }
 0x415   : > { %3877 = vst [vmem:[%s5083_s10 + $0x70] sm:$0xff] %v2094_v0  ;;  %v3738_v31 = vmul.f32 %v3737_v38, %v3735_v7 }
 0x417   : > { %v3739_v19 = vxor.u32 2147483648, %v3738_v31 }
 0x419   : > { %v3740_v40 = vsel %vm3657_vm11, %v3739_v19, %v3738_v31 }
 0x41a   : > { %v3743_v4 = vsel %vm3656_vm12, %v7333_v62, %v3740_v40 }
 0x41b   : > { %4536 = vcosq.f32 %v3743_v4 }
 0x41c   : > { %4538 = vsinq.f32 %v3743_v4 }
 0x425   : > { %v4537_v3 = vpop.eup %4536 }
 0x426   : > { %v4539_v49 = vpop.eup %4538  ;;  %v3755_v60 = vxor.u32 2147483648, %v4537_v3 }
 0x427   : > { %v3752_v39 = vxor.u32 2147483648, %v4539_v49 }
 0x428   : > { %v3756_v57 = vsel %vm3754_vm13, %v3755_v60, %v4539_v49 }
 0x429   : > { %v3753_v32 = vsel %vm3751_vm14, %v4537_v3, %v3752_v39 }
 0x42a   : > { %v3757_v58 = vsel %vm3750_vm15, %v3753_v32, %v3756_v57 }
 0x42b   : > { %v3758_v47 = vsel %vm3747_vm0, nan, %v3757_v58 }
 0x42c   : > { %3893 = vst [vmem:[%s5083_s10 + $0xf0] sm:$0xff] %v3758_v47 }
 0x42d   : > { %4558 = shalt.err (!%p4555_p3)
}
 0x42e   : > { %s4559_s8 = scalar_lea.hbm %s7437_s7, 4096  ;;  %s4563_s24 = scalar_lea.hbm %s7489_s3, 8192 }
 0x42f   : > { %p4560_p4 = scmp.ne.s32.totalorder %s7437_s7, %s4559_s8  ;;  %p4564_p9 = scmp.lt.u32.totalorder %s7437_s7, %s7489_s3 }
 0x430   : > { %p4565_p10 = scmp.lt.u32.totalorder %s4563_s24, %s4559_s8  ;;  %p4567_p12 = scmp.lt.u32.totalorder %s4559_s8, %s7437_s7 }
 0x431   : > { %p4561_p7 = pnand %p4560_p4, %p4676_p5 }
 0x432   : > { %p4566_p11 = por %p4565_p10, %p4564_p9 }
 0x433   : > { %p4562_p8 = pneg %p4561_p7 }
 0x434   : > { %p4568_p13 = por %p4567_p12, %p4566_p11 }
 0x436   : > { %p4569_p0 = pnand %p4568_p13, %p4562_p8 }
 0x438   : > { %4572 = shalt.err (!%p4569_p0)
}
 0x439   : > { %s4616_s27 = smov 128   ;;  %s4617_s28 = smov 8  }
 0x43a   : > { %4365 = dma.vmem_to_hbm [thread:$0]  (%p4676_p5), %s7439_s4, 4096, %s7437_s7, %s7445_s16, %s4616_s27, %s4616_s27, %s4617_s28  }
 0x43b PF: > { %p4371_p1 = scmp.ge.s32.totalorder %s4607_s15, 2  ;;  %s3924_s29 = sand.u32 1, %s4595_s12  }
 0x43c   : > { %s3925_s30 = scalar_lea.sflag [#allocation3], %s3924_s29 }
 0x43d   : > { %p4368_p2 = pnand %p4371_p1, %p4680_p6 }
 0x43f   : > { %4590 = dma.done.wait (!%p4368_p2), %s3925_s30, 4096  }
 0x440   : > { %4592 = vsyncadd (!%p4368_p2), %s3925_s30, 4294963200  ;;  %p13_p3 = scmp.ge.s32.totalorder %s4663_s18, 4   ;;  %s7552_s12 = smov %s4599_s13 }
 0x441   : > { %s7553_s13 = smov %s4603_s14  ;;  %s7554_s14 = smov %s4674_s21 }
 0x442   : > { %s7555_s15 = smov %s4663_s18  ;;  %15 = sbr.rel (!%p13_p3) target bundleno = 3 (0x3), region = 67 }
 0x449   :  { %3930 = vsyncpa [#allocation3], 1 }
 0x44a   :  { %3932 = vsyncpa [#allocation3 + $0x1], 1 }

</bundles_post_ra>
